<compile_context>
chip_gen: v6e
topology: v6e:2x2x1
jax: 0.10.0
libtpu: 0.0.40
codegen_flags: <defaults>
</compile_context>

<pallas_src>
import math

import numpy as np
import jax
import jax.numpy as jnp
from jax import lax
from jax.experimental import pallas as pl
from jax.experimental.pallas import tpu as pltpu


def _round_up(n: int, m: int) -> int:
    return ((n + m - 1) // m) * m


def _make_fpfh_kernel(P: int, num_bins: int, TI: int, TJ: int):
    nb = num_bins
    nb3 = nb * nb * nb
    # Bin boundaries for values in [-1, 1]:  t_b = 2*b/nb - 1,  b = 1..nb-1.
    bounds = [2.0 * b / nb - 1.0 for b in range(1, nb)]
    n_words = (nb + 1) // 2          # theta bins packed 2-per-int32 word
    SHIFT = 1 << 15                  # 15-bit fields: per-column count <= TI < 2^15
    assert TI < SHIFT and TI * (SHIFT + 1) < 2 ** 31, "TI too large for packed int32 fields"

    def kernel(x_ref, xt_ref, out_ref):
        ti = pl.program_id(1)
        tj = pl.program_id(2)

        # j is the reduction axis: zero the resident (1, nb3) accumulator at the first j step.
        @pl.when(tj == 0)
        def _init():
            out_ref[...] = jnp.zeros_like(out_ref)

        xi = x_ref[0]     # (TI, 6): point "i" on sublanes
        xj = xt_ref[0]    # (6, TJ): point "j" on lanes

        pxi, pyi, pzi = xi[:, 0:1], xi[:, 1:2], xi[:, 2:3]    # (TI, 1)
        nxi, nyi, nzi = xi[:, 3:4], xi[:, 4:5], xi[:, 5:6]
        pxj, pyj, pzj = xj[0:1, :], xj[1:2, :], xj[2:3, :]    # (1, TJ)
        nxj, nyj, nzj = xj[3:4, :], xj[4:5, :], xj[5:6, :]

        # delta[i, j] = p_j - p_i                              (all (TI, TJ) f32)
        dx, dy, dz = pxj - pxi, pyj - pyi, pzj - pzi
        dist = jnp.sqrt(dx * dx + dy * dy + dz * dz)

        # v = normalize(cross(delta, n_i)); EUP rsqrt instead of sqrt + 3 divides.
        vx = dy * nzi - dz * nyi
        vy = dz * nxi - dx * nzi
        vz = dx * nyi - dy * nxi
        inv_vn = lax.rsqrt(vx * vx + vy * vy + vz * vz + 1e-12)
        vx, vy, vz = vx * inv_vn, vy * inv_vn, vz * inv_vn

        # w = normalize(cross(n_i, v)), also via rsqrt (exactly matches the module for
        # unit normals; keeps the explicit normalization for non-unit inputs).
        wx = nyi * vz - nzi * vy
        wy = nzi * vx - nxi * vz
        wz = nxi * vy - nyi * vx
        inv_wn = lax.rsqrt(wx * wx + wy * wy + wz * wz + 1e-12)
        wx, wy, wz = wx * inv_wn, wy * inv_wn, wz * inv_wn

        alpha = vx * nxj + vy * nyj + vz * nzj
        d_dot = nxi * dx + nyi * dy + nzi * dz      # n_i . delta (phi numerator)
        w_nj = wx * nxj + wy * nyj + wz * nzj
        u_nj = nxi * nxj + nyi * nyj + nzi * nzj

        # idx = min(trunc(((val + 1)/2) * nb), nb - 1)  ==  #{boundaries t_b : val >= t_b}
        a_idx = jnp.zeros((TI, TJ), jnp.int32)
        for t in bounds:
            a_idx = a_idx + (alpha >= t).astype(jnp.int32)

        # phi = d_dot / (dist + 1e-6):  phi >= t  <=>  d_dot >= t*(dist + 1e-6)
        distps = dist + 1e-6
        p_idx = jnp.zeros((TI, TJ), jnp.int32)
        for t in bounds:
            p_idx = p_idx + (d_dot >= t * distps).astype(jnp.int32)

        # theta = atan2(w_nj, u_nj)/pi, binned with exact half-plane tests.
        t_idx = jnp.zeros((TI, TJ), jnp.int32)
        for frac in bounds:
            ang = math.pi * frac
            c, s = math.cos(ang), math.sin(ang)
            crossb = c * w_nj - s * u_nj            # sign of sin(theta - boundary_angle)
            if frac > 0.0:
                ind = (crossb >= 0.0) & (w_nj >= 0.0)
            elif frac < 0.0:
                ind = (crossb >= 0.0) | (w_nj >= 0.0)
            else:
                ind = w_nj >= 0.0
            t_idx = t_idx + ind.astype(jnp.int32)

        # Validity mask: inside the real P x P square and off-diagonal (i != j).
        gi = ti * TI + lax.broadcasted_iota(jnp.int32, (TI, TJ), 0)
        gj = tj * TJ + lax.broadcasted_iota(jnp.int32, (TI, TJ), 1)
        valid = (gi != gj) & (gi < P) & (gj < P)

        # Pack pairs of theta bins into 15-bit fields of one int32 word each; validity is
        # folded in once here so every bin automatically excludes padded / diagonal pairs.
        words = []
        for w in range(n_words):
            t0 = 2 * w
            word = jnp.where(t_idx == t0, 1, 0).astype(jnp.int32)
            if t0 + 1 < nb:
                word = word + jnp.where(t_idx == t0 + 1, SHIFT, 0)
            words.append(jnp.where(valid, word, 0))

        ap_idx = a_idx * nb + p_idx                         # combined (alpha, phi) index
        lane_bins = lax.broadcasted_iota(jnp.int32, (1, nb3), 1)
        hist = jnp.zeros((1, nb3), jnp.int32)
        for ap in range(nb * nb):
            m_ap = ap_idx == ap
            for w in range(n_words):
                sel = jnp.where(m_ap, words[w], 0)
                # Sublane-axis reduction first: vreg-row adds on the VPU, a single
                # cross-lane XLU reduce only on the final (1, TJ) row.
                col = jnp.sum(sel, axis=0, keepdims=True)   # (1, TJ) int32, exact
                hi = jnp.right_shift(col, 15)               # theta bin 2w+1 per column
                lo = col - hi * SHIFT                       # theta bin 2w   per column
                b_lo = ap * nb + 2 * w
                c_lo = jnp.sum(lo, keepdims=True)           # (1, 1) int32
                hist = hist + jnp.where(lane_bins == b_lo, c_lo, 0)
                if 2 * w + 1 < nb:
                    c_hi = jnp.sum(hi, keepdims=True)
                    hist = hist + jnp.where(lane_bins == b_lo + 1, c_hi, 0)

        # Exact int32 accumulation across j tiles (finalized / normalized on the host).
        out_ref[0, 0] = out_ref[0, 0] + hist

    return kernel


def fpfh_extract(x, num_bins, *, tile_i=256, tile_j=256):
    """Pallas implementation of HandcraftedFPFHExtractor.forward.  x: (B, P, 6) float32."""
    B, P, C = x.shape
    assert C == 6
    nb3 = num_bins ** 3
    x = x.astype(jnp.float32)

    # i side lives on sublanes: tile must be a multiple of 8.
    TI = min(_round_up(tile_i, 8), _round_up(P, 8))
    Ppi = _round_up(P, TI)
    # j side lives on lanes: tile must be a multiple of 128 (or the full dim for small P).
    if P < 128:
        TJ, Ppj = P, P
    else:
        TJ = min(_round_up(tile_j, 128), _round_up(P, 128))
        Ppj = _round_up(P, TJ)

    xi = jnp.pad(x, ((0, 0), (0, Ppi - P), (0, 0))) if Ppi != P else x
    xt = jnp.transpose(x, (0, 2, 1))                    # (B, 6, P): "j" on lanes
    if Ppj != P:
        xt = jnp.pad(xt, ((0, 0), (0, 0), (0, Ppj - P)))

    nI, nJ = Ppi // TI, Ppj // TJ
    kernel = _make_fpfh_kernel(P, num_bins, TI, TJ)
    counts = pl.pallas_call(
        kernel,
        out_shape=jax.ShapeDtypeStruct((B, nI, 1, nb3), jnp.int32),
        grid=(B, nI, nJ),
        in_specs=[
            pl.BlockSpec((1, TI, 6), lambda b, i, j: (b, i, 0)),
            pl.BlockSpec((1, 6, TJ), lambda b, i, j: (b, 0, j)),
        ],
        out_specs=pl.BlockSpec((1, 1, 1, nb3), lambda b, i, j: (b, i, 0, 0)),
        compiler_params=pltpu.CompilerParams(
            dimension_semantics=("parallel", "parallel", "arbitrary")),
    )(xi, xt)

    # Per-(b, i-split) integer partial histograms -> exact totals -> frequencies.
    total = jnp.sum(counts[:, :, 0, :], axis=1)         # (B, nb3) int32, exact
    return total.astype(jnp.float32) / float(P * (P - 1))


def fpfh_reference(x, num_bins):
    """Pure-JAX mirror of the PyTorch forward (uses jnp.arctan2), for verification."""
    B, P, _ = x.shape
    nb = num_bins
    pos = x[:, :, 0:3]
    ori = x[:, :, 3:6]
    pi_ = pos[:, :, None, :]
    pj = pos[:, None, :, :]
    ni = ori[:, :, None, :]
    nj = ori[:, None, :, :]
    delta = pj - pi_
    dist = jnp.sqrt(jnp.sum(delta * delta, axis=3, keepdims=True))
    ni_b = jnp.broadcast_to(ni, delta.shape)
    v = jnp.cross(delta, ni_b, axis=3)
    v = v / (jnp.linalg.norm(v, axis=3, keepdims=True) + 1e-6)
    w = jnp.cross(ni_b, v, axis=3)
    w = w / (jnp.linalg.norm(w, axis=3, keepdims=True) + 1e-6)
    alpha = jnp.sum(v * nj, axis=3)
    phi = jnp.sum(ni * delta, axis=3) / (dist[..., 0] + 1e-6)
    w_nj = jnp.sum(w * nj, axis=3)
    u_nj = jnp.sum(ni * nj, axis=3)
    theta = jnp.arctan2(w_nj, u_nj) / np.pi

    def bin01(val):
        idx = (((val + 1.0) / 2.0) * nb).astype(jnp.int32)
        return jnp.where(idx == nb, nb - 1, idx)

    a_idx, p_idx, t_idx = bin01(alpha), bin01(phi), bin01(theta)
    fpfh_idx = (a_idx * nb + p_idx) * nb + t_idx            # (B, P, P)
    offdiag = ~jnp.eye(P, dtype=bool)
    onehot = (fpfh_idx[..., None] == jnp.arange(nb ** 3)) & offdiag[None, :, :, None]
    freq = jnp.sum(onehot, axis=(1, 2)).astype(jnp.float32) / (P * (P - 1))
    return freq


if __name__ == "__main__":
    num_bins = 4            # -> 64-dim FPFH descriptor

    # --- small smoke test: B=2 point clouds, 8 points, 6 features (pos + normal) ---
    B, P = 2, 8
    key = jax.random.PRNGKey(0)
    kp, kn = jax.random.split(key)
    pos = jax.random.normal(kp, (B, P, 3), dtype=jnp.float32)
    nrm = jax.random.normal(kn, (B, P, 3), dtype=jnp.float32)
    nrm = nrm / jnp.linalg.norm(nrm, axis=-1, keepdims=True)  # unit normals, as FPFH expects
    x = jnp.concatenate([pos, nrm], axis=-1)                  # (B, P, 6)

    out = jax.block_until_ready(fpfh_extract(x, num_bins))
    ref = jax.block_until_ready(fpfh_reference(x, num_bins))
    assert out.shape == (B, num_bins ** 3), out.shape
    # Each histogram is a distribution over the P*(P-1) off-diagonal pairs.
    assert np.allclose(np.asarray(jnp.sum(out, axis=1)), 1.0, atol=1e-5)
    max_diff = float(jnp.max(jnp.abs(out - ref)))
    # rsqrt(+1e-12) vs /(norm+1e-6) and the half-plane theta tests may move at most a
    # boundary-tie pair relative to the divide + atan2 reference.
    assert max_diff <= 1.5 / (P * (P - 1)) + 1e-6, f"max diff too large: {max_diff}"

    # --- larger test exercising the (i, j) tiling, padding and masking paths ---
    B2, P2 = 1, 200
    k2p, k2n = jax.random.split(jax.random.PRNGKey(1))
    pos2 = jax.random.normal(k2p, (B2, P2, 3), dtype=jnp.float32)
    nrm2 = jax.random.normal(k2n, (B2, P2, 3), dtype=jnp.float32)
    nrm2 = nrm2 / jnp.linalg.norm(nrm2, axis=-1, keepdims=True)
    x2 = jnp.concatenate([pos2, nrm2], axis=-1)
    out2 = jax.block_until_ready(fpfh_extract(x2, num_bins, tile_i=64, tile_j=128))
    ref2 = jax.block_until_ready(fpfh_reference(x2, num_bins))
    assert np.allclose(np.asarray(jnp.sum(out2, axis=1)), 1.0, atol=1e-5)
    l1 = float(jnp.sum(jnp.abs(out2 - ref2)))
    # Allow a handful of boundary-tie pairs out of ~40K; any structural error is >> this.
    assert l1 <= 12.0 / (P2 * (P2 - 1)) + 1e-6, f"L1 diff too large: {l1}"

    print("KERNEL_OK")
</pallas_src>

<mosaic_0001>
module attributes {stable_mosaic.version = 11 : i64} {
  func.func @kernel(%arg0: i32, %arg1: i32, %arg2: i32, %arg3: memref<1x8x6xf32, #tpu.memory_space<vmem>>, %arg4: memref<1x6x8xf32, #tpu.memory_space<vmem>>, %arg5: memref<1x1x1x64xi32, #tpu.memory_space<vmem>>) attributes {dimension_semantics = [#tpu.dimension_semantics<parallel>, #tpu.dimension_semantics<parallel>, #tpu.dimension_semantics<arbitrary>], iteration_bounds = array<i64: 2, 1, 1>, scalar_prefetch = 0 : i64, scratch_operands = 0 : i64, tpu.core_type = #tpu.core_type<tc>, window_params = [{transform_indices = @transform_0, window_bounds = array<i64: 1, 8, 6>}, {transform_indices = @transform_1, window_bounds = array<i64: 1, 6, 8>}, {transform_indices = @transform_2, window_bounds = array<i64: 1, 1, 1, 64>}]} {
    %c0_i32 = arith.constant 0 : i32
    %0 = arith.cmpi eq, %arg2, %c0_i32 : i32
    %1 = arith.extui %0 : i1 to i32
    %c0_i32_0 = arith.constant 0 : i32
    %2 = arith.cmpi ne, %1, %c0_i32_0 : i32
    scf.if %2 {
      %c0_i32_326 = arith.constant 0 : i32
      %1321 = vector.broadcast %c0_i32_326 : i32 to vector<1x1x1x64xi32>
      %c0_327 = arith.constant 0 : index
      %c0_328 = arith.constant 0 : index
      %c0_329 = arith.constant 0 : index
      %c0_330 = arith.constant 0 : index
      %1322 = vector.load %arg5[%c0_327, %c0_328, %c0_329, %c0_330] : memref<1x1x1x64xi32, #tpu.memory_space<vmem>>, vector<1x1x1x64xi32>
      tpu.vector_store %arg5[%c0_327, %c0_328, %c0_329, %c0_330], %1321 {strides = array<i32>} : memref<1x1x1x64xi32, #tpu.memory_space<vmem>>, vector<1x1x1x64xi32>,
    } else {
    }
    %c0 = arith.constant 0 : index
    %c0_1 = arith.constant 0 : index
    %c0_2 = arith.constant 0 : index
    %3 = vector.load %arg3[%c0, %c0_1, %c0_2] : memref<1x8x6xf32, #tpu.memory_space<vmem>>, vector<1x8x6xf32>
    %4 = vector.shape_cast %3 : vector<1x8x6xf32> to vector<8x6xf32>
    %c0_3 = arith.constant 0 : index
    %c0_4 = arith.constant 0 : index
    %c0_5 = arith.constant 0 : index
    %5 = vector.load %arg4[%c0_3, %c0_4, %c0_5] : memref<1x6x8xf32, #tpu.memory_space<vmem>>, vector<1x6x8xf32>
    %6 = vector.shape_cast %5 : vector<1x6x8xf32> to vector<6x8xf32>
    %7 = vector.extract_strided_slice %4 {offsets = [0, 0], sizes = [8, 1], strides = [1, 1]} : vector<8x6xf32> to vector<8x1xf32>
    %8 = vector.extract_strided_slice %4 {offsets = [0, 1], sizes = [8, 1], strides = [1, 1]} : vector<8x6xf32> to vector<8x1xf32>
    %9 = vector.extract_strided_slice %4 {offsets = [0, 2], sizes = [8, 1], strides = [1, 1]} : vector<8x6xf32> to vector<8x1xf32>
    %10 = vector.extract_strided_slice %4 {offsets = [0, 3], sizes = [8, 1], strides = [1, 1]} : vector<8x6xf32> to vector<8x1xf32>
    %11 = vector.extract_strided_slice %4 {offsets = [0, 4], sizes = [8, 1], strides = [1, 1]} : vector<8x6xf32> to vector<8x1xf32>
    %12 = vector.extract_strided_slice %4 {offsets = [0, 5], sizes = [8, 1], strides = [1, 1]} : vector<8x6xf32> to vector<8x1xf32>
    %13 = vector.extract_strided_slice %6 {offsets = [0, 0], sizes = [1, 8], strides = [1, 1]} : vector<6x8xf32> to vector<1x8xf32>
    %14 = vector.extract_strided_slice %6 {offsets = [1, 0], sizes = [1, 8], strides = [1, 1]} : vector<6x8xf32> to vector<1x8xf32>
    %15 = vector.extract_strided_slice %6 {offsets = [2, 0], sizes = [1, 8], strides = [1, 1]} : vector<6x8xf32> to vector<1x8xf32>
    %16 = vector.extract_strided_slice %6 {offsets = [3, 0], sizes = [1, 8], strides = [1, 1]} : vector<6x8xf32> to vector<1x8xf32>
    %17 = vector.extract_strided_slice %6 {offsets = [4, 0], sizes = [1, 8], strides = [1, 1]} : vector<6x8xf32> to vector<1x8xf32>
    %18 = vector.extract_strided_slice %6 {offsets = [5, 0], sizes = [1, 8], strides = [1, 1]} : vector<6x8xf32> to vector<1x8xf32>
    %19 = vector.broadcast %13 : vector<1x8xf32> to vector<8x8xf32>
    %20 = vector.broadcast %7 : vector<8x1xf32> to vector<8x8xf32>
    %21 = arith.subf %19, %20 : vector<8x8xf32>
    %22 = vector.broadcast %14 : vector<1x8xf32> to vector<8x8xf32>
    %23 = vector.broadcast %8 : vector<8x1xf32> to vector<8x8xf32>
    %24 = arith.subf %22, %23 : vector<8x8xf32>
    %25 = vector.broadcast %15 : vector<1x8xf32> to vector<8x8xf32>
    %26 = vector.broadcast %9 : vector<8x1xf32> to vector<8x8xf32>
    %27 = arith.subf %25, %26 : vector<8x8xf32>
    %28 = arith.mulf %21, %21 : vector<8x8xf32>
    %29 = arith.mulf %24, %24 : vector<8x8xf32>
    %30 = arith.addf %28, %29 : vector<8x8xf32>
    %31 = arith.mulf %27, %27 : vector<8x8xf32>
    %32 = arith.addf %30, %31 : vector<8x8xf32>
    %33 = math.sqrt %32 : vector<8x8xf32>
    %34 = vector.broadcast %12 : vector<8x1xf32> to vector<8x8xf32>
    %35 = arith.mulf %24, %34 : vector<8x8xf32>
    %36 = vector.broadcast %11 : vector<8x1xf32> to vector<8x8xf32>
    %37 = arith.mulf %27, %36 : vector<8x8xf32>
    %38 = arith.subf %35, %37 : vector<8x8xf32>
    %39 = vector.broadcast %10 : vector<8x1xf32> to vector<8x8xf32>
    %40 = arith.mulf %27, %39 : vector<8x8xf32>
    %41 = vector.broadcast %12 : vector<8x1xf32> to vector<8x8xf32>
    %42 = arith.mulf %21, %41 : vector<8x8xf32>
    %43 = arith.subf %40, %42 : vector<8x8xf32>
    %44 = vector.broadcast %11 : vector<8x1xf32> to vector<8x8xf32>
    %45 = arith.mulf %21, %44 : vector<8x8xf32>
    %46 = vector.broadcast %10 : vector<8x1xf32> to vector<8x8xf32>
    %47 = arith.mulf %24, %46 : vector<8x8xf32>
    %48 = arith.subf %45, %47 : vector<8x8xf32>
    %49 = arith.mulf %38, %38 : vector<8x8xf32>
    %50 = arith.mulf %43, %43 : vector<8x8xf32>
    %51 = arith.addf %49, %50 : vector<8x8xf32>
    %52 = arith.mulf %48, %48 : vector<8x8xf32>
    %53 = arith.addf %51, %52 : vector<8x8xf32>
    %cst = arith.constant 9.99999996E-13 : f32
    %54 = vector.broadcast %cst : f32 to vector<8x8xf32>
    %55 = arith.addf %53, %54 : vector<8x8xf32>
    %56 = math.rsqrt %55 : vector<8x8xf32>
    %57 = arith.mulf %38, %56 : vector<8x8xf32>
    %58 = arith.mulf %43, %56 : vector<8x8xf32>
    %59 = arith.mulf %48, %56 : vector<8x8xf32>
    %60 = vector.broadcast %11 : vector<8x1xf32> to vector<8x8xf32>
    %61 = arith.mulf %60, %59 : vector<8x8xf32>
    %62 = vector.broadcast %12 : vector<8x1xf32> to vector<8x8xf32>
    %63 = arith.mulf %62, %58 : vector<8x8xf32>
    %64 = arith.subf %61, %63 : vector<8x8xf32>
    %65 = vector.broadcast %12 : vector<8x1xf32> to vector<8x8xf32>
    %66 = arith.mulf %65, %57 : vector<8x8xf32>
    %67 = vector.broadcast %10 : vector<8x1xf32> to vector<8x8xf32>
    %68 = arith.mulf %67, %59 : vector<8x8xf32>
    %69 = arith.subf %66, %68 : vector<8x8xf32>
    %70 = vector.broadcast %10 : vector<8x1xf32> to vector<8x8xf32>
    %71 = arith.mulf %70, %58 : vector<8x8xf32>
    %72 = vector.broadcast %11 : vector<8x1xf32> to vector<8x8xf32>
    %73 = arith.mulf %72, %57 : vector<8x8xf32>
    %74 = arith.subf %71, %73 : vector<8x8xf32>
    %75 = arith.mulf %64, %64 : vector<8x8xf32>
    %76 = arith.mulf %69, %69 : vector<8x8xf32>
    %77 = arith.addf %75, %76 : vector<8x8xf32>
    %78 = arith.mulf %74, %74 : vector<8x8xf32>
    %79 = arith.addf %77, %78 : vector<8x8xf32>
    %cst_6 = arith.constant 9.99999996E-13 : f32
    %80 = vector.broadcast %cst_6 : f32 to vector<8x8xf32>
    %81 = arith.addf %79, %80 : vector<8x8xf32>
    %82 = math.rsqrt %81 : vector<8x8xf32>
    %83 = arith.mulf %64, %82 : vector<8x8xf32>
    %84 = arith.mulf %69, %82 : vector<8x8xf32>
    %85 = arith.mulf %74, %82 : vector<8x8xf32>
    %86 = vector.broadcast %16 : vector<1x8xf32> to vector<8x8xf32>
    %87 = arith.mulf %57, %86 : vector<8x8xf32>
    %88 = vector.broadcast %17 : vector<1x8xf32> to vector<8x8xf32>
    %89 = arith.mulf %58, %88 : vector<8x8xf32>
    %90 = arith.addf %87, %89 : vector<8x8xf32>
    %91 = vector.broadcast %18 : vector<1x8xf32> to vector<8x8xf32>
    %92 = arith.mulf %59, %91 : vector<8x8xf32>
    %93 = arith.addf %90, %92 : vector<8x8xf32>
    %94 = vector.broadcast %10 : vector<8x1xf32> to vector<8x8xf32>
    %95 = arith.mulf %94, %21 : vector<8x8xf32>
    %96 = vector.broadcast %11 : vector<8x1xf32> to vector<8x8xf32>
    %97 = arith.mulf %96, %24 : vector<8x8xf32>
    %98 = arith.addf %95, %97 : vector<8x8xf32>
    %99 = vector.broadcast %12 : vector<8x1xf32> to vector<8x8xf32>
    %100 = arith.mulf %99, %27 : vector<8x8xf32>
    %101 = arith.addf %98, %100 : vector<8x8xf32>
    %102 = vector.broadcast %16 : vector<1x8xf32> to vector<8x8xf32>
    %103 = arith.mulf %83, %102 : vector<8x8xf32>
    %104 = vector.broadcast %17 : vector<1x8xf32> to vector<8x8xf32>
    %105 = arith.mulf %84, %104 : vector<8x8xf32>
    %106 = arith.addf %103, %105 : vector<8x8xf32>
    %107 = vector.broadcast %18 : vector<1x8xf32> to vector<8x8xf32>
    %108 = arith.mulf %85, %107 : vector<8x8xf32>
    %109 = arith.addf %106, %108 : vector<8x8xf32>
    %110 = vector.broadcast %10 : vector<8x1xf32> to vector<8x8xf32>
    %111 = vector.broadcast %16 : vector<1x8xf32> to vector<8x8xf32>
    %112 = arith.mulf %110, %111 : vector<8x8xf32>
    %113 = vector.broadcast %11 : vector<8x1xf32> to vector<8x8xf32>
    %114 = vector.broadcast %17 : vector<1x8xf32> to vector<8x8xf32>
    %115 = arith.mulf %113, %114 : vector<8x8xf32>
    %116 = arith.addf %112, %115 : vector<8x8xf32>
    %117 = vector.broadcast %12 : vector<8x1xf32> to vector<8x8xf32>
    %118 = vector.broadcast %18 : vector<1x8xf32> to vector<8x8xf32>
    %119 = arith.mulf %117, %118 : vector<8x8xf32>
    %120 = arith.addf %116, %119 : vector<8x8xf32>
    %c0_i32_7 = arith.constant 0 : i32
    %121 = vector.broadcast %c0_i32_7 : i32 to vector<8x8xi32>
    %cst_8 = arith.constant -5.000000e-01 : f32
    %122 = vector.broadcast %cst_8 : f32 to vector<8x8xf32>
    %123 = arith.cmpf oge, %93, %122 : vector<8x8xf32>
    %124 = arith.extui %123 : vector<8x8xi1> to vector<8x8xi32>
    %125 = arith.addi %121, %124 : vector<8x8xi32>
    %cst_9 = arith.constant 0.000000e+00 : f32
    %126 = vector.broadcast %cst_9 : f32 to vector<8x8xf32>
    %127 = arith.cmpf oge, %93, %126 : vector<8x8xf32>
    %128 = arith.extui %127 : vector<8x8xi1> to vector<8x8xi32>
    %129 = arith.addi %125, %128 : vector<8x8xi32>
    %cst_10 = arith.constant 5.000000e-01 : f32
    %130 = vector.broadcast %cst_10 : f32 to vector<8x8xf32>
    %131 = arith.cmpf oge, %93, %130 : vector<8x8xf32>
    %132 = arith.extui %131 : vector<8x8xi1> to vector<8x8xi32>
    %133 = arith.addi %129, %132 : vector<8x8xi32>
    %cst_11 = arith.constant 9.99999997E-7 : f32
    %134 = vector.broadcast %cst_11 : f32 to vector<8x8xf32>
    %135 = arith.addf %33, %134 : vector<8x8xf32>
    %c0_i32_12 = arith.constant 0 : i32
    %136 = vector.broadcast %c0_i32_12 : i32 to vector<8x8xi32>
    %cst_13 = arith.constant -5.000000e-01 : f32
    %137 = vector.broadcast %cst_13 : f32 to vector<8x8xf32>
    %138 = arith.mulf %137, %135 : vector<8x8xf32>
    %139 = arith.cmpf oge, %101, %138 : vector<8x8xf32>
    %140 = arith.extui %139 : vector<8x8xi1> to vector<8x8xi32>
    %141 = arith.addi %136, %140 : vector<8x8xi32>
    %cst_14 = arith.constant 0.000000e+00 : f32
    %142 = vector.broadcast %cst_14 : f32 to vector<8x8xf32>
    %143 = arith.mulf %142, %135 : vector<8x8xf32>
    %144 = arith.cmpf oge, %101, %143 : vector<8x8xf32>
    %145 = arith.extui %144 : vector<8x8xi1> to vector<8x8xi32>
    %146 = arith.addi %141, %145 : vector<8x8xi32>
    %cst_15 = arith.constant 5.000000e-01 : f32
    %147 = vector.broadcast %cst_15 : f32 to vector<8x8xf32>
    %148 = arith.mulf %147, %135 : vector<8x8xf32>
    %149 = arith.cmpf oge, %101, %148 : vector<8x8xf32>
    %150 = arith.extui %149 : vector<8x8xi1> to vector<8x8xi32>
    %151 = arith.addi %146, %150 : vector<8x8xi32>
    %c0_i32_16 = arith.constant 0 : i32
    %152 = vector.broadcast %c0_i32_16 : i32 to vector<8x8xi32>
    %cst_17 = arith.constant 6.12323426E-17 : f32
    %153 = vector.broadcast %cst_17 : f32 to vector<8x8xf32>
    %154 = arith.mulf %153, %109 : vector<8x8xf32>
    %cst_18 = arith.constant -1.000000e+00 : f32
    %155 = vector.broadcast %cst_18 : f32 to vector<8x8xf32>
    %156 = arith.mulf %155, %120 : vector<8x8xf32>
    %157 = arith.subf %154, %156 : vector<8x8xf32>
    %cst_19 = arith.constant 0.000000e+00 : f32
    %158 = vector.broadcast %cst_19 : f32 to vector<8x8xf32>
    %159 = arith.cmpf oge, %157, %158 : vector<8x8xf32>
    %cst_20 = arith.constant 0.000000e+00 : f32
    %160 = vector.broadcast %cst_20 : f32 to vector<8x8xf32>
    %161 = arith.cmpf oge, %109, %160 : vector<8x8xf32>
    %162 = arith.ori %159, %161 : vector<8x8xi1>
    %163 = arith.extui %162 : vector<8x8xi1> to vector<8x8xi32>
    %164 = arith.addi %152, %163 : vector<8x8xi32>
    %cst_21 = arith.constant 0.000000e+00 : f32
    %165 = vector.broadcast %cst_21 : f32 to vector<8x8xf32>
    %166 = arith.cmpf oge, %109, %165 : vector<8x8xf32>
    %167 = arith.extui %166 : vector<8x8xi1> to vector<8x8xi32>
    %168 = arith.addi %164, %167 : vector<8x8xi32>
    %cst_22 = arith.constant 6.12323426E-17 : f32
    %169 = vector.broadcast %cst_22 : f32 to vector<8x8xf32>
    %170 = arith.mulf %169, %109 : vector<8x8xf32>
    %cst_23 = arith.constant 1.000000e+00 : f32
    %171 = vector.broadcast %cst_23 : f32 to vector<8x8xf32>
    %172 = arith.mulf %171, %120 : vector<8x8xf32>
    %173 = arith.subf %170, %172 : vector<8x8xf32>
    %cst_24 = arith.constant 0.000000e+00 : f32
    %174 = vector.broadcast %cst_24 : f32 to vector<8x8xf32>
    %175 = arith.cmpf oge, %173, %174 : vector<8x8xf32>
    %cst_25 = arith.constant 0.000000e+00 : f32
    %176 = vector.broadcast %cst_25 : f32 to vector<8x8xf32>
    %177 = arith.cmpf oge, %109, %176 : vector<8x8xf32>
    %178 = arith.andi %175, %177 : vector<8x8xi1>
    %179 = arith.extui %178 : vector<8x8xi1> to vector<8x8xi32>
    %180 = arith.addi %168, %179 : vector<8x8xi32>
    %c8_i32 = arith.constant 8 : i32
    %181 = arith.muli %arg1, %c8_i32 : i32
    %182 = tpu.iota {dimensions = array<i32: 0>} : vector<8x8xi32>
    %183 = vector.broadcast %181 : i32 to vector<8x8xi32>
    %184 = arith.addi %183, %182 : vector<8x8xi32>
    %c8_i32_26 = arith.constant 8 : i32
    %185 = arith.muli %arg2, %c8_i32_26 : i32
    %186 = tpu.iota {dimensions = array<i32: 1>} : vector<8x8xi32>
    %187 = vector.broadcast %185 : i32 to vector<8x8xi32>
    %188 = arith.addi %187, %186 : vector<8x8xi32>
    %189 = arith.cmpi ne, %184, %188 : vector<8x8xi32>
    %c8_i32_27 = arith.constant 8 : i32
    %190 = vector.broadcast %c8_i32_27 : i32 to vector<8x8xi32>
    %191 = arith.cmpi slt, %184, %190 : vector<8x8xi32>
    %192 = arith.andi %189, %191 : vector<8x8xi1>
    %c8_i32_28 = arith.constant 8 : i32
    %193 = vector.broadcast %c8_i32_28 : i32 to vector<8x8xi32>
    %194 = arith.cmpi slt, %188, %193 : vector<8x8xi32>
    %195 = arith.andi %192, %194 : vector<8x8xi1>
    %c0_i32_29 = arith.constant 0 : i32
    %196 = vector.broadcast %c0_i32_29 : i32 to vector<8x8xi32>
    %197 = arith.cmpi eq, %180, %196 : vector<8x8xi32>
    %c1_i32 = arith.constant 1 : i32
    %c0_i32_30 = arith.constant 0 : i32
    %198 = vector.broadcast %c1_i32 : i32 to vector<8x8xi32>
    %199 = vector.broadcast %c0_i32_30 : i32 to vector<8x8xi32>
    %200 = arith.select %197, %198, %199 : vector<8x8xi1>, vector<8x8xi32>
    %c1_i32_31 = arith.constant 1 : i32
    %201 = vector.broadcast %c1_i32_31 : i32 to vector<8x8xi32>
    %202 = arith.cmpi eq, %180, %201 : vector<8x8xi32>
    %c32768_i32 = arith.constant 32768 : i32
    %c0_i32_32 = arith.constant 0 : i32
    %203 = vector.broadcast %c32768_i32 : i32 to vector<8x8xi32>
    %204 = vector.broadcast %c0_i32_32 : i32 to vector<8x8xi32>
    %205 = arith.select %202, %203, %204 : vector<8x8xi1>, vector<8x8xi32>
    %206 = arith.addi %200, %205 : vector<8x8xi32>
    %c0_i32_33 = arith.constant 0 : i32
    %207 = vector.broadcast %c0_i32_33 : i32 to vector<8x8xi32>
    %208 = arith.select %195, %206, %207 : vector<8x8xi1>, vector<8x8xi32>
    %c2_i32 = arith.constant 2 : i32
    %209 = vector.broadcast %c2_i32 : i32 to vector<8x8xi32>
    %210 = arith.cmpi eq, %180, %209 : vector<8x8xi32>
    %c1_i32_34 = arith.constant 1 : i32
    %c0_i32_35 = arith.constant 0 : i32
    %211 = vector.broadcast %c1_i32_34 : i32 to vector<8x8xi32>
    %212 = vector.broadcast %c0_i32_35 : i32 to vector<8x8xi32>
    %213 = arith.select %210, %211, %212 : vector<8x8xi1>, vector<8x8xi32>
    %c3_i32 = arith.constant 3 : i32
    %214 = vector.broadcast %c3_i32 : i32 to vector<8x8xi32>
    %215 = arith.cmpi eq, %180, %214 : vector<8x8xi32>
    %c32768_i32_36 = arith.constant 32768 : i32
    %c0_i32_37 = arith.constant 0 : i32
    %216 = vector.broadcast %c32768_i32_36 : i32 to vector<8x8xi32>
    %217 = vector.broadcast %c0_i32_37 : i32 to vector<8x8xi32>
    %218 = arith.select %215, %216, %217 : vector<8x8xi1>, vector<8x8xi32>
    %219 = arith.addi %213, %218 : vector<8x8xi32>
    %c0_i32_38 = arith.constant 0 : i32
    %220 = vector.broadcast %c0_i32_38 : i32 to vector<8x8xi32>
    %221 = arith.select %195, %219, %220 : vector<8x8xi1>, vector<8x8xi32>
    %c4_i32 = arith.constant 4 : i32
    %222 = vector.broadcast %c4_i32 : i32 to vector<8x8xi32>
    %223 = arith.muli %133, %222 : vector<8x8xi32>
    %224 = arith.addi %223, %151 : vector<8x8xi32>
    %225 = tpu.iota {dimensions = array<i32: 1>} : vector<1x64xi32>
    %c0_i32_39 = arith.constant 0 : i32
    %226 = vector.broadcast %c0_i32_39 : i32 to vector<1x64xi32>
    %c0_i32_40 = arith.constant 0 : i32
    %227 = vector.broadcast %c0_i32_40 : i32 to vector<8x8xi32>
    %228 = arith.cmpi eq, %224, %227 : vector<8x8xi32>
    %c0_i32_41 = arith.constant 0 : i32
    %229 = vector.broadcast %c0_i32_41 : i32 to vector<8x8xi32>
    %230 = arith.select %228, %208, %229 : vector<8x8xi1>, vector<8x8xi32>
    %cst_42 = arith.constant dense<0> : vector<8xi32>
    %231 = vector.multi_reduction <add>, %230, %cst_42 [0] : vector<8x8xi32> to vector<8xi32>
    %232 = vector.shape_cast %231 : vector<8xi32> to vector<1x8xi32>
    %c15_i32 = arith.constant 15 : i32
    %233 = vector.broadcast %c15_i32 : i32 to vector<1x8xi32>
    %234 = arith.shrsi %232, %233 : vector<1x8xi32>
    %c32768_i32_43 = arith.constant 32768 : i32
    %235 = vector.broadcast %c32768_i32_43 : i32 to vector<1x8xi32>
    %236 = arith.muli %234, %235 : vector<1x8xi32>
    %237 = arith.subi %232, %236 : vector<1x8xi32>
    %238 = vector.shape_cast %237 : vector<1x8xi32> to vector<1x1x8xi32>
    %cst_44 = arith.constant dense<0> : vector<1xi32>
    %239 = vector.multi_reduction <add>, %238, %cst_44 [1, 2] : vector<1x1x8xi32> to vector<1xi32>
    %240 = vector.shape_cast %239 : vector<1xi32> to vector<1x1x1xi32>
    %241 = vector.extract %240[0, 0, 0] : i32 from vector<1x1x1xi32>
    %242 = vector.broadcast %241 : i32 to vector<1x1xi32>
    %c0_i32_45 = arith.constant 0 : i32
    %243 = vector.broadcast %c0_i32_45 : i32 to vector<1x64xi32>
    %244 = arith.cmpi eq, %225, %243 : vector<1x64xi32>
    %c0_i32_46 = arith.constant 0 : i32
    %245 = vector.shape_cast %242 : vector<1x1xi32> to vector<1x1xi32>
    %246 = vector.broadcast %245 : vector<1x1xi32> to vector<1x64xi32>
    %247 = vector.broadcast %c0_i32_46 : i32 to vector<1x64xi32>
    %248 = arith.select %244, %246, %247 : vector<1x64xi1>, vector<1x64xi32>
    %249 = arith.addi %226, %248 : vector<1x64xi32>
    %250 = vector.shape_cast %234 : vector<1x8xi32> to vector<1x1x8xi32>
    %cst_47 = arith.constant dense<0> : vector<1xi32>
    %251 = vector.multi_reduction <add>, %250, %cst_47 [1, 2] : vector<1x1x8xi32> to vector<1xi32>
    %252 = vector.shape_cast %251 : vector<1xi32> to vector<1x1x1xi32>
    %253 = vector.extract %252[0, 0, 0] : i32 from vector<1x1x1xi32>
    %254 = vector.broadcast %253 : i32 to vector<1x1xi32>
    %c1_i32_48 = arith.constant 1 : i32
    %255 = vector.broadcast %c1_i32_48 : i32 to vector<1x64xi32>
    %256 = arith.cmpi eq, %225, %255 : vector<1x64xi32>
    %c0_i32_49 = arith.constant 0 : i32
    %257 = vector.shape_cast %254 : vector<1x1xi32> to vector<1x1xi32>
    %258 = vector.broadcast %257 : vector<1x1xi32> to vector<1x64xi32>
    %259 = vector.broadcast %c0_i32_49 : i32 to vector<1x64xi32>
    %260 = arith.select %256, %258, %259 : vector<1x64xi1>, vector<1x64xi32>
    %261 = arith.addi %249, %260 : vector<1x64xi32>
    %c0_i32_50 = arith.constant 0 : i32
    %262 = vector.broadcast %c0_i32_50 : i32 to vector<8x8xi32>
    %263 = arith.select %228, %221, %262 : vector<8x8xi1>, vector<8x8xi32>
    %cst_51 = arith.constant dense<0> : vector<8xi32>
    %264 = vector.multi_reduction <add>, %263, %cst_51 [0] : vector<8x8xi32> to vector<8xi32>
    %265 = vector.shape_cast %264 : vector<8xi32> to vector<1x8xi32>
    %c15_i32_52 = arith.constant 15 : i32
    %266 = vector.broadcast %c15_i32_52 : i32 to vector<1x8xi32>
    %267 = arith.shrsi %265, %266 : vector<1x8xi32>
    %c32768_i32_53 = arith.constant 32768 : i32
    %268 = vector.broadcast %c32768_i32_53 : i32 to vector<1x8xi32>
    %269 = arith.muli %267, %268 : vector<1x8xi32>
    %270 = arith.subi %265, %269 : vector<1x8xi32>
    %271 = vector.shape_cast %270 : vector<1x8xi32> to vector<1x1x8xi32>
    %cst_54 = arith.constant dense<0> : vector<1xi32>
    %272 = vector.multi_reduction <add>, %271, %cst_54 [1, 2] : vector<1x1x8xi32> to vector<1xi32>
    %273 = vector.shape_cast %272 : vector<1xi32> to vector<1x1x1xi32>
    %274 = vector.extract %273[0, 0, 0] : i32 from vector<1x1x1xi32>
    %275 = vector.broadcast %274 : i32 to vector<1x1xi32>
    %c2_i32_55 = arith.constant 2 : i32
    %276 = vector.broadcast %c2_i32_55 : i32 to vector<1x64xi32>
    %277 = arith.cmpi eq, %225, %276 : vector<1x64xi32>
    %c0_i32_56 = arith.constant 0 : i32
    %278 = vector.shape_cast %275 : vector<1x1xi32> to vector<1x1xi32>
    %279 = vector.broadcast %278 : vector<1x1xi32> to vector<1x64xi32>
    %280 = vector.broadcast %c0_i32_56 : i32 to vector<1x64xi32>
    %281 = arith.select %277, %279, %280 : vector<1x64xi1>, vector<1x64xi32>
    %282 = arith.addi %261, %281 : vector<1x64xi32>
    %283 = vector.shape_cast %267 : vector<1x8xi32> to vector<1x1x8xi32>
    %cst_57 = arith.constant dense<0> : vector<1xi32>
    %284 = vector.multi_reduction <add>, %283, %cst_57 [1, 2] : vector<1x1x8xi32> to vector<1xi32>
    %285 = vector.shape_cast %284 : vector<1xi32> to vector<1x1x1xi32>
    %286 = vector.extract %285[0, 0, 0] : i32 from vector<1x1x1xi32>
    %287 = vector.broadcast %286 : i32 to vector<1x1xi32>
    %c3_i32_58 = arith.constant 3 : i32
    %288 = vector.broadcast %c3_i32_58 : i32 to vector<1x64xi32>
    %289 = arith.cmpi eq, %225, %288 : vector<1x64xi32>
    %c0_i32_59 = arith.constant 0 : i32
    %290 = vector.shape_cast %287 : vector<1x1xi32> to vector<1x1xi32>
    %291 = vector.broadcast %290 : vector<1x1xi32> to vector<1x64xi32>
    %292 = vector.broadcast %c0_i32_59 : i32 to vector<1x64xi32>
    %293 = arith.select %289, %291, %292 : vector<1x64xi1>, vector<1x64xi32>
    %294 = arith.addi %282, %293 : vector<1x64xi32>
    %c1_i32_60 = arith.constant 1 : i32
    %295 = vector.broadcast %c1_i32_60 : i32 to vector<8x8xi32>
    %296 = arith.cmpi eq, %224, %295 : vector<8x8xi32>
    %c0_i32_61 = arith.constant 0 : i32
    %297 = vector.broadcast %c0_i32_61 : i32 to vector<8x8xi32>
    %298 = arith.select %296, %208, %297 : vector<8x8xi1>, vector<8x8xi32>
    %cst_62 = arith.constant dense<0> : vector<8xi32>
    %299 = vector.multi_reduction <add>, %298, %cst_62 [0] : vector<8x8xi32> to vector<8xi32>
    %300 = vector.shape_cast %299 : vector<8xi32> to vector<1x8xi32>
    %c15_i32_63 = arith.constant 15 : i32
    %301 = vector.broadcast %c15_i32_63 : i32 to vector<1x8xi32>
    %302 = arith.shrsi %300, %301 : vector<1x8xi32>
    %c32768_i32_64 = arith.constant 32768 : i32
    %303 = vector.broadcast %c32768_i32_64 : i32 to vector<1x8xi32>
    %304 = arith.muli %302, %303 : vector<1x8xi32>
    %305 = arith.subi %300, %304 : vector<1x8xi32>
    %306 = vector.shape_cast %305 : vector<1x8xi32> to vector<1x1x8xi32>
    %cst_65 = arith.constant dense<0> : vector<1xi32>
    %307 = vector.multi_reduction <add>, %306, %cst_65 [1, 2] : vector<1x1x8xi32> to vector<1xi32>
    %308 = vector.shape_cast %307 : vector<1xi32> to vector<1x1x1xi32>
    %309 = vector.extract %308[0, 0, 0] : i32 from vector<1x1x1xi32>
    %310 = vector.broadcast %309 : i32 to vector<1x1xi32>
    %c4_i32_66 = arith.constant 4 : i32
    %311 = vector.broadcast %c4_i32_66 : i32 to vector<1x64xi32>
    %312 = arith.cmpi eq, %225, %311 : vector<1x64xi32>
    %c0_i32_67 = arith.constant 0 : i32
    %313 = vector.shape_cast %310 : vector<1x1xi32> to vector<1x1xi32>
    %314 = vector.broadcast %313 : vector<1x1xi32> to vector<1x64xi32>
    %315 = vector.broadcast %c0_i32_67 : i32 to vector<1x64xi32>
    %316 = arith.select %312, %314, %315 : vector<1x64xi1>, vector<1x64xi32>
    %317 = arith.addi %294, %316 : vector<1x64xi32>
    %318 = vector.shape_cast %302 : vector<1x8xi32> to vector<1x1x8xi32>
    %cst_68 = arith.constant dense<0> : vector<1xi32>
    %319 = vector.multi_reduction <add>, %318, %cst_68 [1, 2] : vector<1x1x8xi32> to vector<1xi32>
    %320 = vector.shape_cast %319 : vector<1xi32> to vector<1x1x1xi32>
    %321 = vector.extract %320[0, 0, 0] : i32 from vector<1x1x1xi32>
    %322 = vector.broadcast %321 : i32 to vector<1x1xi32>
    %c5_i32 = arith.constant 5 : i32
    %323 = vector.broadcast %c5_i32 : i32 to vector<1x64xi32>
    %324 = arith.cmpi eq, %225, %323 : vector<1x64xi32>
    %c0_i32_69 = arith.constant 0 : i32
    %325 = vector.shape_cast %322 : vector<1x1xi32> to vector<1x1xi32>
    %326 = vector.broadcast %325 : vector<1x1xi32> to vector<1x64xi32>
    %327 = vector.broadcast %c0_i32_69 : i32 to vector<1x64xi32>
    %328 = arith.select %324, %326, %327 : vector<1x64xi1>, vector<1x64xi32>
    %329 = arith.addi %317, %328 : vector<1x64xi32>
    %c0_i32_70 = arith.constant 0 : i32
    %330 = vector.broadcast %c0_i32_70 : i32 to vector<8x8xi32>
    %331 = arith.select %296, %221, %330 : vector<8x8xi1>, vector<8x8xi32>
    %cst_71 = arith.constant dense<0> : vector<8xi32>
    %332 = vector.multi_reduction <add>, %331, %cst_71 [0] : vector<8x8xi32> to vector<8xi32>
    %333 = vector.shape_cast %332 : vector<8xi32> to vector<1x8xi32>
    %c15_i32_72 = arith.constant 15 : i32
    %334 = vector.broadcast %c15_i32_72 : i32 to vector<1x8xi32>
    %335 = arith.shrsi %333, %334 : vector<1x8xi32>
    %c32768_i32_73 = arith.constant 32768 : i32
    %336 = vector.broadcast %c32768_i32_73 : i32 to vector<1x8xi32>
    %337 = arith.muli %335, %336 : vector<1x8xi32>
    %338 = arith.subi %333, %337 : vector<1x8xi32>
    %339 = vector.shape_cast %338 : vector<1x8xi32> to vector<1x1x8xi32>
    %cst_74 = arith.constant dense<0> : vector<1xi32>
    %340 = vector.multi_reduction <add>, %339, %cst_74 [1, 2] : vector<1x1x8xi32> to vector<1xi32>
    %341 = vector.shape_cast %340 : vector<1xi32> to vector<1x1x1xi32>
    %342 = vector.extract %341[0, 0, 0] : i32 from vector<1x1x1xi32>
    %343 = vector.broadcast %342 : i32 to vector<1x1xi32>
    %c6_i32 = arith.constant 6 : i32
    %344 = vector.broadcast %c6_i32 : i32 to vector<1x64xi32>
    %345 = arith.cmpi eq, %225, %344 : vector<1x64xi32>
    %c0_i32_75 = arith.constant 0 : i32
    %346 = vector.shape_cast %343 : vector<1x1xi32> to vector<1x1xi32>
    %347 = vector.broadcast %346 : vector<1x1xi32> to vector<1x64xi32>
    %348 = vector.broadcast %c0_i32_75 : i32 to vector<1x64xi32>
    %349 = arith.select %345, %347, %348 : vector<1x64xi1>, vector<1x64xi32>
    %350 = arith.addi %329, %349 : vector<1x64xi32>
    %351 = vector.shape_cast %335 : vector<1x8xi32> to vector<1x1x8xi32>
    %cst_76 = arith.constant dense<0> : vector<1xi32>
    %352 = vector.multi_reduction <add>, %351, %cst_76 [1, 2] : vector<1x1x8xi32> to vector<1xi32>
    %353 = vector.shape_cast %352 : vector<1xi32> to vector<1x1x1xi32>
    %354 = vector.extract %353[0, 0, 0] : i32 from vector<1x1x1xi32>
    %355 = vector.broadcast %354 : i32 to vector<1x1xi32>
    %c7_i32 = arith.constant 7 : i32
    %356 = vector.broadcast %c7_i32 : i32 to vector<1x64xi32>
    %357 = arith.cmpi eq, %225, %356 : vector<1x64xi32>
    %c0_i32_77 = arith.constant 0 : i32
    %358 = vector.shape_cast %355 : vector<1x1xi32> to vector<1x1xi32>
    %359 = vector.broadcast %358 : vector<1x1xi32> to vector<1x64xi32>
    %360 = vector.broadcast %c0_i32_77 : i32 to vector<1x64xi32>
    %361 = arith.select %357, %359, %360 : vector<1x64xi1>, vector<1x64xi32>
    %362 = arith.addi %350, %361 : vector<1x64xi32>
    %c2_i32_78 = arith.constant 2 : i32
    %363 = vector.broadcast %c2_i32_78 : i32 to vector<8x8xi32>
    %364 = arith.cmpi eq, %224, %363 : vector<8x8xi32>
    %c0_i32_79 = arith.constant 0 : i32
    %365 = vector.broadcast %c0_i32_79 : i32 to vector<8x8xi32>
    %366 = arith.select %364, %208, %365 : vector<8x8xi1>, vector<8x8xi32>
    %cst_80 = arith.constant dense<0> : vector<8xi32>
    %367 = vector.multi_reduction <add>, %366, %cst_80 [0] : vector<8x8xi32> to vector<8xi32>
    %368 = vector.shape_cast %367 : vector<8xi32> to vector<1x8xi32>
    %c15_i32_81 = arith.constant 15 : i32
    %369 = vector.broadcast %c15_i32_81 : i32 to vector<1x8xi32>
    %370 = arith.shrsi %368, %369 : vector<1x8xi32>
    %c32768_i32_82 = arith.constant 32768 : i32
    %371 = vector.broadcast %c32768_i32_82 : i32 to vector<1x8xi32>
    %372 = arith.muli %370, %371 : vector<1x8xi32>
    %373 = arith.subi %368, %372 : vector<1x8xi32>
    %374 = vector.shape_cast %373 : vector<1x8xi32> to vector<1x1x8xi32>
    %cst_83 = arith.constant dense<0> : vector<1xi32>
    %375 = vector.multi_reduction <add>, %374, %cst_83 [1, 2] : vector<1x1x8xi32> to vector<1xi32>
    %376 = vector.shape_cast %375 : vector<1xi32> to vector<1x1x1xi32>
    %377 = vector.extract %376[0, 0, 0] : i32 from vector<1x1x1xi32>
    %378 = vector.broadcast %377 : i32 to vector<1x1xi32>
    %c8_i32_84 = arith.constant 8 : i32
    %379 = vector.broadcast %c8_i32_84 : i32 to vector<1x64xi32>
    %380 = arith.cmpi eq, %225, %379 : vector<1x64xi32>
    %c0_i32_85 = arith.constant 0 : i32
    %381 = vector.shape_cast %378 : vector<1x1xi32> to vector<1x1xi32>
    %382 = vector.broadcast %381 : vector<1x1xi32> to vector<1x64xi32>
    %383 = vector.broadcast %c0_i32_85 : i32 to vector<1x64xi32>
    %384 = arith.select %380, %382, %383 : vector<1x64xi1>, vector<1x64xi32>
    %385 = arith.addi %362, %384 : vector<1x64xi32>
    %386 = vector.shape_cast %370 : vector<1x8xi32> to vector<1x1x8xi32>
    %cst_86 = arith.constant dense<0> : vector<1xi32>
    %387 = vector.multi_reduction <add>, %386, %cst_86 [1, 2] : vector<1x1x8xi32> to vector<1xi32>
    %388 = vector.shape_cast %387 : vector<1xi32> to vector<1x1x1xi32>
    %389 = vector.extract %388[0, 0, 0] : i32 from vector<1x1x1xi32>
    %390 = vector.broadcast %389 : i32 to vector<1x1xi32>
    %c9_i32 = arith.constant 9 : i32
    %391 = vector.broadcast %c9_i32 : i32 to vector<1x64xi32>
    %392 = arith.cmpi eq, %225, %391 : vector<1x64xi32>
    %c0_i32_87 = arith.constant 0 : i32
    %393 = vector.shape_cast %390 : vector<1x1xi32> to vector<1x1xi32>
    %394 = vector.broadcast %393 : vector<1x1xi32> to vector<1x64xi32>
    %395 = vector.broadcast %c0_i32_87 : i32 to vector<1x64xi32>
    %396 = arith.select %392, %394, %395 : vector<1x64xi1>, vector<1x64xi32>
    %397 = arith.addi %385, %396 : vector<1x64xi32>
    %c0_i32_88 = arith.constant 0 : i32
    %398 = vector.broadcast %c0_i32_88 : i32 to vector<8x8xi32>
    %399 = arith.select %364, %221, %398 : vector<8x8xi1>, vector<8x8xi32>
    %cst_89 = arith.constant dense<0> : vector<8xi32>
    %400 = vector.multi_reduction <add>, %399, %cst_89 [0] : vector<8x8xi32> to vector<8xi32>
    %401 = vector.shape_cast %400 : vector<8xi32> to vector<1x8xi32>
    %c15_i32_90 = arith.constant 15 : i32
    %402 = vector.broadcast %c15_i32_90 : i32 to vector<1x8xi32>
    %403 = arith.shrsi %401, %402 : vector<1x8xi32>
    %c32768_i32_91 = arith.constant 32768 : i32
    %404 = vector.broadcast %c32768_i32_91 : i32 to vector<1x8xi32>
    %405 = arith.muli %403, %404 : vector<1x8xi32>
    %406 = arith.subi %401, %405 : vector<1x8xi32>
    %407 = vector.shape_cast %406 : vector<1x8xi32> to vector<1x1x8xi32>
    %cst_92 = arith.constant dense<0> : vector<1xi32>
    %408 = vector.multi_reduction <add>, %407, %cst_92 [1, 2] : vector<1x1x8xi32> to vector<1xi32>
    %409 = vector.shape_cast %408 : vector<1xi32> to vector<1x1x1xi32>
    %410 = vector.extract %409[0, 0, 0] : i32 from vector<1x1x1xi32>
    %411 = vector.broadcast %410 : i32 to vector<1x1xi32>
    %c10_i32 = arith.constant 10 : i32
    %412 = vector.broadcast %c10_i32 : i32 to vector<1x64xi32>
    %413 = arith.cmpi eq, %225, %412 : vector<1x64xi32>
    %c0_i32_93 = arith.constant 0 : i32
    %414 = vector.shape_cast %411 : vector<1x1xi32> to vector<1x1xi32>
    %415 = vector.broadcast %414 : vector<1x1xi32> to vector<1x64xi32>
    %416 = vector.broadcast %c0_i32_93 : i32 to vector<1x64xi32>
    %417 = arith.select %413, %415, %416 : vector<1x64xi1>, vector<1x64xi32>
    %418 = arith.addi %397, %417 : vector<1x64xi32>
    %419 = vector.shape_cast %403 : vector<1x8xi32> to vector<1x1x8xi32>
    %cst_94 = arith.constant dense<0> : vector<1xi32>
    %420 = vector.multi_reduction <add>, %419, %cst_94 [1, 2] : vector<1x1x8xi32> to vector<1xi32>
    %421 = vector.shape_cast %420 : vector<1xi32> to vector<1x1x1xi32>
    %422 = vector.extract %421[0, 0, 0] : i32 from vector<1x1x1xi32>
    %423 = vector.broadcast %422 : i32 to vector<1x1xi32>
    %c11_i32 = arith.constant 11 : i32
    %424 = vector.broadcast %c11_i32 : i32 to vector<1x64xi32>
    %425 = arith.cmpi eq, %225, %424 : vector<1x64xi32>
    %c0_i32_95 = arith.constant 0 : i32
    %426 = vector.shape_cast %423 : vector<1x1xi32> to vector<1x1xi32>
    %427 = vector.broadcast %426 : vector<1x1xi32> to vector<1x64xi32>
    %428 = vector.broadcast %c0_i32_95 : i32 to vector<1x64xi32>
    %429 = arith.select %425, %427, %428 : vector<1x64xi1>, vector<1x64xi32>
    %430 = arith.addi %418, %429 : vector<1x64xi32>
    %c3_i32_96 = arith.constant 3 : i32
    %431 = vector.broadcast %c3_i32_96 : i32 to vector<8x8xi32>
    %432 = arith.cmpi eq, %224, %431 : vector<8x8xi32>
    %c0_i32_97 = arith.constant 0 : i32
    %433 = vector.broadcast %c0_i32_97 : i32 to vector<8x8xi32>
    %434 = arith.select %432, %208, %433 : vector<8x8xi1>, vector<8x8xi32>
    %cst_98 = arith.constant dense<0> : vector<8xi32>
    %435 = vector.multi_reduction <add>, %434, %cst_98 [0] : vector<8x8xi32> to vector<8xi32>
    %436 = vector.shape_cast %435 : vector<8xi32> to vector<1x8xi32>
    %c15_i32_99 = arith.constant 15 : i32
    %437 = vector.broadcast %c15_i32_99 : i32 to vector<1x8xi32>
    %438 = arith.shrsi %436, %437 : vector<1x8xi32>
    %c32768_i32_100 = arith.constant 32768 : i32
    %439 = vector.broadcast %c32768_i32_100 : i32 to vector<1x8xi32>
    %440 = arith.muli %438, %439 : vector<1x8xi32>
    %441 = arith.subi %436, %440 : vector<1x8xi32>
    %442 = vector.shape_cast %441 : vector<1x8xi32> to vector<1x1x8xi32>
    %cst_101 = arith.constant dense<0> : vector<1xi32>
    %443 = vector.multi_reduction <add>, %442, %cst_101 [1, 2] : vector<1x1x8xi32> to vector<1xi32>
    %444 = vector.shape_cast %443 : vector<1xi32> to vector<1x1x1xi32>
    %445 = vector.extract %444[0, 0, 0] : i32 from vector<1x1x1xi32>
    %446 = vector.broadcast %445 : i32 to vector<1x1xi32>
    %c12_i32 = arith.constant 12 : i32
    %447 = vector.broadcast %c12_i32 : i32 to vector<1x64xi32>
    %448 = arith.cmpi eq, %225, %447 : vector<1x64xi32>
    %c0_i32_102 = arith.constant 0 : i32
    %449 = vector.shape_cast %446 : vector<1x1xi32> to vector<1x1xi32>
    %450 = vector.broadcast %449 : vector<1x1xi32> to vector<1x64xi32>
    %451 = vector.broadcast %c0_i32_102 : i32 to vector<1x64xi32>
    %452 = arith.select %448, %450, %451 : vector<1x64xi1>, vector<1x64xi32>
    %453 = arith.addi %430, %452 : vector<1x64xi32>
    %454 = vector.shape_cast %438 : vector<1x8xi32> to vector<1x1x8xi32>
    %cst_103 = arith.constant dense<0> : vector<1xi32>
    %455 = vector.multi_reduction <add>, %454, %cst_103 [1, 2] : vector<1x1x8xi32> to vector<1xi32>
    %456 = vector.shape_cast %455 : vector<1xi32> to vector<1x1x1xi32>
    %457 = vector.extract %456[0, 0, 0] : i32 from vector<1x1x1xi32>
    %458 = vector.broadcast %457 : i32 to vector<1x1xi32>
    %c13_i32 = arith.constant 13 : i32
    %459 = vector.broadcast %c13_i32 : i32 to vector<1x64xi32>
    %460 = arith.cmpi eq, %225, %459 : vector<1x64xi32>
    %c0_i32_104 = arith.constant 0 : i32
    %461 = vector.shape_cast %458 : vector<1x1xi32> to vector<1x1xi32>
    %462 = vector.broadcast %461 : vector<1x1xi32> to vector<1x64xi32>
    %463 = vector.broadcast %c0_i32_104 : i32 to vector<1x64xi32>
    %464 = arith.select %460, %462, %463 : vector<1x64xi1>, vector<1x64xi32>
    %465 = arith.addi %453, %464 : vector<1x64xi32>
    %c0_i32_105 = arith.constant 0 : i32
    %466 = vector.broadcast %c0_i32_105 : i32 to vector<8x8xi32>
    %467 = arith.select %432, %221, %466 : vector<8x8xi1>, vector<8x8xi32>
    %cst_106 = arith.constant dense<0> : vector<8xi32>
    %468 = vector.multi_reduction <add>, %467, %cst_106 [0] : vector<8x8xi32> to vector<8xi32>
    %469 = vector.shape_cast %468 : vector<8xi32> to vector<1x8xi32>
    %c15_i32_107 = arith.constant 15 : i32
    %470 = vector.broadcast %c15_i32_107 : i32 to vector<1x8xi32>
    %471 = arith.shrsi %469, %470 : vector<1x8xi32>
    %c32768_i32_108 = arith.constant 32768 : i32
    %472 = vector.broadcast %c32768_i32_108 : i32 to vector<1x8xi32>
    %473 = arith.muli %471, %472 : vector<1x8xi32>
    %474 = arith.subi %469, %473 : vector<1x8xi32>
    %475 = vector.shape_cast %474 : vector<1x8xi32> to vector<1x1x8xi32>
    %cst_109 = arith.constant dense<0> : vector<1xi32>
    %476 = vector.multi_reduction <add>, %475, %cst_109 [1, 2] : vector<1x1x8xi32> to vector<1xi32>
    %477 = vector.shape_cast %476 : vector<1xi32> to vector<1x1x1xi32>
    %478 = vector.extract %477[0, 0, 0] : i32 from vector<1x1x1xi32>
    %479 = vector.broadcast %478 : i32 to vector<1x1xi32>
    %c14_i32 = arith.constant 14 : i32
    %480 = vector.broadcast %c14_i32 : i32 to vector<1x64xi32>
    %481 = arith.cmpi eq, %225, %480 : vector<1x64xi32>
    %c0_i32_110 = arith.constant 0 : i32
    %482 = vector.shape_cast %479 : vector<1x1xi32> to vector<1x1xi32>
    %483 = vector.broadcast %482 : vector<1x1xi32> to vector<1x64xi32>
    %484 = vector.broadcast %c0_i32_110 : i32 to vector<1x64xi32>
    %485 = arith.select %481, %483, %484 : vector<1x64xi1>, vector<1x64xi32>
    %486 = arith.addi %465, %485 : vector<1x64xi32>
    %487 = vector.shape_cast %471 : vector<1x8xi32> to vector<1x1x8xi32>
    %cst_111 = arith.constant dense<0> : vector<1xi32>
    %488 = vector.multi_reduction <add>, %487, %cst_111 [1, 2] : vector<1x1x8xi32> to vector<1xi32>
    %489 = vector.shape_cast %488 : vector<1xi32> to vector<1x1x1xi32>
    %490 = vector.extract %489[0, 0, 0] : i32 from vector<1x1x1xi32>
    %491 = vector.broadcast %490 : i32 to vector<1x1xi32>
    %c15_i32_112 = arith.constant 15 : i32
    %492 = vector.broadcast %c15_i32_112 : i32 to vector<1x64xi32>
    %493 = arith.cmpi eq, %225, %492 : vector<1x64xi32>
    %c0_i32_113 = arith.constant 0 : i32
    %494 = vector.shape_cast %491 : vector<1x1xi32> to vector<1x1xi32>
    %495 = vector.broadcast %494 : vector<1x1xi32> to vector<1x64xi32>
    %496 = vector.broadcast %c0_i32_113 : i32 to vector<1x64xi32>
    %497 = arith.select %493, %495, %496 : vector<1x64xi1>, vector<1x64xi32>
    %498 = arith.addi %486, %497 : vector<1x64xi32>
    %c4_i32_114 = arith.constant 4 : i32
    %499 = vector.broadcast %c4_i32_114 : i32 to vector<8x8xi32>
    %500 = arith.cmpi eq, %224, %499 : vector<8x8xi32>
    %c0_i32_115 = arith.constant 0 : i32
    %501 = vector.broadcast %c0_i32_115 : i32 to vector<8x8xi32>
    %502 = arith.select %500, %208, %501 : vector<8x8xi1>, vector<8x8xi32>
    %cst_116 = arith.constant dense<0> : vector<8xi32>
    %503 = vector.multi_reduction <add>, %502, %cst_116 [0] : vector<8x8xi32> to vector<8xi32>
    %504 = vector.shape_cast %503 : vector<8xi32> to vector<1x8xi32>
    %c15_i32_117 = arith.constant 15 : i32
    %505 = vector.broadcast %c15_i32_117 : i32 to vector<1x8xi32>
    %506 = arith.shrsi %504, %505 : vector<1x8xi32>
    %c32768_i32_118 = arith.constant 32768 : i32
    %507 = vector.broadcast %c32768_i32_118 : i32 to vector<1x8xi32>
    %508 = arith.muli %506, %507 : vector<1x8xi32>
    %509 = arith.subi %504, %508 : vector<1x8xi32>
    %510 = vector.shape_cast %509 : vector<1x8xi32> to vector<1x1x8xi32>
    %cst_119 = arith.constant dense<0> : vector<1xi32>
    %511 = vector.multi_reduction <add>, %510, %cst_119 [1, 2] : vector<1x1x8xi32> to vector<1xi32>
    %512 = vector.shape_cast %511 : vector<1xi32> to vector<1x1x1xi32>
    %513 = vector.extract %512[0, 0, 0] : i32 from vector<1x1x1xi32>
    %514 = vector.broadcast %513 : i32 to vector<1x1xi32>
    %c16_i32 = arith.constant 16 : i32
    %515 = vector.broadcast %c16_i32 : i32 to vector<1x64xi32>
    %516 = arith.cmpi eq, %225, %515 : vector<1x64xi32>
    %c0_i32_120 = arith.constant 0 : i32
    %517 = vector.shape_cast %514 : vector<1x1xi32> to vector<1x1xi32>
    %518 = vector.broadcast %517 : vector<1x1xi32> to vector<1x64xi32>
    %519 = vector.broadcast %c0_i32_120 : i32 to vector<1x64xi32>
    %520 = arith.select %516, %518, %519 : vector<1x64xi1>, vector<1x64xi32>
    %521 = arith.addi %498, %520 : vector<1x64xi32>
    %522 = vector.shape_cast %506 : vector<1x8xi32> to vector<1x1x8xi32>
    %cst_121 = arith.constant dense<0> : vector<1xi32>
    %523 = vector.multi_reduction <add>, %522, %cst_121 [1, 2] : vector<1x1x8xi32> to vector<1xi32>
    %524 = vector.shape_cast %523 : vector<1xi32> to vector<1x1x1xi32>
    %525 = vector.extract %524[0, 0, 0] : i32 from vector<1x1x1xi32>
    %526 = vector.broadcast %525 : i32 to vector<1x1xi32>
    %c17_i32 = arith.constant 17 : i32
    %527 = vector.broadcast %c17_i32 : i32 to vector<1x64xi32>
    %528 = arith.cmpi eq, %225, %527 : vector<1x64xi32>
    %c0_i32_122 = arith.constant 0 : i32
    %529 = vector.shape_cast %526 : vector<1x1xi32> to vector<1x1xi32>
    %530 = vector.broadcast %529 : vector<1x1xi32> to vector<1x64xi32>
    %531 = vector.broadcast %c0_i32_122 : i32 to vector<1x64xi32>
    %532 = arith.select %528, %530, %531 : vector<1x64xi1>, vector<1x64xi32>
    %533 = arith.addi %521, %532 : vector<1x64xi32>
    %c0_i32_123 = arith.constant 0 : i32
    %534 = vector.broadcast %c0_i32_123 : i32 to vector<8x8xi32>
    %535 = arith.select %500, %221, %534 : vector<8x8xi1>, vector<8x8xi32>
    %cst_124 = arith.constant dense<0> : vector<8xi32>
    %536 = vector.multi_reduction <add>, %535, %cst_124 [0] : vector<8x8xi32> to vector<8xi32>
    %537 = vector.shape_cast %536 : vector<8xi32> to vector<1x8xi32>
    %c15_i32_125 = arith.constant 15 : i32
    %538 = vector.broadcast %c15_i32_125 : i32 to vector<1x8xi32>
    %539 = arith.shrsi %537, %538 : vector<1x8xi32>
    %c32768_i32_126 = arith.constant 32768 : i32
    %540 = vector.broadcast %c32768_i32_126 : i32 to vector<1x8xi32>
    %541 = arith.muli %539, %540 : vector<1x8xi32>
    %542 = arith.subi %537, %541 : vector<1x8xi32>
    %543 = vector.shape_cast %542 : vector<1x8xi32> to vector<1x1x8xi32>
    %cst_127 = arith.constant dense<0> : vector<1xi32>
    %544 = vector.multi_reduction <add>, %543, %cst_127 [1, 2] : vector<1x1x8xi32> to vector<1xi32>
    %545 = vector.shape_cast %544 : vector<1xi32> to vector<1x1x1xi32>
    %546 = vector.extract %545[0, 0, 0] : i32 from vector<1x1x1xi32>
    %547 = vector.broadcast %546 : i32 to vector<1x1xi32>
    %c18_i32 = arith.constant 18 : i32
    %548 = vector.broadcast %c18_i32 : i32 to vector<1x64xi32>
    %549 = arith.cmpi eq, %225, %548 : vector<1x64xi32>
    %c0_i32_128 = arith.constant 0 : i32
    %550 = vector.shape_cast %547 : vector<1x1xi32> to vector<1x1xi32>
    %551 = vector.broadcast %550 : vector<1x1xi32> to vector<1x64xi32>
    %552 = vector.broadcast %c0_i32_128 : i32 to vector<1x64xi32>
    %553 = arith.select %549, %551, %552 : vector<1x64xi1>, vector<1x64xi32>
    %554 = arith.addi %533, %553 : vector<1x64xi32>
    %555 = vector.shape_cast %539 : vector<1x8xi32> to vector<1x1x8xi32>
    %cst_129 = arith.constant dense<0> : vector<1xi32>
    %556 = vector.multi_reduction <add>, %555, %cst_129 [1, 2] : vector<1x1x8xi32> to vector<1xi32>
    %557 = vector.shape_cast %556 : vector<1xi32> to vector<1x1x1xi32>
    %558 = vector.extract %557[0, 0, 0] : i32 from vector<1x1x1xi32>
    %559 = vector.broadcast %558 : i32 to vector<1x1xi32>
    %c19_i32 = arith.constant 19 : i32
    %560 = vector.broadcast %c19_i32 : i32 to vector<1x64xi32>
    %561 = arith.cmpi eq, %225, %560 : vector<1x64xi32>
    %c0_i32_130 = arith.constant 0 : i32
    %562 = vector.shape_cast %559 : vector<1x1xi32> to vector<1x1xi32>
    %563 = vector.broadcast %562 : vector<1x1xi32> to vector<1x64xi32>
    %564 = vector.broadcast %c0_i32_130 : i32 to vector<1x64xi32>
    %565 = arith.select %561, %563, %564 : vector<1x64xi1>, vector<1x64xi32>
    %566 = arith.addi %554, %565 : vector<1x64xi32>
    %c5_i32_131 = arith.constant 5 : i32
    %567 = vector.broadcast %c5_i32_131 : i32 to vector<8x8xi32>
    %568 = arith.cmpi eq, %224, %567 : vector<8x8xi32>
    %c0_i32_132 = arith.constant 0 : i32
    %569 = vector.broadcast %c0_i32_132 : i32 to vector<8x8xi32>
    %570 = arith.select %568, %208, %569 : vector<8x8xi1>, vector<8x8xi32>
    %cst_133 = arith.constant dense<0> : vector<8xi32>
    %571 = vector.multi_reduction <add>, %570, %cst_133 [0] : vector<8x8xi32> to vector<8xi32>
    %572 = vector.shape_cast %571 : vector<8xi32> to vector<1x8xi32>
    %c15_i32_134 = arith.constant 15 : i32
    %573 = vector.broadcast %c15_i32_134 : i32 to vector<1x8xi32>
    %574 = arith.shrsi %572, %573 : vector<1x8xi32>
    %c32768_i32_135 = arith.constant 32768 : i32
    %575 = vector.broadcast %c32768_i32_135 : i32 to vector<1x8xi32>
    %576 = arith.muli %574, %575 : vector<1x8xi32>
    %577 = arith.subi %572, %576 : vector<1x8xi32>
    %578 = vector.shape_cast %577 : vector<1x8xi32> to vector<1x1x8xi32>
    %cst_136 = arith.constant dense<0> : vector<1xi32>
    %579 = vector.multi_reduction <add>, %578, %cst_136 [1, 2] : vector<1x1x8xi32> to vector<1xi32>
    %580 = vector.shape_cast %579 : vector<1xi32> to vector<1x1x1xi32>
    %581 = vector.extract %580[0, 0, 0] : i32 from vector<1x1x1xi32>
    %582 = vector.broadcast %581 : i32 to vector<1x1xi32>
    %c20_i32 = arith.constant 20 : i32
    %583 = vector.broadcast %c20_i32 : i32 to vector<1x64xi32>
    %584 = arith.cmpi eq, %225, %583 : vector<1x64xi32>
    %c0_i32_137 = arith.constant 0 : i32
    %585 = vector.shape_cast %582 : vector<1x1xi32> to vector<1x1xi32>
    %586 = vector.broadcast %585 : vector<1x1xi32> to vector<1x64xi32>
    %587 = vector.broadcast %c0_i32_137 : i32 to vector<1x64xi32>
    %588 = arith.select %584, %586, %587 : vector<1x64xi1>, vector<1x64xi32>
    %589 = arith.addi %566, %588 : vector<1x64xi32>
    %590 = vector.shape_cast %574 : vector<1x8xi32> to vector<1x1x8xi32>
    %cst_138 = arith.constant dense<0> : vector<1xi32>
    %591 = vector.multi_reduction <add>, %590, %cst_138 [1, 2] : vector<1x1x8xi32> to vector<1xi32>
    %592 = vector.shape_cast %591 : vector<1xi32> to vector<1x1x1xi32>
    %593 = vector.extract %592[0, 0, 0] : i32 from vector<1x1x1xi32>
    %594 = vector.broadcast %593 : i32 to vector<1x1xi32>
    %c21_i32 = arith.constant 21 : i32
    %595 = vector.broadcast %c21_i32 : i32 to vector<1x64xi32>
    %596 = arith.cmpi eq, %225, %595 : vector<1x64xi32>
    %c0_i32_139 = arith.constant 0 : i32
    %597 = vector.shape_cast %594 : vector<1x1xi32> to vector<1x1xi32>
    %598 = vector.broadcast %597 : vector<1x1xi32> to vector<1x64xi32>
    %599 = vector.broadcast %c0_i32_139 : i32 to vector<1x64xi32>
    %600 = arith.select %596, %598, %599 : vector<1x64xi1>, vector<1x64xi32>
    %601 = arith.addi %589, %600 : vector<1x64xi32>
    %c0_i32_140 = arith.constant 0 : i32
    %602 = vector.broadcast %c0_i32_140 : i32 to vector<8x8xi32>
    %603 = arith.select %568, %221, %602 : vector<8x8xi1>, vector<8x8xi32>
    %cst_141 = arith.constant dense<0> : vector<8xi32>
    %604 = vector.multi_reduction <add>, %603, %cst_141 [0] : vector<8x8xi32> to vector<8xi32>
    %605 = vector.shape_cast %604 : vector<8xi32> to vector<1x8xi32>
    %c15_i32_142 = arith.constant 15 : i32
    %606 = vector.broadcast %c15_i32_142 : i32 to vector<1x8xi32>
    %607 = arith.shrsi %605, %606 : vector<1x8xi32>
    %c32768_i32_143 = arith.constant 32768 : i32
    %608 = vector.broadcast %c32768_i32_143 : i32 to vector<1x8xi32>
    %609 = arith.muli %607, %608 : vector<1x8xi32>
    %610 = arith.subi %605, %609 : vector<1x8xi32>
    %611 = vector.shape_cast %610 : vector<1x8xi32> to vector<1x1x8xi32>
    %cst_144 = arith.constant dense<0> : vector<1xi32>
    %612 = vector.multi_reduction <add>, %611, %cst_144 [1, 2] : vector<1x1x8xi32> to vector<1xi32>
    %613 = vector.shape_cast %612 : vector<1xi32> to vector<1x1x1xi32>
    %614 = vector.extract %613[0, 0, 0] : i32 from vector<1x1x1xi32>
    %615 = vector.broadcast %614 : i32 to vector<1x1xi32>
    %c22_i32 = arith.constant 22 : i32
    %616 = vector.broadcast %c22_i32 : i32 to vector<1x64xi32>
    %617 = arith.cmpi eq, %225, %616 : vector<1x64xi32>
    %c0_i32_145 = arith.constant 0 : i32
    %618 = vector.shape_cast %615 : vector<1x1xi32> to vector<1x1xi32>
    %619 = vector.broadcast %618 : vector<1x1xi32> to vector<1x64xi32>
    %620 = vector.broadcast %c0_i32_145 : i32 to vector<1x64xi32>
    %621 = arith.select %617, %619, %620 : vector<1x64xi1>, vector<1x64xi32>
    %622 = arith.addi %601, %621 : vector<1x64xi32>
    %623 = vector.shape_cast %607 : vector<1x8xi32> to vector<1x1x8xi32>
    %cst_146 = arith.constant dense<0> : vector<1xi32>
    %624 = vector.multi_reduction <add>, %623, %cst_146 [1, 2] : vector<1x1x8xi32> to vector<1xi32>
    %625 = vector.shape_cast %624 : vector<1xi32> to vector<1x1x1xi32>
    %626 = vector.extract %625[0, 0, 0] : i32 from vector<1x1x1xi32>
    %627 = vector.broadcast %626 : i32 to vector<1x1xi32>
    %c23_i32 = arith.constant 23 : i32
    %628 = vector.broadcast %c23_i32 : i32 to vector<1x64xi32>
    %629 = arith.cmpi eq, %225, %628 : vector<1x64xi32>
    %c0_i32_147 = arith.constant 0 : i32
    %630 = vector.shape_cast %627 : vector<1x1xi32> to vector<1x1xi32>
    %631 = vector.broadcast %630 : vector<1x1xi32> to vector<1x64xi32>
    %632 = vector.broadcast %c0_i32_147 : i32 to vector<1x64xi32>
    %633 = arith.select %629, %631, %632 : vector<1x64xi1>, vector<1x64xi32>
    %634 = arith.addi %622, %633 : vector<1x64xi32>
    %c6_i32_148 = arith.constant 6 : i32
    %635 = vector.broadcast %c6_i32_148 : i32 to vector<8x8xi32>
    %636 = arith.cmpi eq, %224, %635 : vector<8x8xi32>
    %c0_i32_149 = arith.constant 0 : i32
    %637 = vector.broadcast %c0_i32_149 : i32 to vector<8x8xi32>
    %638 = arith.select %636, %208, %637 : vector<8x8xi1>, vector<8x8xi32>
    %cst_150 = arith.constant dense<0> : vector<8xi32>
    %639 = vector.multi_reduction <add>, %638, %cst_150 [0] : vector<8x8xi32> to vector<8xi32>
    %640 = vector.shape_cast %639 : vector<8xi32> to vector<1x8xi32>
    %c15_i32_151 = arith.constant 15 : i32
    %641 = vector.broadcast %c15_i32_151 : i32 to vector<1x8xi32>
    %642 = arith.shrsi %640, %641 : vector<1x8xi32>
    %c32768_i32_152 = arith.constant 32768 : i32
    %643 = vector.broadcast %c32768_i32_152 : i32 to vector<1x8xi32>
    %644 = arith.muli %642, %643 : vector<1x8xi32>
    %645 = arith.subi %640, %644 : vector<1x8xi32>
    %646 = vector.shape_cast %645 : vector<1x8xi32> to vector<1x1x8xi32>
    %cst_153 = arith.constant dense<0> : vector<1xi32>
    %647 = vector.multi_reduction <add>, %646, %cst_153 [1, 2] : vector<1x1x8xi32> to vector<1xi32>
    %648 = vector.shape_cast %647 : vector<1xi32> to vector<1x1x1xi32>
    %649 = vector.extract %648[0, 0, 0] : i32 from vector<1x1x1xi32>
    %650 = vector.broadcast %649 : i32 to vector<1x1xi32>
    %c24_i32 = arith.constant 24 : i32
    %651 = vector.broadcast %c24_i32 : i32 to vector<1x64xi32>
    %652 = arith.cmpi eq, %225, %651 : vector<1x64xi32>
    %c0_i32_154 = arith.constant 0 : i32
    %653 = vector.shape_cast %650 : vector<1x1xi32> to vector<1x1xi32>
    %654 = vector.broadcast %653 : vector<1x1xi32> to vector<1x64xi32>
    %655 = vector.broadcast %c0_i32_154 : i32 to vector<1x64xi32>
    %656 = arith.select %652, %654, %655 : vector<1x64xi1>, vector<1x64xi32>
    %657 = arith.addi %634, %656 : vector<1x64xi32>
    %658 = vector.shape_cast %642 : vector<1x8xi32> to vector<1x1x8xi32>
    %cst_155 = arith.constant dense<0> : vector<1xi32>
    %659 = vector.multi_reduction <add>, %658, %cst_155 [1, 2] : vector<1x1x8xi32> to vector<1xi32>
    %660 = vector.shape_cast %659 : vector<1xi32> to vector<1x1x1xi32>
    %661 = vector.extract %660[0, 0, 0] : i32 from vector<1x1x1xi32>
    %662 = vector.broadcast %661 : i32 to vector<1x1xi32>
    %c25_i32 = arith.constant 25 : i32
    %663 = vector.broadcast %c25_i32 : i32 to vector<1x64xi32>
    %664 = arith.cmpi eq, %225, %663 : vector<1x64xi32>
    %c0_i32_156 = arith.constant 0 : i32
    %665 = vector.shape_cast %662 : vector<1x1xi32> to vector<1x1xi32>
    %666 = vector.broadcast %665 : vector<1x1xi32> to vector<1x64xi32>
    %667 = vector.broadcast %c0_i32_156 : i32 to vector<1x64xi32>
    %668 = arith.select %664, %666, %667 : vector<1x64xi1>, vector<1x64xi32>
    %669 = arith.addi %657, %668 : vector<1x64xi32>
    %c0_i32_157 = arith.constant 0 : i32
    %670 = vector.broadcast %c0_i32_157 : i32 to vector<8x8xi32>
    %671 = arith.select %636, %221, %670 : vector<8x8xi1>, vector<8x8xi32>
    %cst_158 = arith.constant dense<0> : vector<8xi32>
    %672 = vector.multi_reduction <add>, %671, %cst_158 [0] : vector<8x8xi32> to vector<8xi32>
    %673 = vector.shape_cast %672 : vector<8xi32> to vector<1x8xi32>
    %c15_i32_159 = arith.constant 15 : i32
    %674 = vector.broadcast %c15_i32_159 : i32 to vector<1x8xi32>
    %675 = arith.shrsi %673, %674 : vector<1x8xi32>
    %c32768_i32_160 = arith.constant 32768 : i32
    %676 = vector.broadcast %c32768_i32_160 : i32 to vector<1x8xi32>
    %677 = arith.muli %675, %676 : vector<1x8xi32>
    %678 = arith.subi %673, %677 : vector<1x8xi32>
    %679 = vector.shape_cast %678 : vector<1x8xi32> to vector<1x1x8xi32>
    %cst_161 = arith.constant dense<0> : vector<1xi32>
    %680 = vector.multi_reduction <add>, %679, %cst_161 [1, 2] : vector<1x1x8xi32> to vector<1xi32>
    %681 = vector.shape_cast %680 : vector<1xi32> to vector<1x1x1xi32>
    %682 = vector.extract %681[0, 0, 0] : i32 from vector<1x1x1xi32>
    %683 = vector.broadcast %682 : i32 to vector<1x1xi32>
    %c26_i32 = arith.constant 26 : i32
    %684 = vector.broadcast %c26_i32 : i32 to vector<1x64xi32>
    %685 = arith.cmpi eq, %225, %684 : vector<1x64xi32>
    %c0_i32_162 = arith.constant 0 : i32
    %686 = vector.shape_cast %683 : vector<1x1xi32> to vector<1x1xi32>
    %687 = vector.broadcast %686 : vector<1x1xi32> to vector<1x64xi32>
    %688 = vector.broadcast %c0_i32_162 : i32 to vector<1x64xi32>
    %689 = arith.select %685, %687, %688 : vector<1x64xi1>, vector<1x64xi32>
    %690 = arith.addi %669, %689 : vector<1x64xi32>
    %691 = vector.shape_cast %675 : vector<1x8xi32> to vector<1x1x8xi32>
    %cst_163 = arith.constant dense<0> : vector<1xi32>
    %692 = vector.multi_reduction <add>, %691, %cst_163 [1, 2] : vector<1x1x8xi32> to vector<1xi32>
    %693 = vector.shape_cast %692 : vector<1xi32> to vector<1x1x1xi32>
    %694 = vector.extract %693[0, 0, 0] : i32 from vector<1x1x1xi32>
    %695 = vector.broadcast %694 : i32 to vector<1x1xi32>
    %c27_i32 = arith.constant 27 : i32
    %696 = vector.broadcast %c27_i32 : i32 to vector<1x64xi32>
    %697 = arith.cmpi eq, %225, %696 : vector<1x64xi32>
    %c0_i32_164 = arith.constant 0 : i32
    %698 = vector.shape_cast %695 : vector<1x1xi32> to vector<1x1xi32>
    %699 = vector.broadcast %698 : vector<1x1xi32> to vector<1x64xi32>
    %700 = vector.broadcast %c0_i32_164 : i32 to vector<1x64xi32>
    %701 = arith.select %697, %699, %700 : vector<1x64xi1>, vector<1x64xi32>
    %702 = arith.addi %690, %701 : vector<1x64xi32>
    %c7_i32_165 = arith.constant 7 : i32
    %703 = vector.broadcast %c7_i32_165 : i32 to vector<8x8xi32>
    %704 = arith.cmpi eq, %224, %703 : vector<8x8xi32>
    %c0_i32_166 = arith.constant 0 : i32
    %705 = vector.broadcast %c0_i32_166 : i32 to vector<8x8xi32>
    %706 = arith.select %704, %208, %705 : vector<8x8xi1>, vector<8x8xi32>
    %cst_167 = arith.constant dense<0> : vector<8xi32>
    %707 = vector.multi_reduction <add>, %706, %cst_167 [0] : vector<8x8xi32> to vector<8xi32>
    %708 = vector.shape_cast %707 : vector<8xi32> to vector<1x8xi32>
    %c15_i32_168 = arith.constant 15 : i32
    %709 = vector.broadcast %c15_i32_168 : i32 to vector<1x8xi32>
    %710 = arith.shrsi %708, %709 : vector<1x8xi32>
    %c32768_i32_169 = arith.constant 32768 : i32
    %711 = vector.broadcast %c32768_i32_169 : i32 to vector<1x8xi32>
    %712 = arith.muli %710, %711 : vector<1x8xi32>
    %713 = arith.subi %708, %712 : vector<1x8xi32>
    %714 = vector.shape_cast %713 : vector<1x8xi32> to vector<1x1x8xi32>
    %cst_170 = arith.constant dense<0> : vector<1xi32>
    %715 = vector.multi_reduction <add>, %714, %cst_170 [1, 2] : vector<1x1x8xi32> to vector<1xi32>
    %716 = vector.shape_cast %715 : vector<1xi32> to vector<1x1x1xi32>
    %717 = vector.extract %716[0, 0, 0] : i32 from vector<1x1x1xi32>
    %718 = vector.broadcast %717 : i32 to vector<1x1xi32>
    %c28_i32 = arith.constant 28 : i32
    %719 = vector.broadcast %c28_i32 : i32 to vector<1x64xi32>
    %720 = arith.cmpi eq, %225, %719 : vector<1x64xi32>
    %c0_i32_171 = arith.constant 0 : i32
    %721 = vector.shape_cast %718 : vector<1x1xi32> to vector<1x1xi32>
    %722 = vector.broadcast %721 : vector<1x1xi32> to vector<1x64xi32>
    %723 = vector.broadcast %c0_i32_171 : i32 to vector<1x64xi32>
    %724 = arith.select %720, %722, %723 : vector<1x64xi1>, vector<1x64xi32>
    %725 = arith.addi %702, %724 : vector<1x64xi32>
    %726 = vector.shape_cast %710 : vector<1x8xi32> to vector<1x1x8xi32>
    %cst_172 = arith.constant dense<0> : vector<1xi32>
    %727 = vector.multi_reduction <add>, %726, %cst_172 [1, 2] : vector<1x1x8xi32> to vector<1xi32>
    %728 = vector.shape_cast %727 : vector<1xi32> to vector<1x1x1xi32>
    %729 = vector.extract %728[0, 0, 0] : i32 from vector<1x1x1xi32>
    %730 = vector.broadcast %729 : i32 to vector<1x1xi32>
    %c29_i32 = arith.constant 29 : i32
    %731 = vector.broadcast %c29_i32 : i32 to vector<1x64xi32>
    %732 = arith.cmpi eq, %225, %731 : vector<1x64xi32>
    %c0_i32_173 = arith.constant 0 : i32
    %733 = vector.shape_cast %730 : vector<1x1xi32> to vector<1x1xi32>
    %734 = vector.broadcast %733 : vector<1x1xi32> to vector<1x64xi32>
    %735 = vector.broadcast %c0_i32_173 : i32 to vector<1x64xi32>
    %736 = arith.select %732, %734, %735 : vector<1x64xi1>, vector<1x64xi32>
    %737 = arith.addi %725, %736 : vector<1x64xi32>
    %c0_i32_174 = arith.constant 0 : i32
    %738 = vector.broadcast %c0_i32_174 : i32 to vector<8x8xi32>
    %739 = arith.select %704, %221, %738 : vector<8x8xi1>, vector<8x8xi32>
    %cst_175 = arith.constant dense<0> : vector<8xi32>
    %740 = vector.multi_reduction <add>, %739, %cst_175 [0] : vector<8x8xi32> to vector<8xi32>
    %741 = vector.shape_cast %740 : vector<8xi32> to vector<1x8xi32>
    %c15_i32_176 = arith.constant 15 : i32
    %742 = vector.broadcast %c15_i32_176 : i32 to vector<1x8xi32>
    %743 = arith.shrsi %741, %742 : vector<1x8xi32>
    %c32768_i32_177 = arith.constant 32768 : i32
    %744 = vector.broadcast %c32768_i32_177 : i32 to vector<1x8xi32>
    %745 = arith.muli %743, %744 : vector<1x8xi32>
    %746 = arith.subi %741, %745 : vector<1x8xi32>
    %747 = vector.shape_cast %746 : vector<1x8xi32> to vector<1x1x8xi32>
    %cst_178 = arith.constant dense<0> : vector<1xi32>
    %748 = vector.multi_reduction <add>, %747, %cst_178 [1, 2] : vector<1x1x8xi32> to vector<1xi32>
    %749 = vector.shape_cast %748 : vector<1xi32> to vector<1x1x1xi32>
    %750 = vector.extract %749[0, 0, 0] : i32 from vector<1x1x1xi32>
    %751 = vector.broadcast %750 : i32 to vector<1x1xi32>
    %c30_i32 = arith.constant 30 : i32
    %752 = vector.broadcast %c30_i32 : i32 to vector<1x64xi32>
    %753 = arith.cmpi eq, %225, %752 : vector<1x64xi32>
    %c0_i32_179 = arith.constant 0 : i32
    %754 = vector.shape_cast %751 : vector<1x1xi32> to vector<1x1xi32>
    %755 = vector.broadcast %754 : vector<1x1xi32> to vector<1x64xi32>
    %756 = vector.broadcast %c0_i32_179 : i32 to vector<1x64xi32>
    %757 = arith.select %753, %755, %756 : vector<1x64xi1>, vector<1x64xi32>
    %758 = arith.addi %737, %757 : vector<1x64xi32>
    %759 = vector.shape_cast %743 : vector<1x8xi32> to vector<1x1x8xi32>
    %cst_180 = arith.constant dense<0> : vector<1xi32>
    %760 = vector.multi_reduction <add>, %759, %cst_180 [1, 2] : vector<1x1x8xi32> to vector<1xi32>
    %761 = vector.shape_cast %760 : vector<1xi32> to vector<1x1x1xi32>
    %762 = vector.extract %761[0, 0, 0] : i32 from vector<1x1x1xi32>
    %763 = vector.broadcast %762 : i32 to vector<1x1xi32>
    %c31_i32 = arith.constant 31 : i32
    %764 = vector.broadcast %c31_i32 : i32 to vector<1x64xi32>
    %765 = arith.cmpi eq, %225, %764 : vector<1x64xi32>
    %c0_i32_181 = arith.constant 0 : i32
    %766 = vector.shape_cast %763 : vector<1x1xi32> to vector<1x1xi32>
    %767 = vector.broadcast %766 : vector<1x1xi32> to vector<1x64xi32>
    %768 = vector.broadcast %c0_i32_181 : i32 to vector<1x64xi32>
    %769 = arith.select %765, %767, %768 : vector<1x64xi1>, vector<1x64xi32>
    %770 = arith.addi %758, %769 : vector<1x64xi32>
    %c8_i32_182 = arith.constant 8 : i32
    %771 = vector.broadcast %c8_i32_182 : i32 to vector<8x8xi32>
    %772 = arith.cmpi eq, %224, %771 : vector<8x8xi32>
    %c0_i32_183 = arith.constant 0 : i32
    %773 = vector.broadcast %c0_i32_183 : i32 to vector<8x8xi32>
    %774 = arith.select %772, %208, %773 : vector<8x8xi1>, vector<8x8xi32>
    %cst_184 = arith.constant dense<0> : vector<8xi32>
    %775 = vector.multi_reduction <add>, %774, %cst_184 [0] : vector<8x8xi32> to vector<8xi32>
    %776 = vector.shape_cast %775 : vector<8xi32> to vector<1x8xi32>
    %c15_i32_185 = arith.constant 15 : i32
    %777 = vector.broadcast %c15_i32_185 : i32 to vector<1x8xi32>
    %778 = arith.shrsi %776, %777 : vector<1x8xi32>
    %c32768_i32_186 = arith.constant 32768 : i32
    %779 = vector.broadcast %c32768_i32_186 : i32 to vector<1x8xi32>
    %780 = arith.muli %778, %779 : vector<1x8xi32>
    %781 = arith.subi %776, %780 : vector<1x8xi32>
    %782 = vector.shape_cast %781 : vector<1x8xi32> to vector<1x1x8xi32>
    %cst_187 = arith.constant dense<0> : vector<1xi32>
    %783 = vector.multi_reduction <add>, %782, %cst_187 [1, 2] : vector<1x1x8xi32> to vector<1xi32>
    %784 = vector.shape_cast %783 : vector<1xi32> to vector<1x1x1xi32>
    %785 = vector.extract %784[0, 0, 0] : i32 from vector<1x1x1xi32>
    %786 = vector.broadcast %785 : i32 to vector<1x1xi32>
    %c32_i32 = arith.constant 32 : i32
    %787 = vector.broadcast %c32_i32 : i32 to vector<1x64xi32>
    %788 = arith.cmpi eq, %225, %787 : vector<1x64xi32>
    %c0_i32_188 = arith.constant 0 : i32
    %789 = vector.shape_cast %786 : vector<1x1xi32> to vector<1x1xi32>
    %790 = vector.broadcast %789 : vector<1x1xi32> to vector<1x64xi32>
    %791 = vector.broadcast %c0_i32_188 : i32 to vector<1x64xi32>
    %792 = arith.select %788, %790, %791 : vector<1x64xi1>, vector<1x64xi32>
    %793 = arith.addi %770, %792 : vector<1x64xi32>
    %794 = vector.shape_cast %778 : vector<1x8xi32> to vector<1x1x8xi32>
    %cst_189 = arith.constant dense<0> : vector<1xi32>
    %795 = vector.multi_reduction <add>, %794, %cst_189 [1, 2] : vector<1x1x8xi32> to vector<1xi32>
    %796 = vector.shape_cast %795 : vector<1xi32> to vector<1x1x1xi32>
    %797 = vector.extract %796[0, 0, 0] : i32 from vector<1x1x1xi32>
    %798 = vector.broadcast %797 : i32 to vector<1x1xi32>
    %c33_i32 = arith.constant 33 : i32
    %799 = vector.broadcast %c33_i32 : i32 to vector<1x64xi32>
    %800 = arith.cmpi eq, %225, %799 : vector<1x64xi32>
    %c0_i32_190 = arith.constant 0 : i32
    %801 = vector.shape_cast %798 : vector<1x1xi32> to vector<1x1xi32>
    %802 = vector.broadcast %801 : vector<1x1xi32> to vector<1x64xi32>
    %803 = vector.broadcast %c0_i32_190 : i32 to vector<1x64xi32>
    %804 = arith.select %800, %802, %803 : vector<1x64xi1>, vector<1x64xi32>
    %805 = arith.addi %793, %804 : vector<1x64xi32>
    %c0_i32_191 = arith.constant 0 : i32
    %806 = vector.broadcast %c0_i32_191 : i32 to vector<8x8xi32>
    %807 = arith.select %772, %221, %806 : vector<8x8xi1>, vector<8x8xi32>
    %cst_192 = arith.constant dense<0> : vector<8xi32>
    %808 = vector.multi_reduction <add>, %807, %cst_192 [0] : vector<8x8xi32> to vector<8xi32>
    %809 = vector.shape_cast %808 : vector<8xi32> to vector<1x8xi32>
    %c15_i32_193 = arith.constant 15 : i32
    %810 = vector.broadcast %c15_i32_193 : i32 to vector<1x8xi32>
    %811 = arith.shrsi %809, %810 : vector<1x8xi32>
    %c32768_i32_194 = arith.constant 32768 : i32
    %812 = vector.broadcast %c32768_i32_194 : i32 to vector<1x8xi32>
    %813 = arith.muli %811, %812 : vector<1x8xi32>
    %814 = arith.subi %809, %813 : vector<1x8xi32>
    %815 = vector.shape_cast %814 : vector<1x8xi32> to vector<1x1x8xi32>
    %cst_195 = arith.constant dense<0> : vector<1xi32>
    %816 = vector.multi_reduction <add>, %815, %cst_195 [1, 2] : vector<1x1x8xi32> to vector<1xi32>
    %817 = vector.shape_cast %816 : vector<1xi32> to vector<1x1x1xi32>
    %818 = vector.extract %817[0, 0, 0] : i32 from vector<1x1x1xi32>
    %819 = vector.broadcast %818 : i32 to vector<1x1xi32>
    %c34_i32 = arith.constant 34 : i32
    %820 = vector.broadcast %c34_i32 : i32 to vector<1x64xi32>
    %821 = arith.cmpi eq, %225, %820 : vector<1x64xi32>
    %c0_i32_196 = arith.constant 0 : i32
    %822 = vector.shape_cast %819 : vector<1x1xi32> to vector<1x1xi32>
    %823 = vector.broadcast %822 : vector<1x1xi32> to vector<1x64xi32>
    %824 = vector.broadcast %c0_i32_196 : i32 to vector<1x64xi32>
    %825 = arith.select %821, %823, %824 : vector<1x64xi1>, vector<1x64xi32>
    %826 = arith.addi %805, %825 : vector<1x64xi32>
    %827 = vector.shape_cast %811 : vector<1x8xi32> to vector<1x1x8xi32>
    %cst_197 = arith.constant dense<0> : vector<1xi32>
    %828 = vector.multi_reduction <add>, %827, %cst_197 [1, 2] : vector<1x1x8xi32> to vector<1xi32>
    %829 = vector.shape_cast %828 : vector<1xi32> to vector<1x1x1xi32>
    %830 = vector.extract %829[0, 0, 0] : i32 from vector<1x1x1xi32>
    %831 = vector.broadcast %830 : i32 to vector<1x1xi32>
    %c35_i32 = arith.constant 35 : i32
    %832 = vector.broadcast %c35_i32 : i32 to vector<1x64xi32>
    %833 = arith.cmpi eq, %225, %832 : vector<1x64xi32>
    %c0_i32_198 = arith.constant 0 : i32
    %834 = vector.shape_cast %831 : vector<1x1xi32> to vector<1x1xi32>
    %835 = vector.broadcast %834 : vector<1x1xi32> to vector<1x64xi32>
    %836 = vector.broadcast %c0_i32_198 : i32 to vector<1x64xi32>
    %837 = arith.select %833, %835, %836 : vector<1x64xi1>, vector<1x64xi32>
    %838 = arith.addi %826, %837 : vector<1x64xi32>
    %c9_i32_199 = arith.constant 9 : i32
    %839 = vector.broadcast %c9_i32_199 : i32 to vector<8x8xi32>
    %840 = arith.cmpi eq, %224, %839 : vector<8x8xi32>
    %c0_i32_200 = arith.constant 0 : i32
    %841 = vector.broadcast %c0_i32_200 : i32 to vector<8x8xi32>
    %842 = arith.select %840, %208, %841 : vector<8x8xi1>, vector<8x8xi32>
    %cst_201 = arith.constant dense<0> : vector<8xi32>
    %843 = vector.multi_reduction <add>, %842, %cst_201 [0] : vector<8x8xi32> to vector<8xi32>
    %844 = vector.shape_cast %843 : vector<8xi32> to vector<1x8xi32>
    %c15_i32_202 = arith.constant 15 : i32
    %845 = vector.broadcast %c15_i32_202 : i32 to vector<1x8xi32>
    %846 = arith.shrsi %844, %845 : vector<1x8xi32>
    %c32768_i32_203 = arith.constant 32768 : i32
    %847 = vector.broadcast %c32768_i32_203 : i32 to vector<1x8xi32>
    %848 = arith.muli %846, %847 : vector<1x8xi32>
    %849 = arith.subi %844, %848 : vector<1x8xi32>
    %850 = vector.shape_cast %849 : vector<1x8xi32> to vector<1x1x8xi32>
    %cst_204 = arith.constant dense<0> : vector<1xi32>
    %851 = vector.multi_reduction <add>, %850, %cst_204 [1, 2] : vector<1x1x8xi32> to vector<1xi32>
    %852 = vector.shape_cast %851 : vector<1xi32> to vector<1x1x1xi32>
    %853 = vector.extract %852[0, 0, 0] : i32 from vector<1x1x1xi32>
    %854 = vector.broadcast %853 : i32 to vector<1x1xi32>
    %c36_i32 = arith.constant 36 : i32
    %855 = vector.broadcast %c36_i32 : i32 to vector<1x64xi32>
    %856 = arith.cmpi eq, %225, %855 : vector<1x64xi32>
    %c0_i32_205 = arith.constant 0 : i32
    %857 = vector.shape_cast %854 : vector<1x1xi32> to vector<1x1xi32>
    %858 = vector.broadcast %857 : vector<1x1xi32> to vector<1x64xi32>
    %859 = vector.broadcast %c0_i32_205 : i32 to vector<1x64xi32>
    %860 = arith.select %856, %858, %859 : vector<1x64xi1>, vector<1x64xi32>
    %861 = arith.addi %838, %860 : vector<1x64xi32>
    %862 = vector.shape_cast %846 : vector<1x8xi32> to vector<1x1x8xi32>
    %cst_206 = arith.constant dense<0> : vector<1xi32>
    %863 = vector.multi_reduction <add>, %862, %cst_206 [1, 2] : vector<1x1x8xi32> to vector<1xi32>
    %864 = vector.shape_cast %863 : vector<1xi32> to vector<1x1x1xi32>
    %865 = vector.extract %864[0, 0, 0] : i32 from vector<1x1x1xi32>
    %866 = vector.broadcast %865 : i32 to vector<1x1xi32>
    %c37_i32 = arith.constant 37 : i32
    %867 = vector.broadcast %c37_i32 : i32 to vector<1x64xi32>
    %868 = arith.cmpi eq, %225, %867 : vector<1x64xi32>
    %c0_i32_207 = arith.constant 0 : i32
    %869 = vector.shape_cast %866 : vector<1x1xi32> to vector<1x1xi32>
    %870 = vector.broadcast %869 : vector<1x1xi32> to vector<1x64xi32>
    %871 = vector.broadcast %c0_i32_207 : i32 to vector<1x64xi32>
    %872 = arith.select %868, %870, %871 : vector<1x64xi1>, vector<1x64xi32>
    %873 = arith.addi %861, %872 : vector<1x64xi32>
    %c0_i32_208 = arith.constant 0 : i32
    %874 = vector.broadcast %c0_i32_208 : i32 to vector<8x8xi32>
    %875 = arith.select %840, %221, %874 : vector<8x8xi1>, vector<8x8xi32>
    %cst_209 = arith.constant dense<0> : vector<8xi32>
    %876 = vector.multi_reduction <add>, %875, %cst_209 [0] : vector<8x8xi32> to vector<8xi32>
    %877 = vector.shape_cast %876 : vector<8xi32> to vector<1x8xi32>
    %c15_i32_210 = arith.constant 15 : i32
    %878 = vector.broadcast %c15_i32_210 : i32 to vector<1x8xi32>
    %879 = arith.shrsi %877, %878 : vector<1x8xi32>
    %c32768_i32_211 = arith.constant 32768 : i32
    %880 = vector.broadcast %c32768_i32_211 : i32 to vector<1x8xi32>
    %881 = arith.muli %879, %880 : vector<1x8xi32>
    %882 = arith.subi %877, %881 : vector<1x8xi32>
    %883 = vector.shape_cast %882 : vector<1x8xi32> to vector<1x1x8xi32>
    %cst_212 = arith.constant dense<0> : vector<1xi32>
    %884 = vector.multi_reduction <add>, %883, %cst_212 [1, 2] : vector<1x1x8xi32> to vector<1xi32>
    %885 = vector.shape_cast %884 : vector<1xi32> to vector<1x1x1xi32>
    %886 = vector.extract %885[0, 0, 0] : i32 from vector<1x1x1xi32>
    %887 = vector.broadcast %886 : i32 to vector<1x1xi32>
    %c38_i32 = arith.constant 38 : i32
    %888 = vector.broadcast %c38_i32 : i32 to vector<1x64xi32>
    %889 = arith.cmpi eq, %225, %888 : vector<1x64xi32>
    %c0_i32_213 = arith.constant 0 : i32
    %890 = vector.shape_cast %887 : vector<1x1xi32> to vector<1x1xi32>
    %891 = vector.broadcast %890 : vector<1x1xi32> to vector<1x64xi32>
    %892 = vector.broadcast %c0_i32_213 : i32 to vector<1x64xi32>
    %893 = arith.select %889, %891, %892 : vector<1x64xi1>, vector<1x64xi32>
    %894 = arith.addi %873, %893 : vector<1x64xi32>
    %895 = vector.shape_cast %879 : vector<1x8xi32> to vector<1x1x8xi32>
    %cst_214 = arith.constant dense<0> : vector<1xi32>
    %896 = vector.multi_reduction <add>, %895, %cst_214 [1, 2] : vector<1x1x8xi32> to vector<1xi32>
    %897 = vector.shape_cast %896 : vector<1xi32> to vector<1x1x1xi32>
    %898 = vector.extract %897[0, 0, 0] : i32 from vector<1x1x1xi32>
    %899 = vector.broadcast %898 : i32 to vector<1x1xi32>
    %c39_i32 = arith.constant 39 : i32
    %900 = vector.broadcast %c39_i32 : i32 to vector<1x64xi32>
    %901 = arith.cmpi eq, %225, %900 : vector<1x64xi32>
    %c0_i32_215 = arith.constant 0 : i32
    %902 = vector.shape_cast %899 : vector<1x1xi32> to vector<1x1xi32>
    %903 = vector.broadcast %902 : vector<1x1xi32> to vector<1x64xi32>
    %904 = vector.broadcast %c0_i32_215 : i32 to vector<1x64xi32>
    %905 = arith.select %901, %903, %904 : vector<1x64xi1>, vector<1x64xi32>
    %906 = arith.addi %894, %905 : vector<1x64xi32>
    %c10_i32_216 = arith.constant 10 : i32
    %907 = vector.broadcast %c10_i32_216 : i32 to vector<8x8xi32>
    %908 = arith.cmpi eq, %224, %907 : vector<8x8xi32>
    %c0_i32_217 = arith.constant 0 : i32
    %909 = vector.broadcast %c0_i32_217 : i32 to vector<8x8xi32>
    %910 = arith.select %908, %208, %909 : vector<8x8xi1>, vector<8x8xi32>
    %cst_218 = arith.constant dense<0> : vector<8xi32>
    %911 = vector.multi_reduction <add>, %910, %cst_218 [0] : vector<8x8xi32> to vector<8xi32>
    %912 = vector.shape_cast %911 : vector<8xi32> to vector<1x8xi32>
    %c15_i32_219 = arith.constant 15 : i32
    %913 = vector.broadcast %c15_i32_219 : i32 to vector<1x8xi32>
    %914 = arith.shrsi %912, %913 : vector<1x8xi32>
    %c32768_i32_220 = arith.constant 32768 : i32
    %915 = vector.broadcast %c32768_i32_220 : i32 to vector<1x8xi32>
    %916 = arith.muli %914, %915 : vector<1x8xi32>
    %917 = arith.subi %912, %916 : vector<1x8xi32>
    %918 = vector.shape_cast %917 : vector<1x8xi32> to vector<1x1x8xi32>
    %cst_221 = arith.constant dense<0> : vector<1xi32>
    %919 = vector.multi_reduction <add>, %918, %cst_221 [1, 2] : vector<1x1x8xi32> to vector<1xi32>
    %920 = vector.shape_cast %919 : vector<1xi32> to vector<1x1x1xi32>
    %921 = vector.extract %920[0, 0, 0] : i32 from vector<1x1x1xi32>
    %922 = vector.broadcast %921 : i32 to vector<1x1xi32>
    %c40_i32 = arith.constant 40 : i32
    %923 = vector.broadcast %c40_i32 : i32 to vector<1x64xi32>
    %924 = arith.cmpi eq, %225, %923 : vector<1x64xi32>
    %c0_i32_222 = arith.constant 0 : i32
    %925 = vector.shape_cast %922 : vector<1x1xi32> to vector<1x1xi32>
    %926 = vector.broadcast %925 : vector<1x1xi32> to vector<1x64xi32>
    %927 = vector.broadcast %c0_i32_222 : i32 to vector<1x64xi32>
    %928 = arith.select %924, %926, %927 : vector<1x64xi1>, vector<1x64xi32>
    %929 = arith.addi %906, %928 : vector<1x64xi32>
    %930 = vector.shape_cast %914 : vector<1x8xi32> to vector<1x1x8xi32>
    %cst_223 = arith.constant dense<0> : vector<1xi32>
    %931 = vector.multi_reduction <add>, %930, %cst_223 [1, 2] : vector<1x1x8xi32> to vector<1xi32>
    %932 = vector.shape_cast %931 : vector<1xi32> to vector<1x1x1xi32>
    %933 = vector.extract %932[0, 0, 0] : i32 from vector<1x1x1xi32>
    %934 = vector.broadcast %933 : i32 to vector<1x1xi32>
    %c41_i32 = arith.constant 41 : i32
    %935 = vector.broadcast %c41_i32 : i32 to vector<1x64xi32>
    %936 = arith.cmpi eq, %225, %935 : vector<1x64xi32>
    %c0_i32_224 = arith.constant 0 : i32
    %937 = vector.shape_cast %934 : vector<1x1xi32> to vector<1x1xi32>
    %938 = vector.broadcast %937 : vector<1x1xi32> to vector<1x64xi32>
    %939 = vector.broadcast %c0_i32_224 : i32 to vector<1x64xi32>
    %940 = arith.select %936, %938, %939 : vector<1x64xi1>, vector<1x64xi32>
    %941 = arith.addi %929, %940 : vector<1x64xi32>
    %c0_i32_225 = arith.constant 0 : i32
    %942 = vector.broadcast %c0_i32_225 : i32 to vector<8x8xi32>
    %943 = arith.select %908, %221, %942 : vector<8x8xi1>, vector<8x8xi32>
    %cst_226 = arith.constant dense<0> : vector<8xi32>
    %944 = vector.multi_reduction <add>, %943, %cst_226 [0] : vector<8x8xi32> to vector<8xi32>
    %945 = vector.shape_cast %944 : vector<8xi32> to vector<1x8xi32>
    %c15_i32_227 = arith.constant 15 : i32
    %946 = vector.broadcast %c15_i32_227 : i32 to vector<1x8xi32>
    %947 = arith.shrsi %945, %946 : vector<1x8xi32>
    %c32768_i32_228 = arith.constant 32768 : i32
    %948 = vector.broadcast %c32768_i32_228 : i32 to vector<1x8xi32>
    %949 = arith.muli %947, %948 : vector<1x8xi32>
    %950 = arith.subi %945, %949 : vector<1x8xi32>
    %951 = vector.shape_cast %950 : vector<1x8xi32> to vector<1x1x8xi32>
    %cst_229 = arith.constant dense<0> : vector<1xi32>
    %952 = vector.multi_reduction <add>, %951, %cst_229 [1, 2] : vector<1x1x8xi32> to vector<1xi32>
    %953 = vector.shape_cast %952 : vector<1xi32> to vector<1x1x1xi32>
    %954 = vector.extract %953[0, 0, 0] : i32 from vector<1x1x1xi32>
    %955 = vector.broadcast %954 : i32 to vector<1x1xi32>
    %c42_i32 = arith.constant 42 : i32
    %956 = vector.broadcast %c42_i32 : i32 to vector<1x64xi32>
    %957 = arith.cmpi eq, %225, %956 : vector<1x64xi32>
    %c0_i32_230 = arith.constant 0 : i32
    %958 = vector.shape_cast %955 : vector<1x1xi32> to vector<1x1xi32>
    %959 = vector.broadcast %958 : vector<1x1xi32> to vector<1x64xi32>
    %960 = vector.broadcast %c0_i32_230 : i32 to vector<1x64xi32>
    %961 = arith.select %957, %959, %960 : vector<1x64xi1>, vector<1x64xi32>
    %962 = arith.addi %941, %961 : vector<1x64xi32>
    %963 = vector.shape_cast %947 : vector<1x8xi32> to vector<1x1x8xi32>
    %cst_231 = arith.constant dense<0> : vector<1xi32>
    %964 = vector.multi_reduction <add>, %963, %cst_231 [1, 2] : vector<1x1x8xi32> to vector<1xi32>
    %965 = vector.shape_cast %964 : vector<1xi32> to vector<1x1x1xi32>
    %966 = vector.extract %965[0, 0, 0] : i32 from vector<1x1x1xi32>
    %967 = vector.broadcast %966 : i32 to vector<1x1xi32>
    %c43_i32 = arith.constant 43 : i32
    %968 = vector.broadcast %c43_i32 : i32 to vector<1x64xi32>
    %969 = arith.cmpi eq, %225, %968 : vector<1x64xi32>
    %c0_i32_232 = arith.constant 0 : i32
    %970 = vector.shape_cast %967 : vector<1x1xi32> to vector<1x1xi32>
    %971 = vector.broadcast %970 : vector<1x1xi32> to vector<1x64xi32>
    %972 = vector.broadcast %c0_i32_232 : i32 to vector<1x64xi32>
    %973 = arith.select %969, %971, %972 : vector<1x64xi1>, vector<1x64xi32>
    %974 = arith.addi %962, %973 : vector<1x64xi32>
    %c11_i32_233 = arith.constant 11 : i32
    %975 = vector.broadcast %c11_i32_233 : i32 to vector<8x8xi32>
    %976 = arith.cmpi eq, %224, %975 : vector<8x8xi32>
    %c0_i32_234 = arith.constant 0 : i32
    %977 = vector.broadcast %c0_i32_234 : i32 to vector<8x8xi32>
    %978 = arith.select %976, %208, %977 : vector<8x8xi1>, vector<8x8xi32>
    %cst_235 = arith.constant dense<0> : vector<8xi32>
    %979 = vector.multi_reduction <add>, %978, %cst_235 [0] : vector<8x8xi32> to vector<8xi32>
    %980 = vector.shape_cast %979 : vector<8xi32> to vector<1x8xi32>
    %c15_i32_236 = arith.constant 15 : i32
    %981 = vector.broadcast %c15_i32_236 : i32 to vector<1x8xi32>
    %982 = arith.shrsi %980, %981 : vector<1x8xi32>
    %c32768_i32_237 = arith.constant 32768 : i32
    %983 = vector.broadcast %c32768_i32_237 : i32 to vector<1x8xi32>
    %984 = arith.muli %982, %983 : vector<1x8xi32>
    %985 = arith.subi %980, %984 : vector<1x8xi32>
    %986 = vector.shape_cast %985 : vector<1x8xi32> to vector<1x1x8xi32>
    %cst_238 = arith.constant dense<0> : vector<1xi32>
    %987 = vector.multi_reduction <add>, %986, %cst_238 [1, 2] : vector<1x1x8xi32> to vector<1xi32>
    %988 = vector.shape_cast %987 : vector<1xi32> to vector<1x1x1xi32>
    %989 = vector.extract %988[0, 0, 0] : i32 from vector<1x1x1xi32>
    %990 = vector.broadcast %989 : i32 to vector<1x1xi32>
    %c44_i32 = arith.constant 44 : i32
    %991 = vector.broadcast %c44_i32 : i32 to vector<1x64xi32>
    %992 = arith.cmpi eq, %225, %991 : vector<1x64xi32>
    %c0_i32_239 = arith.constant 0 : i32
    %993 = vector.shape_cast %990 : vector<1x1xi32> to vector<1x1xi32>
    %994 = vector.broadcast %993 : vector<1x1xi32> to vector<1x64xi32>
    %995 = vector.broadcast %c0_i32_239 : i32 to vector<1x64xi32>
    %996 = arith.select %992, %994, %995 : vector<1x64xi1>, vector<1x64xi32>
    %997 = arith.addi %974, %996 : vector<1x64xi32>
    %998 = vector.shape_cast %982 : vector<1x8xi32> to vector<1x1x8xi32>
    %cst_240 = arith.constant dense<0> : vector<1xi32>
    %999 = vector.multi_reduction <add>, %998, %cst_240 [1, 2] : vector<1x1x8xi32> to vector<1xi32>
    %1000 = vector.shape_cast %999 : vector<1xi32> to vector<1x1x1xi32>
    %1001 = vector.extract %1000[0, 0, 0] : i32 from vector<1x1x1xi32>
    %1002 = vector.broadcast %1001 : i32 to vector<1x1xi32>
    %c45_i32 = arith.constant 45 : i32
    %1003 = vector.broadcast %c45_i32 : i32 to vector<1x64xi32>
    %1004 = arith.cmpi eq, %225, %1003 : vector<1x64xi32>
    %c0_i32_241 = arith.constant 0 : i32
    %1005 = vector.shape_cast %1002 : vector<1x1xi32> to vector<1x1xi32>
    %1006 = vector.broadcast %1005 : vector<1x1xi32> to vector<1x64xi32>
    %1007 = vector.broadcast %c0_i32_241 : i32 to vector<1x64xi32>
    %1008 = arith.select %1004, %1006, %1007 : vector<1x64xi1>, vector<1x64xi32>
    %1009 = arith.addi %997, %1008 : vector<1x64xi32>
    %c0_i32_242 = arith.constant 0 : i32
    %1010 = vector.broadcast %c0_i32_242 : i32 to vector<8x8xi32>
    %1011 = arith.select %976, %221, %1010 : vector<8x8xi1>, vector<8x8xi32>
    %cst_243 = arith.constant dense<0> : vector<8xi32>
    %1012 = vector.multi_reduction <add>, %1011, %cst_243 [0] : vector<8x8xi32> to vector<8xi32>
    %1013 = vector.shape_cast %1012 : vector<8xi32> to vector<1x8xi32>
    %c15_i32_244 = arith.constant 15 : i32
    %1014 = vector.broadcast %c15_i32_244 : i32 to vector<1x8xi32>
    %1015 = arith.shrsi %1013, %1014 : vector<1x8xi32>
    %c32768_i32_245 = arith.constant 32768 : i32
    %1016 = vector.broadcast %c32768_i32_245 : i32 to vector<1x8xi32>
    %1017 = arith.muli %1015, %1016 : vector<1x8xi32>
    %1018 = arith.subi %1013, %1017 : vector<1x8xi32>
    %1019 = vector.shape_cast %1018 : vector<1x8xi32> to vector<1x1x8xi32>
    %cst_246 = arith.constant dense<0> : vector<1xi32>
    %1020 = vector.multi_reduction <add>, %1019, %cst_246 [1, 2] : vector<1x1x8xi32> to vector<1xi32>
    %1021 = vector.shape_cast %1020 : vector<1xi32> to vector<1x1x1xi32>
    %1022 = vector.extract %1021[0, 0, 0] : i32 from vector<1x1x1xi32>
    %1023 = vector.broadcast %1022 : i32 to vector<1x1xi32>
    %c46_i32 = arith.constant 46 : i32
    %1024 = vector.broadcast %c46_i32 : i32 to vector<1x64xi32>
    %1025 = arith.cmpi eq, %225, %1024 : vector<1x64xi32>
    %c0_i32_247 = arith.constant 0 : i32
    %1026 = vector.shape_cast %1023 : vector<1x1xi32> to vector<1x1xi32>
    %1027 = vector.broadcast %1026 : vector<1x1xi32> to vector<1x64xi32>
    %1028 = vector.broadcast %c0_i32_247 : i32 to vector<1x64xi32>
    %1029 = arith.select %1025, %1027, %1028 : vector<1x64xi1>, vector<1x64xi32>
    %1030 = arith.addi %1009, %1029 : vector<1x64xi32>
    %1031 = vector.shape_cast %1015 : vector<1x8xi32> to vector<1x1x8xi32>
    %cst_248 = arith.constant dense<0> : vector<1xi32>
    %1032 = vector.multi_reduction <add>, %1031, %cst_248 [1, 2] : vector<1x1x8xi32> to vector<1xi32>
    %1033 = vector.shape_cast %1032 : vector<1xi32> to vector<1x1x1xi32>
    %1034 = vector.extract %1033[0, 0, 0] : i32 from vector<1x1x1xi32>
    %1035 = vector.broadcast %1034 : i32 to vector<1x1xi32>
    %c47_i32 = arith.constant 47 : i32
    %1036 = vector.broadcast %c47_i32 : i32 to vector<1x64xi32>
    %1037 = arith.cmpi eq, %225, %1036 : vector<1x64xi32>
    %c0_i32_249 = arith.constant 0 : i32
    %1038 = vector.shape_cast %1035 : vector<1x1xi32> to vector<1x1xi32>
    %1039 = vector.broadcast %1038 : vector<1x1xi32> to vector<1x64xi32>
    %1040 = vector.broadcast %c0_i32_249 : i32 to vector<1x64xi32>
    %1041 = arith.select %1037, %1039, %1040 : vector<1x64xi1>, vector<1x64xi32>
    %1042 = arith.addi %1030, %1041 : vector<1x64xi32>
    %c12_i32_250 = arith.constant 12 : i32
    %1043 = vector.broadcast %c12_i32_250 : i32 to vector<8x8xi32>
    %1044 = arith.cmpi eq, %224, %1043 : vector<8x8xi32>
    %c0_i32_251 = arith.constant 0 : i32
    %1045 = vector.broadcast %c0_i32_251 : i32 to vector<8x8xi32>
    %1046 = arith.select %1044, %208, %1045 : vector<8x8xi1>, vector<8x8xi32>
    %cst_252 = arith.constant dense<0> : vector<8xi32>
    %1047 = vector.multi_reduction <add>, %1046, %cst_252 [0] : vector<8x8xi32> to vector<8xi32>
    %1048 = vector.shape_cast %1047 : vector<8xi32> to vector<1x8xi32>
    %c15_i32_253 = arith.constant 15 : i32
    %1049 = vector.broadcast %c15_i32_253 : i32 to vector<1x8xi32>
    %1050 = arith.shrsi %1048, %1049 : vector<1x8xi32>
    %c32768_i32_254 = arith.constant 32768 : i32
    %1051 = vector.broadcast %c32768_i32_254 : i32 to vector<1x8xi32>
    %1052 = arith.muli %1050, %1051 : vector<1x8xi32>
    %1053 = arith.subi %1048, %1052 : vector<1x8xi32>
    %1054 = vector.shape_cast %1053 : vector<1x8xi32> to vector<1x1x8xi32>
    %cst_255 = arith.constant dense<0> : vector<1xi32>
    %1055 = vector.multi_reduction <add>, %1054, %cst_255 [1, 2] : vector<1x1x8xi32> to vector<1xi32>
    %1056 = vector.shape_cast %1055 : vector<1xi32> to vector<1x1x1xi32>
    %1057 = vector.extract %1056[0, 0, 0] : i32 from vector<1x1x1xi32>
    %1058 = vector.broadcast %1057 : i32 to vector<1x1xi32>
    %c48_i32 = arith.constant 48 : i32
    %1059 = vector.broadcast %c48_i32 : i32 to vector<1x64xi32>
    %1060 = arith.cmpi eq, %225, %1059 : vector<1x64xi32>
    %c0_i32_256 = arith.constant 0 : i32
    %1061 = vector.shape_cast %1058 : vector<1x1xi32> to vector<1x1xi32>
    %1062 = vector.broadcast %1061 : vector<1x1xi32> to vector<1x64xi32>
    %1063 = vector.broadcast %c0_i32_256 : i32 to vector<1x64xi32>
    %1064 = arith.select %1060, %1062, %1063 : vector<1x64xi1>, vector<1x64xi32>
    %1065 = arith.addi %1042, %1064 : vector<1x64xi32>
    %1066 = vector.shape_cast %1050 : vector<1x8xi32> to vector<1x1x8xi32>
    %cst_257 = arith.constant dense<0> : vector<1xi32>
    %1067 = vector.multi_reduction <add>, %1066, %cst_257 [1, 2] : vector<1x1x8xi32> to vector<1xi32>
    %1068 = vector.shape_cast %1067 : vector<1xi32> to vector<1x1x1xi32>
    %1069 = vector.extract %1068[0, 0, 0] : i32 from vector<1x1x1xi32>
    %1070 = vector.broadcast %1069 : i32 to vector<1x1xi32>
    %c49_i32 = arith.constant 49 : i32
    %1071 = vector.broadcast %c49_i32 : i32 to vector<1x64xi32>
    %1072 = arith.cmpi eq, %225, %1071 : vector<1x64xi32>
    %c0_i32_258 = arith.constant 0 : i32
    %1073 = vector.shape_cast %1070 : vector<1x1xi32> to vector<1x1xi32>
    %1074 = vector.broadcast %1073 : vector<1x1xi32> to vector<1x64xi32>
    %1075 = vector.broadcast %c0_i32_258 : i32 to vector<1x64xi32>
    %1076 = arith.select %1072, %1074, %1075 : vector<1x64xi1>, vector<1x64xi32>
    %1077 = arith.addi %1065, %1076 : vector<1x64xi32>
    %c0_i32_259 = arith.constant 0 : i32
    %1078 = vector.broadcast %c0_i32_259 : i32 to vector<8x8xi32>
    %1079 = arith.select %1044, %221, %1078 : vector<8x8xi1>, vector<8x8xi32>
    %cst_260 = arith.constant dense<0> : vector<8xi32>
    %1080 = vector.multi_reduction <add>, %1079, %cst_260 [0] : vector<8x8xi32> to vector<8xi32>
    %1081 = vector.shape_cast %1080 : vector<8xi32> to vector<1x8xi32>
    %c15_i32_261 = arith.constant 15 : i32
    %1082 = vector.broadcast %c15_i32_261 : i32 to vector<1x8xi32>
    %1083 = arith.shrsi %1081, %1082 : vector<1x8xi32>
    %c32768_i32_262 = arith.constant 32768 : i32
    %1084 = vector.broadcast %c32768_i32_262 : i32 to vector<1x8xi32>
    %1085 = arith.muli %1083, %1084 : vector<1x8xi32>
    %1086 = arith.subi %1081, %1085 : vector<1x8xi32>
    %1087 = vector.shape_cast %1086 : vector<1x8xi32> to vector<1x1x8xi32>
    %cst_263 = arith.constant dense<0> : vector<1xi32>
    %1088 = vector.multi_reduction <add>, %1087, %cst_263 [1, 2] : vector<1x1x8xi32> to vector<1xi32>
    %1089 = vector.shape_cast %1088 : vector<1xi32> to vector<1x1x1xi32>
    %1090 = vector.extract %1089[0, 0, 0] : i32 from vector<1x1x1xi32>
    %1091 = vector.broadcast %1090 : i32 to vector<1x1xi32>
    %c50_i32 = arith.constant 50 : i32
    %1092 = vector.broadcast %c50_i32 : i32 to vector<1x64xi32>
    %1093 = arith.cmpi eq, %225, %1092 : vector<1x64xi32>
    %c0_i32_264 = arith.constant 0 : i32
    %1094 = vector.shape_cast %1091 : vector<1x1xi32> to vector<1x1xi32>
    %1095 = vector.broadcast %1094 : vector<1x1xi32> to vector<1x64xi32>
    %1096 = vector.broadcast %c0_i32_264 : i32 to vector<1x64xi32>
    %1097 = arith.select %1093, %1095, %1096 : vector<1x64xi1>, vector<1x64xi32>
    %1098 = arith.addi %1077, %1097 : vector<1x64xi32>
    %1099 = vector.shape_cast %1083 : vector<1x8xi32> to vector<1x1x8xi32>
    %cst_265 = arith.constant dense<0> : vector<1xi32>
    %1100 = vector.multi_reduction <add>, %1099, %cst_265 [1, 2] : vector<1x1x8xi32> to vector<1xi32>
    %1101 = vector.shape_cast %1100 : vector<1xi32> to vector<1x1x1xi32>
    %1102 = vector.extract %1101[0, 0, 0] : i32 from vector<1x1x1xi32>
    %1103 = vector.broadcast %1102 : i32 to vector<1x1xi32>
    %c51_i32 = arith.constant 51 : i32
    %1104 = vector.broadcast %c51_i32 : i32 to vector<1x64xi32>
    %1105 = arith.cmpi eq, %225, %1104 : vector<1x64xi32>
    %c0_i32_266 = arith.constant 0 : i32
    %1106 = vector.shape_cast %1103 : vector<1x1xi32> to vector<1x1xi32>
    %1107 = vector.broadcast %1106 : vector<1x1xi32> to vector<1x64xi32>
    %1108 = vector.broadcast %c0_i32_266 : i32 to vector<1x64xi32>
    %1109 = arith.select %1105, %1107, %1108 : vector<1x64xi1>, vector<1x64xi32>
    %1110 = arith.addi %1098, %1109 : vector<1x64xi32>
    %c13_i32_267 = arith.constant 13 : i32
    %1111 = vector.broadcast %c13_i32_267 : i32 to vector<8x8xi32>
    %1112 = arith.cmpi eq, %224, %1111 : vector<8x8xi32>
    %c0_i32_268 = arith.constant 0 : i32
    %1113 = vector.broadcast %c0_i32_268 : i32 to vector<8x8xi32>
    %1114 = arith.select %1112, %208, %1113 : vector<8x8xi1>, vector<8x8xi32>
    %cst_269 = arith.constant dense<0> : vector<8xi32>
    %1115 = vector.multi_reduction <add>, %1114, %cst_269 [0] : vector<8x8xi32> to vector<8xi32>
    %1116 = vector.shape_cast %1115 : vector<8xi32> to vector<1x8xi32>
    %c15_i32_270 = arith.constant 15 : i32
    %1117 = vector.broadcast %c15_i32_270 : i32 to vector<1x8xi32>
    %1118 = arith.shrsi %1116, %1117 : vector<1x8xi32>
    %c32768_i32_271 = arith.constant 32768 : i32
    %1119 = vector.broadcast %c32768_i32_271 : i32 to vector<1x8xi32>
    %1120 = arith.muli %1118, %1119 : vector<1x8xi32>
    %1121 = arith.subi %1116, %1120 : vector<1x8xi32>
    %1122 = vector.shape_cast %1121 : vector<1x8xi32> to vector<1x1x8xi32>
    %cst_272 = arith.constant dense<0> : vector<1xi32>
    %1123 = vector.multi_reduction <add>, %1122, %cst_272 [1, 2] : vector<1x1x8xi32> to vector<1xi32>
    %1124 = vector.shape_cast %1123 : vector<1xi32> to vector<1x1x1xi32>
    %1125 = vector.extract %1124[0, 0, 0] : i32 from vector<1x1x1xi32>
    %1126 = vector.broadcast %1125 : i32 to vector<1x1xi32>
    %c52_i32 = arith.constant 52 : i32
    %1127 = vector.broadcast %c52_i32 : i32 to vector<1x64xi32>
    %1128 = arith.cmpi eq, %225, %1127 : vector<1x64xi32>
    %c0_i32_273 = arith.constant 0 : i32
    %1129 = vector.shape_cast %1126 : vector<1x1xi32> to vector<1x1xi32>
    %1130 = vector.broadcast %1129 : vector<1x1xi32> to vector<1x64xi32>
    %1131 = vector.broadcast %c0_i32_273 : i32 to vector<1x64xi32>
    %1132 = arith.select %1128, %1130, %1131 : vector<1x64xi1>, vector<1x64xi32>
    %1133 = arith.addi %1110, %1132 : vector<1x64xi32>
    %1134 = vector.shape_cast %1118 : vector<1x8xi32> to vector<1x1x8xi32>
    %cst_274 = arith.constant dense<0> : vector<1xi32>
    %1135 = vector.multi_reduction <add>, %1134, %cst_274 [1, 2] : vector<1x1x8xi32> to vector<1xi32>
    %1136 = vector.shape_cast %1135 : vector<1xi32> to vector<1x1x1xi32>
    %1137 = vector.extract %1136[0, 0, 0] : i32 from vector<1x1x1xi32>
    %1138 = vector.broadcast %1137 : i32 to vector<1x1xi32>
    %c53_i32 = arith.constant 53 : i32
    %1139 = vector.broadcast %c53_i32 : i32 to vector<1x64xi32>
    %1140 = arith.cmpi eq, %225, %1139 : vector<1x64xi32>
    %c0_i32_275 = arith.constant 0 : i32
    %1141 = vector.shape_cast %1138 : vector<1x1xi32> to vector<1x1xi32>
    %1142 = vector.broadcast %1141 : vector<1x1xi32> to vector<1x64xi32>
    %1143 = vector.broadcast %c0_i32_275 : i32 to vector<1x64xi32>
    %1144 = arith.select %1140, %1142, %1143 : vector<1x64xi1>, vector<1x64xi32>
    %1145 = arith.addi %1133, %1144 : vector<1x64xi32>
    %c0_i32_276 = arith.constant 0 : i32
    %1146 = vector.broadcast %c0_i32_276 : i32 to vector<8x8xi32>
    %1147 = arith.select %1112, %221, %1146 : vector<8x8xi1>, vector<8x8xi32>
    %cst_277 = arith.constant dense<0> : vector<8xi32>
    %1148 = vector.multi_reduction <add>, %1147, %cst_277 [0] : vector<8x8xi32> to vector<8xi32>
    %1149 = vector.shape_cast %1148 : vector<8xi32> to vector<1x8xi32>
    %c15_i32_278 = arith.constant 15 : i32
    %1150 = vector.broadcast %c15_i32_278 : i32 to vector<1x8xi32>
    %1151 = arith.shrsi %1149, %1150 : vector<1x8xi32>
    %c32768_i32_279 = arith.constant 32768 : i32
    %1152 = vector.broadcast %c32768_i32_279 : i32 to vector<1x8xi32>
    %1153 = arith.muli %1151, %1152 : vector<1x8xi32>
    %1154 = arith.subi %1149, %1153 : vector<1x8xi32>
    %1155 = vector.shape_cast %1154 : vector<1x8xi32> to vector<1x1x8xi32>
    %cst_280 = arith.constant dense<0> : vector<1xi32>
    %1156 = vector.multi_reduction <add>, %1155, %cst_280 [1, 2] : vector<1x1x8xi32> to vector<1xi32>
    %1157 = vector.shape_cast %1156 : vector<1xi32> to vector<1x1x1xi32>
    %1158 = vector.extract %1157[0, 0, 0] : i32 from vector<1x1x1xi32>
    %1159 = vector.broadcast %1158 : i32 to vector<1x1xi32>
    %c54_i32 = arith.constant 54 : i32
    %1160 = vector.broadcast %c54_i32 : i32 to vector<1x64xi32>
    %1161 = arith.cmpi eq, %225, %1160 : vector<1x64xi32>
    %c0_i32_281 = arith.constant 0 : i32
    %1162 = vector.shape_cast %1159 : vector<1x1xi32> to vector<1x1xi32>
    %1163 = vector.broadcast %1162 : vector<1x1xi32> to vector<1x64xi32>
    %1164 = vector.broadcast %c0_i32_281 : i32 to vector<1x64xi32>
    %1165 = arith.select %1161, %1163, %1164 : vector<1x64xi1>, vector<1x64xi32>
    %1166 = arith.addi %1145, %1165 : vector<1x64xi32>
    %1167 = vector.shape_cast %1151 : vector<1x8xi32> to vector<1x1x8xi32>
    %cst_282 = arith.constant dense<0> : vector<1xi32>
    %1168 = vector.multi_reduction <add>, %1167, %cst_282 [1, 2] : vector<1x1x8xi32> to vector<1xi32>
    %1169 = vector.shape_cast %1168 : vector<1xi32> to vector<1x1x1xi32>
    %1170 = vector.extract %1169[0, 0, 0] : i32 from vector<1x1x1xi32>
    %1171 = vector.broadcast %1170 : i32 to vector<1x1xi32>
    %c55_i32 = arith.constant 55 : i32
    %1172 = vector.broadcast %c55_i32 : i32 to vector<1x64xi32>
    %1173 = arith.cmpi eq, %225, %1172 : vector<1x64xi32>
    %c0_i32_283 = arith.constant 0 : i32
    %1174 = vector.shape_cast %1171 : vector<1x1xi32> to vector<1x1xi32>
    %1175 = vector.broadcast %1174 : vector<1x1xi32> to vector<1x64xi32>
    %1176 = vector.broadcast %c0_i32_283 : i32 to vector<1x64xi32>
    %1177 = arith.select %1173, %1175, %1176 : vector<1x64xi1>, vector<1x64xi32>
    %1178 = arith.addi %1166, %1177 : vector<1x64xi32>
    %c14_i32_284 = arith.constant 14 : i32
    %1179 = vector.broadcast %c14_i32_284 : i32 to vector<8x8xi32>
    %1180 = arith.cmpi eq, %224, %1179 : vector<8x8xi32>
    %c0_i32_285 = arith.constant 0 : i32
    %1181 = vector.broadcast %c0_i32_285 : i32 to vector<8x8xi32>
    %1182 = arith.select %1180, %208, %1181 : vector<8x8xi1>, vector<8x8xi32>
    %cst_286 = arith.constant dense<0> : vector<8xi32>
    %1183 = vector.multi_reduction <add>, %1182, %cst_286 [0] : vector<8x8xi32> to vector<8xi32>
    %1184 = vector.shape_cast %1183 : vector<8xi32> to vector<1x8xi32>
    %c15_i32_287 = arith.constant 15 : i32
    %1185 = vector.broadcast %c15_i32_287 : i32 to vector<1x8xi32>
    %1186 = arith.shrsi %1184, %1185 : vector<1x8xi32>
    %c32768_i32_288 = arith.constant 32768 : i32
    %1187 = vector.broadcast %c32768_i32_288 : i32 to vector<1x8xi32>
    %1188 = arith.muli %1186, %1187 : vector<1x8xi32>
    %1189 = arith.subi %1184, %1188 : vector<1x8xi32>
    %1190 = vector.shape_cast %1189 : vector<1x8xi32> to vector<1x1x8xi32>
    %cst_289 = arith.constant dense<0> : vector<1xi32>
    %1191 = vector.multi_reduction <add>, %1190, %cst_289 [1, 2] : vector<1x1x8xi32> to vector<1xi32>
    %1192 = vector.shape_cast %1191 : vector<1xi32> to vector<1x1x1xi32>
    %1193 = vector.extract %1192[0, 0, 0] : i32 from vector<1x1x1xi32>
    %1194 = vector.broadcast %1193 : i32 to vector<1x1xi32>
    %c56_i32 = arith.constant 56 : i32
    %1195 = vector.broadcast %c56_i32 : i32 to vector<1x64xi32>
    %1196 = arith.cmpi eq, %225, %1195 : vector<1x64xi32>
    %c0_i32_290 = arith.constant 0 : i32
    %1197 = vector.shape_cast %1194 : vector<1x1xi32> to vector<1x1xi32>
    %1198 = vector.broadcast %1197 : vector<1x1xi32> to vector<1x64xi32>
    %1199 = vector.broadcast %c0_i32_290 : i32 to vector<1x64xi32>
    %1200 = arith.select %1196, %1198, %1199 : vector<1x64xi1>, vector<1x64xi32>
    %1201 = arith.addi %1178, %1200 : vector<1x64xi32>
    %1202 = vector.shape_cast %1186 : vector<1x8xi32> to vector<1x1x8xi32>
    %cst_291 = arith.constant dense<0> : vector<1xi32>
    %1203 = vector.multi_reduction <add>, %1202, %cst_291 [1, 2] : vector<1x1x8xi32> to vector<1xi32>
    %1204 = vector.shape_cast %1203 : vector<1xi32> to vector<1x1x1xi32>
    %1205 = vector.extract %1204[0, 0, 0] : i32 from vector<1x1x1xi32>
    %1206 = vector.broadcast %1205 : i32 to vector<1x1xi32>
    %c57_i32 = arith.constant 57 : i32
    %1207 = vector.broadcast %c57_i32 : i32 to vector<1x64xi32>
    %1208 = arith.cmpi eq, %225, %1207 : vector<1x64xi32>
    %c0_i32_292 = arith.constant 0 : i32
    %1209 = vector.shape_cast %1206 : vector<1x1xi32> to vector<1x1xi32>
    %1210 = vector.broadcast %1209 : vector<1x1xi32> to vector<1x64xi32>
    %1211 = vector.broadcast %c0_i32_292 : i32 to vector<1x64xi32>
    %1212 = arith.select %1208, %1210, %1211 : vector<1x64xi1>, vector<1x64xi32>
    %1213 = arith.addi %1201, %1212 : vector<1x64xi32>
    %c0_i32_293 = arith.constant 0 : i32
    %1214 = vector.broadcast %c0_i32_293 : i32 to vector<8x8xi32>
    %1215 = arith.select %1180, %221, %1214 : vector<8x8xi1>, vector<8x8xi32>
    %cst_294 = arith.constant dense<0> : vector<8xi32>
    %1216 = vector.multi_reduction <add>, %1215, %cst_294 [0] : vector<8x8xi32> to vector<8xi32>
    %1217 = vector.shape_cast %1216 : vector<8xi32> to vector<1x8xi32>
    %c15_i32_295 = arith.constant 15 : i32
    %1218 = vector.broadcast %c15_i32_295 : i32 to vector<1x8xi32>
    %1219 = arith.shrsi %1217, %1218 : vector<1x8xi32>
    %c32768_i32_296 = arith.constant 32768 : i32
    %1220 = vector.broadcast %c32768_i32_296 : i32 to vector<1x8xi32>
    %1221 = arith.muli %1219, %1220 : vector<1x8xi32>
    %1222 = arith.subi %1217, %1221 : vector<1x8xi32>
    %1223 = vector.shape_cast %1222 : vector<1x8xi32> to vector<1x1x8xi32>
    %cst_297 = arith.constant dense<0> : vector<1xi32>
    %1224 = vector.multi_reduction <add>, %1223, %cst_297 [1, 2] : vector<1x1x8xi32> to vector<1xi32>
    %1225 = vector.shape_cast %1224 : vector<1xi32> to vector<1x1x1xi32>
    %1226 = vector.extract %1225[0, 0, 0] : i32 from vector<1x1x1xi32>
    %1227 = vector.broadcast %1226 : i32 to vector<1x1xi32>
    %c58_i32 = arith.constant 58 : i32
    %1228 = vector.broadcast %c58_i32 : i32 to vector<1x64xi32>
    %1229 = arith.cmpi eq, %225, %1228 : vector<1x64xi32>
    %c0_i32_298 = arith.constant 0 : i32
    %1230 = vector.shape_cast %1227 : vector<1x1xi32> to vector<1x1xi32>
    %1231 = vector.broadcast %1230 : vector<1x1xi32> to vector<1x64xi32>
    %1232 = vector.broadcast %c0_i32_298 : i32 to vector<1x64xi32>
    %1233 = arith.select %1229, %1231, %1232 : vector<1x64xi1>, vector<1x64xi32>
    %1234 = arith.addi %1213, %1233 : vector<1x64xi32>
    %1235 = vector.shape_cast %1219 : vector<1x8xi32> to vector<1x1x8xi32>
    %cst_299 = arith.constant dense<0> : vector<1xi32>
    %1236 = vector.multi_reduction <add>, %1235, %cst_299 [1, 2] : vector<1x1x8xi32> to vector<1xi32>
    %1237 = vector.shape_cast %1236 : vector<1xi32> to vector<1x1x1xi32>
    %1238 = vector.extract %1237[0, 0, 0] : i32 from vector<1x1x1xi32>
    %1239 = vector.broadcast %1238 : i32 to vector<1x1xi32>
    %c59_i32 = arith.constant 59 : i32
    %1240 = vector.broadcast %c59_i32 : i32 to vector<1x64xi32>
    %1241 = arith.cmpi eq, %225, %1240 : vector<1x64xi32>
    %c0_i32_300 = arith.constant 0 : i32
    %1242 = vector.shape_cast %1239 : vector<1x1xi32> to vector<1x1xi32>
    %1243 = vector.broadcast %1242 : vector<1x1xi32> to vector<1x64xi32>
    %1244 = vector.broadcast %c0_i32_300 : i32 to vector<1x64xi32>
    %1245 = arith.select %1241, %1243, %1244 : vector<1x64xi1>, vector<1x64xi32>
    %1246 = arith.addi %1234, %1245 : vector<1x64xi32>
    %c15_i32_301 = arith.constant 15 : i32
    %1247 = vector.broadcast %c15_i32_301 : i32 to vector<8x8xi32>
    %1248 = arith.cmpi eq, %224, %1247 : vector<8x8xi32>
    %c0_i32_302 = arith.constant 0 : i32
    %1249 = vector.broadcast %c0_i32_302 : i32 to vector<8x8xi32>
    %1250 = arith.select %1248, %208, %1249 : vector<8x8xi1>, vector<8x8xi32>
    %cst_303 = arith.constant dense<0> : vector<8xi32>
    %1251 = vector.multi_reduction <add>, %1250, %cst_303 [0] : vector<8x8xi32> to vector<8xi32>
    %1252 = vector.shape_cast %1251 : vector<8xi32> to vector<1x8xi32>
    %c15_i32_304 = arith.constant 15 : i32
    %1253 = vector.broadcast %c15_i32_304 : i32 to vector<1x8xi32>
    %1254 = arith.shrsi %1252, %1253 : vector<1x8xi32>
    %c32768_i32_305 = arith.constant 32768 : i32
    %1255 = vector.broadcast %c32768_i32_305 : i32 to vector<1x8xi32>
    %1256 = arith.muli %1254, %1255 : vector<1x8xi32>
    %1257 = arith.subi %1252, %1256 : vector<1x8xi32>
    %1258 = vector.shape_cast %1257 : vector<1x8xi32> to vector<1x1x8xi32>
    %cst_306 = arith.constant dense<0> : vector<1xi32>
    %1259 = vector.multi_reduction <add>, %1258, %cst_306 [1, 2] : vector<1x1x8xi32> to vector<1xi32>
    %1260 = vector.shape_cast %1259 : vector<1xi32> to vector<1x1x1xi32>
    %1261 = vector.extract %1260[0, 0, 0] : i32 from vector<1x1x1xi32>
    %1262 = vector.broadcast %1261 : i32 to vector<1x1xi32>
    %c60_i32 = arith.constant 60 : i32
    %1263 = vector.broadcast %c60_i32 : i32 to vector<1x64xi32>
    %1264 = arith.cmpi eq, %225, %1263 : vector<1x64xi32>
    %c0_i32_307 = arith.constant 0 : i32
    %1265 = vector.shape_cast %1262 : vector<1x1xi32> to vector<1x1xi32>
    %1266 = vector.broadcast %1265 : vector<1x1xi32> to vector<1x64xi32>
    %1267 = vector.broadcast %c0_i32_307 : i32 to vector<1x64xi32>
    %1268 = arith.select %1264, %1266, %1267 : vector<1x64xi1>, vector<1x64xi32>
    %1269 = arith.addi %1246, %1268 : vector<1x64xi32>
    %1270 = vector.shape_cast %1254 : vector<1x8xi32> to vector<1x1x8xi32>
    %cst_308 = arith.constant dense<0> : vector<1xi32>
    %1271 = vector.multi_reduction <add>, %1270, %cst_308 [1, 2] : vector<1x1x8xi32> to vector<1xi32>
    %1272 = vector.shape_cast %1271 : vector<1xi32> to vector<1x1x1xi32>
    %1273 = vector.extract %1272[0, 0, 0] : i32 from vector<1x1x1xi32>
    %1274 = vector.broadcast %1273 : i32 to vector<1x1xi32>
    %c61_i32 = arith.constant 61 : i32
    %1275 = vector.broadcast %c61_i32 : i32 to vector<1x64xi32>
    %1276 = arith.cmpi eq, %225, %1275 : vector<1x64xi32>
    %c0_i32_309 = arith.constant 0 : i32
    %1277 = vector.shape_cast %1274 : vector<1x1xi32> to vector<1x1xi32>
    %1278 = vector.broadcast %1277 : vector<1x1xi32> to vector<1x64xi32>
    %1279 = vector.broadcast %c0_i32_309 : i32 to vector<1x64xi32>
    %1280 = arith.select %1276, %1278, %1279 : vector<1x64xi1>, vector<1x64xi32>
    %1281 = arith.addi %1269, %1280 : vector<1x64xi32>
    %c0_i32_310 = arith.constant 0 : i32
    %1282 = vector.broadcast %c0_i32_310 : i32 to vector<8x8xi32>
    %1283 = arith.select %1248, %221, %1282 : vector<8x8xi1>, vector<8x8xi32>
    %cst_311 = arith.constant dense<0> : vector<8xi32>
    %1284 = vector.multi_reduction <add>, %1283, %cst_311 [0] : vector<8x8xi32> to vector<8xi32>
    %1285 = vector.shape_cast %1284 : vector<8xi32> to vector<1x8xi32>
    %c15_i32_312 = arith.constant 15 : i32
    %1286 = vector.broadcast %c15_i32_312 : i32 to vector<1x8xi32>
    %1287 = arith.shrsi %1285, %1286 : vector<1x8xi32>
    %c32768_i32_313 = arith.constant 32768 : i32
    %1288 = vector.broadcast %c32768_i32_313 : i32 to vector<1x8xi32>
    %1289 = arith.muli %1287, %1288 : vector<1x8xi32>
    %1290 = arith.subi %1285, %1289 : vector<1x8xi32>
    %1291 = vector.shape_cast %1290 : vector<1x8xi32> to vector<1x1x8xi32>
    %cst_314 = arith.constant dense<0> : vector<1xi32>
    %1292 = vector.multi_reduction <add>, %1291, %cst_314 [1, 2] : vector<1x1x8xi32> to vector<1xi32>
    %1293 = vector.shape_cast %1292 : vector<1xi32> to vector<1x1x1xi32>
    %1294 = vector.extract %1293[0, 0, 0] : i32 from vector<1x1x1xi32>
    %1295 = vector.broadcast %1294 : i32 to vector<1x1xi32>
    %c62_i32 = arith.constant 62 : i32
    %1296 = vector.broadcast %c62_i32 : i32 to vector<1x64xi32>
    %1297 = arith.cmpi eq, %225, %1296 : vector<1x64xi32>
    %c0_i32_315 = arith.constant 0 : i32
    %1298 = vector.shape_cast %1295 : vector<1x1xi32> to vector<1x1xi32>
    %1299 = vector.broadcast %1298 : vector<1x1xi32> to vector<1x64xi32>
    %1300 = vector.broadcast %c0_i32_315 : i32 to vector<1x64xi32>
    %1301 = arith.select %1297, %1299, %1300 : vector<1x64xi1>, vector<1x64xi32>
    %1302 = arith.addi %1281, %1301 : vector<1x64xi32>
    %1303 = vector.shape_cast %1287 : vector<1x8xi32> to vector<1x1x8xi32>
    %cst_316 = arith.constant dense<0> : vector<1xi32>
    %1304 = vector.multi_reduction <add>, %1303, %cst_316 [1, 2] : vector<1x1x8xi32> to vector<1xi32>
    %1305 = vector.shape_cast %1304 : vector<1xi32> to vector<1x1x1xi32>
    %1306 = vector.extract %1305[0, 0, 0] : i32 from vector<1x1x1xi32>
    %1307 = vector.broadcast %1306 : i32 to vector<1x1xi32>
    %c63_i32 = arith.constant 63 : i32
    %1308 = vector.broadcast %c63_i32 : i32 to vector<1x64xi32>
    %1309 = arith.cmpi eq, %225, %1308 : vector<1x64xi32>
    %c0_i32_317 = arith.constant 0 : i32
    %1310 = vector.shape_cast %1307 : vector<1x1xi32> to vector<1x1xi32>
    %1311 = vector.broadcast %1310 : vector<1x1xi32> to vector<1x64xi32>
    %1312 = vector.broadcast %c0_i32_317 : i32 to vector<1x64xi32>
    %1313 = arith.select %1309, %1311, %1312 : vector<1x64xi1>, vector<1x64xi32>
    %1314 = arith.addi %1302, %1313 : vector<1x64xi32>
    %c0_318 = arith.constant 0 : index
    %c0_319 = arith.constant 0 : index
    %c0_320 = arith.constant 0 : index
    %c0_321 = arith.constant 0 : index
    %1315 = vector.load %arg5[%c0_318, %c0_319, %c0_320, %c0_321] : memref<1x1x1x64xi32, #tpu.memory_space<vmem>>, vector<1x1x1x64xi32>
    %1316 = vector.shape_cast %1315 : vector<1x1x1x64xi32> to vector<1x64xi32>
    %1317 = arith.addi %1316, %1314 : vector<1x64xi32>
    %c0_322 = arith.constant 0 : index
    %c0_323 = arith.constant 0 : index
    %c0_324 = arith.constant 0 : index
    %c0_325 = arith.constant 0 : index
    %1318 = vector.load %arg5[%c0_322, %c0_323, %c0_324, %c0_325] : memref<1x1x1x64xi32, #tpu.memory_space<vmem>>, vector<1x1x1x64xi32>
    %1319 = vector.shape_cast %1318 : vector<1x1x1x64xi32> to vector<1x64xi32>
    %1320 = vector.shape_cast %1317 : vector<1x64xi32> to vector<1x1x1x64xi32>
    tpu.vector_store %arg5[%c0_322, %c0_323, %c0_324, %c0_325], %1320 {strides = array<i32>} : memref<1x1x1x64xi32, #tpu.memory_space<vmem>>, vector<1x1x1x64xi32>,
    return
  }
  func.func @transform_0(%arg0: i32, %arg1: i32, %arg2: i32) -> (i32, i32, i32) {
    %c0_i32 = arith.constant 0 : i32
    %c0_i32_0 = arith.constant 0 : i32
    return %arg0, %arg1, %c0_i32 : i32, i32, i32
  }
  func.func @transform_1(%arg0: i32, %arg1: i32, %arg2: i32) -> (i32, i32, i32) {
    %c0_i32 = arith.constant 0 : i32
    %c0_i32_0 = arith.constant 0 : i32
    return %arg0, %c0_i32, %arg2 : i32, i32, i32
  }
  func.func @transform_2(%arg0: i32, %arg1: i32, %arg2: i32) -> (i32, i32, i32, i32) {
    %c0_i32 = arith.constant 0 : i32
    %c0_i32_0 = arith.constant 0 : i32
    %c0_i32_1 = arith.constant 0 : i32
    return %arg0, %arg1, %c0_i32, %c0_i32_0 : i32, i32, i32, i32
  }
}

</mosaic_0001>

<bundles_post_ra>
// kernel: tpu_custom_call.1
= control target key start
LH: loop header
LB: loop body
LE: loop exit
PB: predicated region body
PF: predicated region fallthrough
CT: control target
= control target key end

     0   :  { %7 = vsyncpa [#allocation3], 0  ;;  %s3177_s0 = inlined_call_operand.vmem [shape: f32[2,8,6], index: 0, kind: input, shape index: {}]   ;;  %s3178_s1 = inlined_call_operand.vmem [shape: f32[2,6,8], index: 1, kind: input, shape index: {}]   ;;  %s3179_s2 = inlined_call_operand.hbm [shape: s32[2,1,1,64], index: 2, kind: output, shape index: {}]  }
   0x1   :  { %9 = vsyncpa [#allocation3 + $0x1], 0  ;;  %s2325_s9 = smov 0   ;;  %s2327_s10 = smov 0  }
   0x2   :  { %s2329_s11 = smov 0   ;;  %s2331_s12 = smov 0  }
   0x3   :  { %s2333_s13 = smov 0   ;;  %s2335_s14 = smov 0  }
   0x4 LB: > { %s2014_s15 = sadd.s32 4294967295, %s2301_s14   ;;  %s2015_s16 = sadd.s32 4294967294, %s2301_s14   ;;  %s2301_s14 = sphi %s2335_s14, %s15_s14   ;;  %s2297_s13 = sphi %s2333_s13, %s3210_s13   ;;  %s2293_s12 = sphi %s2331_s12, %s3209_s12   ;;  %s2289_s11 = sphi %s2329_s11, %s3208_s11   ;;  %s2285_s10 = sphi %s2327_s10, %s3207_s10   ;;  %s2281_s9 = sphi %s2325_s9, %s3206_s9  }
   0x5   : > { %s34_s17 = sadd.s32 1, %s2297_s13  ;;  %s99_s18 = sadd.s32 1, %s2289_s11 }
   0x6   : > { %p36_p0 = scmp.ge.s32.totalorder %s34_s17, 2  ;;  %p109_p1 = scmp.ne.s32.totalorder %s2289_s11, %s2285_s10 }
   0x7   : > { %p110_p2 = scmp.eq.s32.totalorder %s2014_s15, 1  ;;  %p115_p3 = scmp.ne.s32.totalorder %s2285_s10, %s2281_s9 }
   0x8   : > { %s3212_s17 = smov (%p36_p0, %s34_s17), 0  ;;  %p116_p5 = scmp.eq.s32.totalorder %s2015_s16, 1 }
   0x9   : > { %p2365_p4 = por %p110_p2, %p109_p1  ;;  %s94_s20 = ssub.s32 %s2297_s13, %s3212_s17 }
   0xa   : > { %p2018_p6 = scmp.ge.s32.totalorder %s2301_s14, 1  ;;  %p97_p7 = scmp.eq.s32.totalorder %s94_s20, 0 }
   0xb   : > { %p2372_p8 = por %p116_p5, %p115_p3  ;;  %p154_p9 = scmp.lt.s32.totalorder %s2301_s14, 3 }
   0xc   : > { %s2378_s22 = scalar_select %p97_p7, %s2289_s11, %s99_s18  }
   0xd   : > { %p155_p10 = pnand %p2018_p6, %p154_p9 }
   0xe   : > { %p184_p11 = scmp.lt.s32.totalorder (!%p155_p10), %s2293_s12, 1 }
   0xf   : > { %158 = sbr.rel (%p155_p10) target bundleno = 724 (0x2d4), region = 28 }
  0x14   : > { %v2303_v0 = vmov 2   ;;  %v3180_v1 = vmov 0   ;;  %s185_s23 = scalar_select %p184_p11, %s2293_s12, 1  ;;  %v2305_v3 = vmov 5   ;;  %v2306_v4 = vmov 1  }
  0x15   : > { %2215 = vset.pattern.permute.xlu1 %v2303_v0  ;;  %2213 = vset.pattern.permute.xlu0 %v3180_v1  ;;  %v2307_v5 = vmov 4   ;;  %v2308_v6 = vmov 3   ;;  %v206_v7 = vlaneseq }
  0x16   : > { %s2019_s24 = sshll.u32 %s185_s23, 3 }
  0x17   : > { %s190_s27 = scalar_lea.vmem %s3177_s0, %s2019_s24  ;;  %v2387_v8 = vshrl.u32 %v206_v7, 7  ;;  %s197_s30 = scalar_lea.vmem %s3178_s1, %s2019_s24 }
  0x18   : > { %v204_v2 = vld [vmem:[%s190_s27] sm:$0xff]  ;;  %s182_s27 = sand.u32 1, %s2285_s10  }
  0x19   : > { %230 = vperm.xlu1 %2215, %v204_v2   ;;  %212 = vperm.xlu0 %2213, %v204_v2   ;;  %v208_v9 = vsub.s32 0, %v2387_v8  ;;  %v2393_v10 = vld [vmem:[%s197_s30] sm:$0x3f]  ;;  %v227_v11 = vsub.s32 2, %v2387_v8  ;;  %v218_v12 = vsub.s32 1, %v2387_v8  ;;  %v309_v59 = vsub.s32 5, %v2387_v8 }
  0x1a   : > { %v303_v60 = vsub.s32 4, %v2387_v8  ;;  %v298_v61 = vsub.s32 3, %v2387_v8  ;;  %s3074_s30 = scalar_lea.vmem [#allocation2], %s182_s27 }
  0x1b   : > { %v209_v14 = vrot.slane %v2393_v10, %v208_v9  ;;  %v228_v16 = vrot.slane %v2393_v10, %v227_v11  ;;  %v219_v17 = vrot.slane %v2393_v10, %v218_v12  ;;  %v310_v9 = vrot.slane %v2393_v10, %v309_v59 }
  0x1c   : > { %v304_v11 = vrot.slane %v2393_v10, %v303_v60  ;;  %v299_v12 = vrot.slane %v2393_v10, %v298_v61 }
  0x1d   : > { %2216 = vset.pattern.permute.xlu1 %v2305_v3  ;;  %2214 = vset.pattern.permute.xlu0 %v2306_v4 }
  0x1e   : > { %247 = vperm.xlu1 %2216, %v204_v2   ;;  %221 = vperm.xlu0 %2214, %v204_v2  }
  0x22   : > { %2217 = vset.pattern.permute.xlu1 %v2307_v5  ;;  %2218 = vset.pattern.permute.xlu0 %v2308_v6 }
  0x23   : > { %252 = vperm.xlu1 %2217, %v204_v2   ;;  %258 = vperm.xlu0 %2218, %v204_v2  }
  0x94   : > { %v231_v13 = vpop.permute.xlu1 %230  ;;  %v213_v15 = vpop.permute.xlu0 %212 }
  0x95   : > { %v215_v18 = vsub.f32 %v209_v14, %v213_v15  ;;  %v233_v21 = vsub.f32 %v228_v16, %v231_v13 }
  0x97   : > { %v234_v23 = vmul.f32 %v215_v18, %v215_v18  ;;  %v237_v25 = vmul.f32 %v233_v21, %v233_v21 }
  0x99   : > { %v2400_v19 = vpop.permute.xlu1 %247  ;;  %v222_v20 = vpop.permute.xlu0 %221 }
  0x9a   : > { %v224_v22 = vsub.f32 %v219_v17, %v222_v20  ;;  %v262_v37 = vmul.f32 %v2400_v19, %v215_v18  ;;  %v316_v39 = vmul.f32 %v2400_v19, %v233_v21 }
  0x9c   : > { %v235_v24 = vmul.f32 %v224_v22, %v224_v22  ;;  %v250_v29 = vmul.f32 %v2400_v19, %v224_v22 }
  0x9e   : > { %v236_v26 = vadd.f32 %v235_v24, %v234_v23  ;;  %v2402_v27 = vpop.permute.xlu1 %252  ;;  %v2404_v28 = vpop.permute.xlu0 %258 }
  0x9f   : > { %v255_v30 = vmul.f32 %v2402_v27, %v233_v21  ;;  %v264_v31 = vmul.f32 %v2402_v27, %v215_v18  ;;  %v314_v32 = vmul.f32 %v2402_v27, %v224_v22  ;;  %v261_v34 = vmul.f32 %v2404_v28, %v233_v21 }
  0xa0   : > { %v238_v33 = vadd.f32 %v237_v25, %v236_v26  ;;  %v265_v35 = vmul.f32 %v2404_v28, %v224_v22  ;;  %v313_v36 = vmul.f32 %v2404_v28, %v215_v18 }
  0xa1   : > { %v256_v38 = vsub.f32 %v250_v29, %v255_v30  ;;  %v263_v41 = vsub.f32 %v261_v34, %v262_v37 }
  0xa2   : > { %2219 = vrsqrt.f32 %v238_v33  ;;  %v266_v42 = vsub.f32 %v264_v31, %v265_v35  ;;  %v315_v43 = vadd.f32 %v314_v32, %v313_v36  ;;  %vm241_vm0 = vcmp.eq.f32.partialorder %v238_v33, inf }
  0xa3   : > { %v267_v40 = vmul.f32 %v256_v38, %v256_v38  ;;  %v268_v44 = vmul.f32 %v263_v41, %v263_v41  ;;  %v244_v52 = vand.u32 2147483648, %v238_v33  ;;  %vm243_vm1 = vcmp.eq.f32.partialorder %v238_v33, 0.0 }
  0xa4   : > { %v317_v45 = vadd.f32 %v316_v39, %v315_v43  ;;  %v270_v47 = vmul.f32 %v266_v42, %v266_v42  ;;  %v324_v43 = vmul.f32 %v304_v11, %v2402_v27 }
  0xa5   : > { %v269_v46 = vadd.f32 %v268_v44, %v267_v40  ;;  %v323_v44 = vmul.f32 %v299_v12, %v2404_v28 }
  0xa7   : > { %v271_v48 = vadd.f32 %v270_v47, %v269_v46 }
  0xa9   : > { %v272_v49 = vadd.f32 1e-12, %v271_v48 }
  0xab   : > { %2221 = vrsqrt.f32 %v272_v49  ;;  %v325_v49 = vadd.f32 %v324_v43, %v323_v44 }
  0xaf   : > { %v2220_v50 = vpop.eup %2219 }
  0xb0   : > { %v240_v51 = vmul.f32 %v2220_v50, %v238_v33  ;;  %v326_v50 = vmul.f32 %v310_v9, %v2400_v19 }
  0xb2   : > { %v242_v53 = vsel %vm241_vm0, %v238_v33, %v240_v51 }
  0xb3   : > { %v245_v54 = vsel %vm243_vm1, %v244_v52, %v242_v53 }
  0xb4   : > { %v336_v55 = vadd.f32 1e-06, %v245_v54 }
  0xb6   : > { %v337_v56 = vmul.f32 -0.5, %v336_v55  ;;  %v340_v57 = vmul.f32 0.0, %v336_v55  ;;  %v344_v58 = vmul.f32 0.5, %v336_v55  ;;  %v327_v55 = vadd.f32 %v326_v50, %v325_v49 }
  0xb8   : > { %vm338_vm2 = vcmp.ge.f32.partialorder %v317_v45, %v337_v56  ;;  %vm341_vm3 = vcmp.ge.f32.partialorder %v317_v45, %v340_v57  ;;  %vm345_vm4 = vcmp.ge.f32.partialorder %v317_v45, %v344_v58  ;;  %v2222_v0 = vpop.eup %2221  ;;  %v349_v58 = vmul.f32 -1.0, %v327_v55 }
  0xb9   : > { %v339_v62 = vsel %vm338_vm2, 1, %v3180_v1  ;;  %v342_v63 = vsel %vm341_vm3, 1, %v3180_v1  ;;  %v274_v3 = vmul.f32 %v2222_v0, %v256_v38  ;;  %v275_v4 = vmul.f32 %v2222_v0, %v263_v41 }
  0xba   : > { %v343_v2 = vadd.s32 %v342_v63, %v339_v62  ;;  %v276_v5 = vmul.f32 %v2222_v0, %v266_v42  ;;  %v346_v6 = vsel %vm345_vm4, 1, %v3180_v1 }
  0xbb   : > { %v278_v15 = vmul.f32 %v275_v4, %v2400_v19  ;;  %v280_v16 = vmul.f32 %v274_v3, %v2400_v19  ;;  %v283_v18 = vmul.f32 %v275_v4, %v2404_v28  ;;  %v284_v20 = vmul.f32 %v274_v3, %v2402_v27 }
  0xbc   : > { %v347_v13 = vadd.s32 %v346_v6, %v343_v2  ;;  %v277_v14 = vmul.f32 %v276_v5, %v2402_v27  ;;  %v281_v17 = vmul.f32 %v276_v5, %v2404_v28  ;;  %v300_v21 = vmul.f32 %v299_v12, %v274_v3 }
  0xbd   : > { %v305_v22 = vmul.f32 %v304_v11, %v275_v4  ;;  %v285_v25 = vsub.f32 %v283_v18, %v284_v20  ;;  %v311_v10 = vmul.f32 %v310_v9, %v276_v5  ;;  %v2439_v27 = vand.u32 127, %v206_v7 }
  0xbe   : > { %v279_v23 = vsub.f32 %v277_v14, %v278_v15  ;;  %v282_v24 = vsub.f32 %v280_v16, %v281_v17 }
  0xbf   : > { %v306_v26 = vadd.f32 %v305_v22, %v300_v21  ;;  %v289_v33 = vmul.f32 %v285_v25, %v285_v25  ;;  %vm372_vm13 = vcmp.ne.s32.totalorder %v2387_v8, %v2439_v27  ;;  %vm375_vm14 = vcmp.lt.s32.totalorder %v2439_v27, 8 }
  0xc0   : > { %v286_v29 = vmul.f32 %v279_v23, %v279_v23  ;;  %v287_v30 = vmul.f32 %v282_v24, %v282_v24  ;;  %vm376_vm3 = vmand %vm372_vm13, %vm375_vm14 }
  0xc1   : > { %v312_v31 = vadd.f32 %v311_v10, %v306_v26 }
  0xc2   : > { %v288_v32 = vadd.f32 %v287_v30, %v286_v29 }
  0xc3   : > { %vm328_vm5 = vcmp.ge.f32.partialorder %v312_v31, -0.5  ;;  %vm330_vm6 = vcmp.ge.f32.partialorder %v312_v31, 0.0  ;;  %vm333_vm7 = vcmp.ge.f32.partialorder %v312_v31, 0.5 }
  0xc4   : > { %v290_v34 = vadd.f32 %v289_v33, %v288_v32  ;;  %v329_v35 = vsel %vm328_vm5, 1, %v3180_v1  ;;  %v331_v36 = vsel %vm330_vm6, 1, %v3180_v1  ;;  %v334_v39 = vsel %vm333_vm7, 1, %v3180_v1 }
  0xc5   : > { %v332_v37 = vadd.s32 %v331_v36, %v329_v35  ;;  %vm393_vm5 = vcmask 64512  }
  0xc6   : > { %v291_v38 = vadd.f32 1e-12, %v290_v34 }
  0xc7   : > { %v335_v40 = vadd.s32 %v334_v39, %v332_v37 }
  0xc8   : > { %2223 = vrsqrt.f32 %v291_v38 }
  0xc9   : > { %v389_v41 = vmul.u32 4, %v335_v40 }
  0xcb   : > { %v2433_v42 = vadd.s32 %v389_v41, %v347_v13 }
  0xcd   : > { %vm391_vm4 = vcmp.eq.s32.totalorder %v2433_v42, 0  ;;  %vm486_vm6 = vcmp.eq.s32.totalorder %v2433_v42, 1  ;;  %vm581_vm7 = vcmp.eq.s32.totalorder %v2433_v42, 2  ;;  %vm1151_vm13 = vcmp.eq.s32.totalorder %v2433_v42, 8 }
  0xce   : > { %vm1246_vm14 = vcmp.eq.s32.totalorder %v2433_v42, 9 }
  0xd5   : > { %v2224_v45 = vpop.eup %2223 }
  0xd6   : > { %v293_v46 = vmul.f32 %v2224_v45, %v279_v23  ;;  %v294_v47 = vmul.f32 %v2224_v45, %v282_v24  ;;  %v295_v48 = vmul.f32 %v2224_v45, %v285_v25 }
  0xd8   : > { %v318_v51 = vmul.f32 %v299_v12, %v293_v46  ;;  %v319_v52 = vmul.f32 %v304_v11, %v294_v47  ;;  %v321_v54 = vmul.f32 %v310_v9, %v295_v48 }
  0xda   : > { %v320_v53 = vadd.f32 %v319_v52, %v318_v51 }
  0xdc   : > { %v322_v56 = vadd.f32 %v321_v54, %v320_v53 }
  0xde   : > { %v348_v57 = vmul.f32 6.123234e-17, %v322_v56  ;;  %vm352_vm8 = vcmp.ge.f32.partialorder %v322_v56, 0.0 }
  0xdf   : > { %v355_v19 = vsel %vm352_vm8, 1, %v3180_v1 }
  0xe0   : > { %v350_v59 = vsub.f32 %v348_v57, %v349_v58  ;;  %v357_v60 = vsub.f32 %v348_v57, %v327_v55 }
  0xe2   : > { %vm351_vm9 = vcmp.ge.f32.partialorder %v350_v59, 0.0  ;;  %vm358_vm10 = vcmp.ge.f32.partialorder %v357_v60, 0.0 }
  0xe3   : > { %vm353_vm11 = vmor %vm351_vm9, %vm352_vm8  ;;  %vm771_vm9 = vcmp.eq.s32.totalorder %v2433_v42, 4 }
  0xe4   : > { %v354_v28 = vsel %vm353_vm11, 1, %v3180_v1  ;;  %vm359_vm12 = vmand %vm358_vm10, %vm352_vm8  ;;  %vm676_vm8 = vcmp.eq.s32.totalorder %v2433_v42, 3  ;;  %vm866_vm10 = vcmp.eq.s32.totalorder %v2433_v42, 5  ;;  %vm961_vm11 = vcmp.eq.s32.totalorder %v2433_v42, 6 }
  0xe5   : > { %v356_v61 = vadd.s32 %v355_v19, %v354_v28  ;;  %v360_v62 = vsel %vm359_vm12, 1, %v3180_v1  ;;  %vm1056_vm12 = vcmp.eq.s32.totalorder %v2433_v42, 7 }
  0xe7   : > { %v361_v63 = vadd.s32 %v360_v62, %v356_v61 }
  0xe9   : > { %vm377_vm15 = vcmp.eq.s32.totalorder %v361_v63, 0  ;;  %vm379_vm0 = vcmp.eq.s32.totalorder %v361_v63, 1  ;;  %vm383_vm1 = vcmp.eq.s32.totalorder %v361_v63, 2  ;;  %vm385_vm2 = vcmp.eq.s32.totalorder %v361_v63, 3 }
  0xea   : > { %v378_v7 = vsel %vm377_vm15, 1, %v3180_v1  ;;  %v380_v0 = vsel %vm379_vm0, 32768, %v3180_v1  ;;  %v384_v2 = vsel %vm383_vm1, 1, %v3180_v1  ;;  %v386_v3 = vsel %vm385_vm2, 32768, %v3180_v1 }
  0xeb   : > { %v381_v4 = vadd.s32 %v380_v0, %v378_v7  ;;  %v387_v5 = vadd.s32 %v386_v3, %v384_v2  ;;  %vm1341_vm15 = vcmp.eq.s32.totalorder %v2433_v42, 10  ;;  %vm1436_vm0 = vcmp.eq.s32.totalorder %v2433_v42, 11 }
  0xec   : > { %vm1531_vm1 = vcmp.eq.s32.totalorder %v2433_v42, 12  ;;  %vm1626_vm2 = vcmp.eq.s32.totalorder %v2433_v42, 13 }
  0xed   : > { %v2453_v8 = vsel %vm376_vm3, %v381_v4, 0  ;;  %v2455_v6 = vsel %vm376_vm3, %v387_v5, 0  ;;  %vm1721_vm3 = vcmp.eq.s32.totalorder %v2433_v42, 14 }
  0xee   : > { %v392_v9 = vsel %vm391_vm4, %v2453_v8, 0  ;;  %v439_v11 = vsel %vm391_vm4, %v2455_v6, 0  ;;  %v487_v12 = vsel %vm486_vm6, %v2453_v8, 0  ;;  %v534_v13 = vsel %vm486_vm6, %v2455_v6, 0 }
  0xef   : > { %v394_v14 = vsel %vm393_vm5, %v392_v9, 0  ;;  %v440_v15 = vsel %vm393_vm5, %v439_v11, 0  ;;  %v488_v16 = vsel %vm393_vm5, %v487_v12, 0  ;;  %v535_v17 = vsel %vm393_vm5, %v534_v13, 0 }
  0xf0   : > { %v395_v18 = vrot.slane %v394_v14, 4  ;;  %v441_v20 = vrot.slane %v440_v15, 4  ;;  %v489_v21 = vrot.slane %v488_v16, 4  ;;  %v536_v22 = vrot.slane %v535_v17, 4 }
  0xf1   : > { %v582_v23 = vsel %vm581_vm7, %v2453_v8, 0  ;;  %v629_v24 = vsel %vm581_vm7, %v2455_v6, 0  ;;  %v677_v25 = vsel %vm676_vm8, %v2453_v8, 0  ;;  %v724_v26 = vsel %vm676_vm8, %v2455_v6, 0 }
  0xf2   : > { %v396_v10 = vadd.s32 %v395_v18, %v394_v14  ;;  %v442_v29 = vadd.s32 %v441_v20, %v440_v15  ;;  %v490_v30 = vadd.s32 %v489_v21, %v488_v16  ;;  %v537_v31 = vadd.s32 %v536_v22, %v535_v17 }
  0xf3   : > { %v583_v32 = vsel %vm393_vm5, %v582_v23, 0  ;;  %v630_v33 = vsel %vm393_vm5, %v629_v24, 0  ;;  %v678_v34 = vsel %vm393_vm5, %v677_v25, 0  ;;  %v725_v35 = vsel %vm393_vm5, %v724_v26, 0 }
  0xf4   : > { %v397_v36 = vrot.slane %v396_v10, 2  ;;  %v443_v37 = vrot.slane %v442_v29, 2  ;;  %v491_v38 = vrot.slane %v490_v30, 2  ;;  %v538_v39 = vrot.slane %v537_v31, 2 }
  0xf5   : > { %v584_v40 = vrot.slane %v583_v32, 4  ;;  %v631_v41 = vrot.slane %v630_v33, 4  ;;  %v679_v43 = vrot.slane %v678_v34, 4  ;;  %v726_v44 = vrot.slane %v725_v35, 4 }
  0xf6   : > { %v398_v45 = vadd.s32 %v397_v36, %v396_v10  ;;  %v444_v46 = vadd.s32 %v443_v37, %v442_v29  ;;  %v492_v47 = vadd.s32 %v491_v38, %v490_v30  ;;  %v539_v48 = vadd.s32 %v538_v39, %v537_v31 }
  0xf7   : > { %v585_v49 = vadd.s32 %v584_v40, %v583_v32  ;;  %v632_v50 = vadd.s32 %v631_v41, %v630_v33  ;;  %v680_v51 = vadd.s32 %v679_v43, %v678_v34  ;;  %v727_v52 = vadd.s32 %v726_v44, %v725_v35 }
  0xf8   : > { %v399_v53 = vrot.slane %v398_v45, 1  ;;  %v445_v54 = vrot.slane %v444_v46, 1  ;;  %v493_v55 = vrot.slane %v492_v47, 1  ;;  %v540_v56 = vrot.slane %v539_v48, 1 }
  0xf9   : > { %v586_v57 = vrot.slane %v585_v49, 2  ;;  %v633_v58 = vrot.slane %v632_v50, 2  ;;  %v681_v59 = vrot.slane %v680_v51, 2  ;;  %v728_v60 = vrot.slane %v727_v52, 2 }
  0xfa   : > { %v2479_v28 = vadd.s32 %v399_v53, %v398_v45  ;;  %v2481_v19 = vadd.s32 %v445_v54, %v444_v46  ;;  %v2483_v61 = vadd.s32 %v493_v55, %v492_v47  ;;  %v2485_v62 = vadd.s32 %v540_v56, %v539_v48 }
  0xfb   : > { %v587_v63 = vadd.s32 %v586_v57, %v585_v49  ;;  %v634_v7 = vadd.s32 %v633_v58, %v632_v50  ;;  %v682_v0 = vadd.s32 %v681_v59, %v680_v51  ;;  %v729_v9 = vadd.s32 %v728_v60, %v727_v52 }
  0xfc   : > { %v401_v2 = vshra.s32 %v2479_v28, 15  ;;  %v447_v3 = vshra.s32 %v2481_v19, 15  ;;  %v495_v4 = vshra.s32 %v2483_v61, 15  ;;  %v3185_v5 = vshra.s32 %v2485_v62, 15 }
  0xfd   : > { %v588_v13 = vrot.slane %v587_v63, 1  ;;  %v635_v14 = vrot.slane %v634_v7, 1  ;;  %v683_v18 = vrot.slane %v682_v0, 1  ;;  %v730_v10 = vrot.slane %v729_v9, 1 }
  0xfe   : > { %v421_v11 = vsel %vm393_vm5, %v401_v2, 0  ;;  %v468_v12 = vsel %vm393_vm5, %v447_v3, 0  ;;  %v516_v17 = vsel %vm393_vm5, %v495_v4, 0  ;;  %v563_v26 = vsel %vm393_vm5, %v3185_v5, 0 }
  0xff   : > { %v423_v15 = vshrl.u32 %v421_v11, 16  ;;  %v422_v16 = vand.u32 65535, %v421_v11  ;;  %v470_v20 = vshrl.u32 %v468_v12, 16  ;;  %v469_v21 = vand.u32 65535, %v468_v12 }
 0x100   : > { %v518_v24 = vshrl.u32 %v516_v17, 16  ;;  %v517_v25 = vand.u32 65535, %v516_v17  ;;  %v2505_v29 = vadd.s32 %v588_v13, %v587_v63  ;;  %v2507_v30 = vadd.s32 %v635_v14, %v634_v7 }
 0x101   : > { %v425_v22 = vcvt.s32.f32 %v423_v15  ;;  %v424_v23 = vcvt.s32.f32 %v422_v16  ;;  %v2509_v31 = vadd.s32 %v683_v18, %v682_v0  ;;  %v772_v32 = vsel %vm771_vm9, %v2453_v8, 0 }
 0x102   : > { %v472_v33 = vcvt.s32.f32 %v470_v20  ;;  %v471_v34 = vcvt.s32.f32 %v469_v21  ;;  %v773_v35 = vsel %vm393_vm5, %v772_v32, 0  ;;  %v819_v36 = vsel %vm771_vm9, %v2455_v6, 0 }
 0x103   : > { %428 = vadd.xlane.f32.xlu1 %v425_v22  ;;  %426 = vadd.xlane.f32.xlu0 %v424_v23  ;;  %v3184_v37 = vshra.s32 %v2505_v29, 15  ;;  %v3183_v38 = vshra.s32 %v2507_v30, 15  ;;  %v774_v39 = vrot.slane %v773_v35, 4  ;;  %v867_v40 = vsel %vm866_vm10, %v2453_v8, 0 }
 0x104   : > { %v520_v41 = vcvt.s32.f32 %v518_v24  ;;  %v565_v43 = vshrl.u32 %v563_v26, 16  ;;  %v564_v44 = vand.u32 65535, %v563_v26  ;;  %v3182_v46 = vshra.s32 %v2509_v31, 15 }
 0x105   : > { %v611_v45 = vsel %vm393_vm5, %v3184_v37, 0  ;;  %v2523_v47 = vadd.s32 %v730_v10, %v729_v9  ;;  %v775_v48 = vadd.s32 %v774_v39, %v773_v35  ;;  %v519_v49 = vcvt.s32.f32 %v517_v25 }
 0x106   : > { %v658_v50 = vsel %vm393_vm5, %v3183_v38, 0  ;;  %v820_v51 = vsel %vm393_vm5, %v819_v36, 0  ;;  %v868_v52 = vsel %vm393_vm5, %v867_v40, 0  ;;  %v613_v53 = vshrl.u32 %v611_v45, 16 }
 0x107   : > { %475 = vadd.xlane.f32.xlu1 %v472_v33  ;;  %473 = vadd.xlane.f32.xlu0 %v471_v34  ;;  %v612_v54 = vand.u32 65535, %v611_v45  ;;  %v776_v55 = vrot.slane %v775_v48, 2  ;;  %v914_v56 = vsel %vm866_vm10, %v2455_v6, 0  ;;  %v567_v57 = vcvt.s32.f32 %v565_v43 }
 0x108   : > { %v566_v58 = vcvt.s32.f32 %v564_v44  ;;  %v660_v59 = vshrl.u32 %v658_v50, 16  ;;  %v659_v60 = vand.u32 65535, %v658_v50  ;;  %v706_v63 = vsel %vm393_vm5, %v3182_v46, 0 }
 0x109   : > { %v3181_v7 = vshra.s32 %v2523_v47, 15  ;;  %v777_v0 = vadd.s32 %v776_v55, %v775_v48  ;;  %v821_v9 = vrot.slane %v820_v51, 4  ;;  %v869_v11 = vrot.slane %v868_v52, 4 }
 0x10a   : > { %v915_v12 = vsel %vm393_vm5, %v914_v56, 0  ;;  %v615_v13 = vcvt.s32.f32 %v613_v53  ;;  %v614_v14 = vcvt.s32.f32 %v612_v54  ;;  %v962_v16 = vsel %vm961_vm11, %v2453_v8, 0 }
 0x10b   : > { %523 = vadd.xlane.f32.xlu1 %v520_v41  ;;  %521 = vadd.xlane.f32.xlu0 %v519_v49  ;;  %v916_v15 = vrot.slane %v915_v12, 4  ;;  %v778_v17 = vrot.slane %v777_v0, 1  ;;  %v822_v18 = vadd.s32 %v821_v9, %v820_v51  ;;  %v870_v20 = vadd.s32 %v869_v11, %v868_v52 }
 0x10c   : > { %v963_v21 = vsel %vm393_vm5, %v962_v16, 0  ;;  %v1009_v24 = vsel %vm961_vm11, %v2455_v6, 0  ;;  %v1057_v25 = vsel %vm1056_vm12, %v2453_v8, 0  ;;  %v708_v44 = vshrl.u32 %v706_v63, 16 }
 0x10d   : > { %v917_v22 = vadd.s32 %v916_v15, %v915_v12  ;;  %v964_v23 = vrot.slane %v963_v21, 4  ;;  %v2550_v26 = vadd.s32 %v778_v17, %v777_v0  ;;  %v823_v10 = vrot.slane %v822_v18, 2 }
 0x10e   : > { %v871_v32 = vrot.slane %v870_v20, 2  ;;  %v1010_v33 = vsel %vm393_vm5, %v1009_v24, 0  ;;  %v1058_v39 = vsel %vm393_vm5, %v1057_v25, 0  ;;  %v707_v50 = vand.u32 65535, %v706_v63 }
 0x10f   : > { %570 = vadd.xlane.f32.xlu1 %v567_v57  ;;  %568 = vadd.xlane.f32.xlu0 %v566_v58  ;;  %v918_v34 = vrot.slane %v917_v22, 2  ;;  %v965_v35 = vadd.s32 %v964_v23, %v963_v21  ;;  %v1011_v36 = vrot.slane %v1010_v33, 4  ;;  %v824_v40 = vadd.s32 %v823_v10, %v822_v18 }
 0x110   : > { %v872_v41 = vadd.s32 %v871_v32, %v870_v20  ;;  %v1059_v43 = vrot.slane %v1058_v39, 4  ;;  %v662_v54 = vcvt.s32.f32 %v660_v59  ;;  %v661_v55 = vcvt.s32.f32 %v659_v60 }
 0x111   : > { %v919_v45 = vadd.s32 %v918_v34, %v917_v22  ;;  %v966_v48 = vrot.slane %v965_v35, 2  ;;  %v1012_v49 = vadd.s32 %v1011_v36, %v1010_v33  ;;  %v825_v51 = vrot.slane %v824_v40, 1 }
 0x112   : > { %v873_v52 = vrot.slane %v872_v41, 1  ;;  %v1060_v53 = vadd.s32 %v1059_v43, %v1058_v39  ;;  %v753_v56 = vsel %vm393_vm5, %v3181_v7, 0  ;;  %v780_v57 = vshra.s32 %v2550_v26, 15 }
 0x113   : > { %618 = vadd.xlane.f32.xlu1 %v615_v13  ;;  %616 = vadd.xlane.f32.xlu0 %v614_v14  ;;  %v2558_v58 = vadd.s32 %v825_v51, %v824_v40  ;;  %v920_v9 = vrot.slane %v919_v45, 1  ;;  %v967_v11 = vadd.s32 %v966_v48, %v965_v35  ;;  %v1013_v63 = vrot.slane %v1012_v49, 2 }
 0x114   : > { %v2560_v0 = vadd.s32 %v873_v52, %v872_v41  ;;  %v1061_v12 = vrot.slane %v1060_v53, 2  ;;  %v710_v13 = vcvt.s32.f32 %v708_v44  ;;  %v709_v14 = vcvt.s32.f32 %v707_v50 }
 0x115   : > { %v827_v59 = vshra.s32 %v2558_v58, 15  ;;  %v755_v60 = vshrl.u32 %v753_v56, 16  ;;  %v754_v15 = vand.u32 65535, %v753_v56  ;;  %v801_v16 = vsel %vm393_vm5, %v780_v57, 0 }
 0x116   : > { %v1104_v17 = vsel %vm1056_vm12, %v2455_v6, 0  ;;  %v875_v18 = vshra.s32 %v2560_v0, 15  ;;  %v2570_v20 = vadd.s32 %v920_v9, %v919_v45  ;;  %v968_v21 = vrot.slane %v967_v11, 1 }
 0x117   : > { %665 = vadd.xlane.f32.xlu1 %v662_v54  ;;  %663 = vadd.xlane.f32.xlu0 %v661_v55  ;;  %v1014_v22 = vadd.s32 %v1013_v63, %v1012_v49  ;;  %v1062_v23 = vadd.s32 %v1061_v12, %v1060_v53  ;;  %v803_v24 = vshrl.u32 %v801_v16, 16  ;;  %v848_v25 = vsel %vm393_vm5, %v827_v59, 0 }
 0x118   : > { %v1105_v10 = vsel %vm393_vm5, %v1104_v17, 0  ;;  %v757_v32 = vcvt.s32.f32 %v755_v60  ;;  %v756_v33 = vcvt.s32.f32 %v754_v15  ;;  %v802_v34 = vand.u32 65535, %v801_v16 }
 0x119   : > { %v1152_v35 = vsel %vm1151_vm13, %v2453_v8, 0  ;;  %v896_v36 = vsel %vm393_vm5, %v875_v18, 0  ;;  %v922_v39 = vshra.s32 %v2570_v20, 15  ;;  %v2584_v40 = vadd.s32 %v968_v21, %v967_v11 }
 0x11a   : > { %v850_v41 = vshrl.u32 %v848_v25, 16  ;;  %v1015_v43 = vrot.slane %v1014_v22, 1  ;;  %v1063_v44 = vrot.slane %v1062_v23, 1  ;;  %v1106_v45 = vrot.slane %v1105_v10, 4 }
 0x11b   : > { %713 = vadd.xlane.f32.xlu1 %v710_v13  ;;  %711 = vadd.xlane.f32.xlu0 %v709_v14  ;;  %v805_v48 = vcvt.s32.f32 %v803_v24  ;;  %v1153_v49 = vsel %vm393_vm5, %v1152_v35, 0  ;;  %v804_v50 = vcvt.s32.f32 %v802_v34  ;;  %v849_v51 = vand.u32 65535, %v848_v25 }
 0x11c   : > { %v898_v52 = vshrl.u32 %v896_v36, 16  ;;  %v897_v53 = vand.u32 65535, %v896_v36  ;;  %v943_v54 = vsel %vm393_vm5, %v922_v39, 0  ;;  %v1107_v55 = vadd.s32 %v1106_v45, %v1105_v10 }
 0x11d   : > { %v1154_v56 = vrot.slane %v1153_v49, 4  ;;  %v1199_v9 = vsel %vm1151_vm13, %v2455_v6, 0  ;;  %v852_v11 = vcvt.s32.f32 %v850_v41  ;;  %v970_v63 = vshra.s32 %v2584_v40, 15 }
 0x11e   : > { %v2597_v12 = vadd.s32 %v1015_v43, %v1014_v22  ;;  %v2599_v13 = vadd.s32 %v1063_v44, %v1062_v23  ;;  %v1108_v14 = vrot.slane %v1107_v55, 2  ;;  %v1200_v15 = vsel %vm393_vm5, %v1199_v9, 0 }
 0x11f   : > { %760 = vadd.xlane.f32.xlu1 %v757_v32  ;;  %758 = vadd.xlane.f32.xlu0 %v756_v33  ;;  %v1155_v60 = vadd.s32 %v1154_v56, %v1153_v49  ;;  %v1247_v16 = vsel %vm1246_vm14, %v2453_v8, 0  ;;  %v851_v17 = vcvt.s32.f32 %v849_v51  ;;  %v900_v21 = vcvt.s32.f32 %v898_v52 }
 0x120   : > { %v1201_v24 = vrot.slane %v1200_v15, 4  ;;  %v1248_v25 = vsel %vm393_vm5, %v1247_v16, 0  ;;  %v1109_v10 = vadd.s32 %v1108_v14, %v1107_v55  ;;  %v1294_v22 = vsel %vm1246_vm14, %v2455_v6, 0 }
 0x121   : > { %v1156_v32 = vrot.slane %v1155_v60, 2  ;;  %v1249_v33 = vrot.slane %v1248_v25, 4  ;;  %v899_v23 = vcvt.s32.f32 %v897_v53  ;;  %v1295_v35 = vsel %vm393_vm5, %v1294_v22, 0 }
 0x122   : > { %v1202_v34 = vadd.s32 %v1201_v24, %v1200_v15  ;;  %v1342_v36 = vsel %vm1341_vm15, %v2453_v8, 0  ;;  %v991_v41 = vsel %vm393_vm5, %v970_v63, 0  ;;  %v1110_v43 = vrot.slane %v1109_v10, 1 }
 0x123   : > { %808 = vadd.xlane.f32.xlu1 %v805_v48  ;;  %806 = vadd.xlane.f32.xlu0 %v804_v50  ;;  %v1157_v44 = vadd.s32 %v1156_v32, %v1155_v60  ;;  %v1250_v45 = vadd.s32 %v1249_v33, %v1248_v25  ;;  %v945_v48 = vshrl.u32 %v943_v54, 16  ;;  %v944_v49 = vand.u32 65535, %v943_v54 }
 0x124   : > { %v1017_v50 = vshra.s32 %v2597_v12, 15  ;;  %v1437_v51 = vsel %vm1436_vm0, %v2453_v8, 0  ;;  %v1203_v52 = vrot.slane %v1202_v34, 2  ;;  %v1296_v53 = vrot.slane %v1295_v35, 4 }
 0x125   : > { %v1343_v55 = vsel %vm393_vm5, %v1342_v36, 0  ;;  %v1389_v56 = vsel %vm1341_vm15, %v2455_v6, 0  ;;  %v993_v9 = vshrl.u32 %v991_v41, 16  ;;  %v1065_v54 = vshra.s32 %v2599_v13, 15 }
 0x126   : > { %v2625_v14 = vadd.s32 %v1110_v43, %v1109_v10  ;;  %v1158_v60 = vrot.slane %v1157_v44, 1  ;;  %v1251_v15 = vrot.slane %v1250_v45, 2  ;;  %v1438_v16 = vsel %vm393_vm5, %v1437_v51, 0 }
 0x127   : > { %855 = vadd.xlane.f32.xlu1 %v852_v11  ;;  %853 = vadd.xlane.f32.xlu0 %v851_v17  ;;  %v992_v11 = vand.u32 65535, %v991_v41  ;;  %v947_v17 = vcvt.s32.f32 %v945_v48  ;;  %v946_v24 = vcvt.s32.f32 %v944_v49  ;;  %v1344_v25 = vrot.slane %v1343_v55, 4 }
 0x128   : > { %v1390_v32 = vsel %vm393_vm5, %v1389_v56, 0  ;;  %v1204_v33 = vadd.s32 %v1203_v52, %v1202_v34  ;;  %v1297_v22 = vadd.s32 %v1296_v53, %v1295_v35  ;;  %v1086_v10 = vsel %vm393_vm5, %v1065_v54, 0 }
 0x129   : > { %v1439_v36 = vrot.slane %v1438_v16, 4  ;;  %v1112_v41 = vshra.s32 %v2625_v14, 15  ;;  %v2636_v43 = vadd.s32 %v1158_v60, %v1157_v44  ;;  %v1252_v48 = vadd.s32 %v1251_v15, %v1250_v45 }
 0x12a   : > { %v1391_v49 = vrot.slane %v1390_v32, 4  ;;  %v994_v51 = vcvt.s32.f32 %v992_v11  ;;  %v1345_v7 = vadd.s32 %v1344_v25, %v1343_v55  ;;  %v1205_v34 = vrot.slane %v1204_v33, 1 }
 0x12b   : > { %903 = vadd.xlane.f32.xlu1 %v900_v21  ;;  %901 = vadd.xlane.f32.xlu0 %v899_v23  ;;  %v1038_v21 = vsel %vm393_vm5, %v1017_v50, 0  ;;  %v995_v23 = vcvt.s32.f32 %v993_v9  ;;  %v1298_v35 = vrot.slane %v1297_v22, 2  ;;  %v1088_v52 = vshrl.u32 %v1086_v10, 16 }
 0x12c   : > { %v1040_v56 = vshrl.u32 %v1038_v21, 16  ;;  %v1039_v1 = vand.u32 65535, %v1038_v21  ;;  %v1087_v53 = vand.u32 65535, %v1086_v10  ;;  %v1440_v9 = vadd.s32 %v1439_v36, %v1438_v16 }
 0x12d   : > { %v1160_v44 = vshra.s32 %v2636_v43, 15  ;;  %v1253_v60 = vrot.slane %v1252_v48, 1  ;;  %v1392_v45 = vadd.s32 %v1391_v49, %v1390_v32  ;;  %v2642_v21 = vadd.s32 %v1205_v34, %v1204_v33 }
 0x12e   : > { %v1042_v15 = vcvt.s32.f32 %v1040_v56  ;;  %v1041_v11 = vcvt.s32.f32 %v1039_v1  ;;  %v1299_v55 = vadd.s32 %v1298_v35, %v1297_v22  ;;  %v1090_v25 = vcvt.s32.f32 %v1088_v52 }
 0x12f   : > { %950 = vadd.xlane.f32.xlu1 %v947_v17  ;;  %948 = vadd.xlane.f32.xlu0 %v946_v24  ;;  %v1133_v17 = vsel %vm393_vm5, %v1112_v41, 0  ;;  %v1346_v24 = vrot.slane %v1345_v7, 2  ;;  %v1441_v16 = vrot.slane %v1440_v9, 2  ;;  %v2647_v46 = vadd.s32 %v1253_v60, %v1252_v48 }
 0x130   : > { %v1135_v10 = vshrl.u32 %v1133_v17, 16  ;;  %v1134_v36 = vand.u32 65535, %v1133_v17  ;;  %v1393_v32 = vrot.slane %v1392_v45, 2  ;;  %v1484_v1 = vsel %vm1436_vm0, %v2455_v6, 0 }
 0x131   : > { %v1347_v49 = vadd.s32 %v1346_v24, %v1345_v7  ;;  %v2654_v33 = vmul.u32 32768, %v401_v2  ;;  %v2658_v22 = vmul.u32 32768, %v447_v3  ;;  %v1207_v56 = vshra.s32 %v2642_v21, 15 }
 0x132   : > { %v1300_v34 = vrot.slane %v1299_v55, 1  ;;  %v1442_v7 = vadd.s32 %v1441_v16, %v1440_v9  ;;  %v1485_v52 = vsel %vm393_vm5, %v1484_v1, 0  ;;  %v1137_v60 = vcvt.s32.f32 %v1135_v10 }
 0x133   : > { %998 = vadd.xlane.f32.xlu1 %v995_v23  ;;  %996 = vadd.xlane.f32.xlu0 %v994_v51  ;;  %v1089_v23 = vcvt.s32.f32 %v1087_v53  ;;  %v1181_v51 = vsel %vm393_vm5, %v1160_v44, 0  ;;  %v3186_v53 = vshra.s32 %v2647_v46, 15  ;;  %v1486_v17 = vrot.slane %v1485_v52, 4 }
 0x134   : > { %v1183_v48 = vshrl.u32 %v1181_v51, 16  ;;  %v1182_v35 = vand.u32 65535, %v1181_v51  ;;  %v403_v2 = vsub.s32 %v2479_v28, %v2654_v33  ;;  %v449_v3 = vsub.s32 %v2481_v19, %v2658_v22 }
 0x135   : > { %v1394_v24 = vadd.s32 %v1393_v32, %v1392_v45  ;;  %v2670_v9 = vadd.s32 %v1300_v34, %v1299_v55  ;;  %v1443_v16 = vrot.slane %v1442_v7, 1  ;;  %v1276_v38 = vsel %vm393_vm5, %v3186_v53, 0 }
 0x136   : > { %v1185_v51 = vcvt.s32.f32 %v1183_v48  ;;  %v1184_v1 = vcvt.s32.f32 %v1182_v35  ;;  %v1277_v48 = vand.u32 65535, %v1276_v38  ;;  %v450_v28 = vsel %vm393_vm5, %v449_v3, 0 }
 0x137   : > { %1045 = vadd.xlane.f32.xlu1 %v1042_v15  ;;  %1043 = vadd.xlane.f32.xlu0 %v1041_v11  ;;  %v1136_v15 = vcvt.s32.f32 %v1134_v36  ;;  %v1348_v11 = vrot.slane %v1347_v49, 1  ;;  %v1395_v32 = vrot.slane %v1394_v24, 1  ;;  %v1302_v5 = vshra.s32 %v2670_v9, 15 }
 0x138   : > { %v2678_v34 = vadd.s32 %v1443_v16, %v1442_v7  ;;  %v2757_v33 = vmul.u32 32768, %v1112_v41  ;;  %v2769_v19 = vmul.u32 32768, %v1207_v56  ;;  %v3189_v22 = vshra.s32 %v2647_v46, 15 }
 0x139   : > { %v2675_v45 = vadd.s32 %v1348_v11, %v1347_v49  ;;  %v2681_v53 = vadd.s32 %v1395_v32, %v1394_v24  ;;  %v1323_v49 = vsel %vm393_vm5, %v1302_v5, 0  ;;  %vm1816_vm4 = vcmp.eq.s32.totalorder %v2433_v42, 15 }
 0x13a   : > { %v1445_v7 = vshra.s32 %v2678_v34, 15  ;;  %v1325_v16 = vshrl.u32 %v1323_v49, 16  ;;  %v2773_v41 = vmul.u32 32768, %v3189_v22  ;;  %v1114_v3 = vsub.s32 %v2625_v14, %v2757_v33 }
 0x13b   : > { %1093 = vadd.xlane.f32.xlu1 %v1090_v25  ;;  %1091 = vadd.xlane.f32.xlu0 %v1089_v23  ;;  %v1228_v25 = vsel %vm393_vm5, %v1207_v56, 0  ;;  %v1487_v23 = vadd.s32 %v1486_v17, %v1485_v52  ;;  %v1278_v52 = vshrl.u32 %v1276_v38, 16  ;;  %v1579_v14 = vsel %vm1531_vm1, %v2455_v6, 0 }
 0x13c   : > { %v1230_v36 = vshrl.u32 %v1228_v25, 16  ;;  %v1229_v37 = vand.u32 65535, %v1228_v25  ;;  %vm435_vm6 = vcmp.eq.s32.totalorder %v2439_v27, 1  ;;  %vm464_vm7 = vcmp.eq.s32.totalorder %v2439_v27, 2 }
 0x13d   : > { %v1488_v10 = vrot.slane %v1487_v23, 2  ;;  %v1280_v25 = vcvt.s32.f32 %v1278_v52  ;;  %vm482_vm8 = vcmp.eq.s32.totalorder %v2439_v27, 3  ;;  %vm512_vm9 = vcmp.eq.s32.totalorder %v2439_v27, 4 }
 0x13e   : > { %v1232_v17 = vcvt.s32.f32 %v1230_v36  ;;  %vm530_vm10 = vcmp.eq.s32.totalorder %v2439_v27, 5  ;;  %vm559_vm11 = vcmp.eq.s32.totalorder %v2439_v27, 6  ;;  %vm577_vm12 = vcmp.eq.s32.totalorder %v2439_v27, 7 }
 0x13f   : > { %1140 = vadd.xlane.f32.xlu1 %v1137_v60  ;;  %1138 = vadd.xlane.f32.xlu0 %v1136_v15  ;;  %v1489_v55 = vadd.s32 %v1488_v10, %v1487_v23  ;;  %v1231_v60 = vcvt.s32.f32 %v1229_v37  ;;  %v1350_v15 = vshra.s32 %v2675_v45, 15  ;;  %v1279_v23 = vcvt.s32.f32 %v1277_v48 }
 0x140   : > { %v1324_v37 = vand.u32 65535, %v1323_v49  ;;  %vm607_vm13 = vcmp.eq.s32.totalorder %v2439_v27, 8  ;;  %vm625_vm14 = vcmp.eq.s32.totalorder %v2439_v27, 9  ;;  %vm654_vm15 = vcmp.eq.s32.totalorder %v2439_v27, 10 }
 0x141   : > { %v1490_v35 = vrot.slane %v1489_v55, 1  ;;  %v1371_v24 = vsel %vm393_vm5, %v1350_v15, 0  ;;  %vm672_vm0 = vcmp.eq.s32.totalorder %v2439_v27, 11 }
 0x142   : > { %v1373_v36 = vshrl.u32 %v1371_v24, 16  ;;  %v1372_v32 = vand.u32 65535, %v1371_v24  ;;  %v1326_v52 = vcvt.s32.f32 %v1324_v37 }
 0x143   : > { %1188 = vadd.xlane.f32.xlu1 %v1185_v51  ;;  %1186 = vadd.xlane.f32.xlu0 %v1184_v1  ;;  %v2686_v11 = vadd.s32 %v1490_v35, %v1489_v55  ;;  %v1397_v51 = vshra.s32 %v2681_v53, 15  ;;  %v2694_v1 = vmul.u32 32768, %v1445_v7  ;;  %v1327_v55 = vcvt.s32.f32 %v1325_v16 }
 0x144   : > { %v2703_v35 = vmul.u32 32768, %v780_v57  ;;  %v1374_v16 = vcvt.s32.f32 %v1372_v32 }
 0x145   : > { %v1492_v38 = vshra.s32 %v2686_v11, 15  ;;  %v1418_v48 = vsel %vm393_vm5, %v1397_v51, 0 }
 0x146   : > { %v1420_v57 = vshrl.u32 %v1418_v48, 16  ;;  %v782_v37 = vsub.s32 %v2550_v26, %v2703_v35  ;;  %v1419_v24 = vand.u32 65535, %v1418_v48 }
 0x147   : > { %1235 = vadd.xlane.f32.xlu1 %v1232_v17  ;;  %1233 = vadd.xlane.f32.xlu0 %v1231_v60  ;;  %v2696_v10 = vmul.u32 32768, %v1492_v38  ;;  %v2707_v17 = vmul.u32 32768, %v827_v59  ;;  %v1466_v59 = vsel %vm393_vm5, %v1445_v7, 0 }
 0x148   : > { %v2711_v60 = vmul.u32 32768, %v875_v18  ;;  %v1468_v32 = vshrl.u32 %v1466_v59, 16  ;;  %v1467_v48 = vand.u32 65535, %v1466_v59  ;;  %v1422_v49 = vcvt.s32.f32 %v1420_v57 }
 0x149   : > { %v1421_v18 = vcvt.s32.f32 %v1419_v24  ;;  %v2745_v57 = vmul.u32 32768, %v1017_v50 }
 0x14a   : > { %v3196_v26 = vsub.s32 %v2560_v0, %v2711_v60 }
 0x14b   : > { %1283 = vadd.xlane.f32.xlu1 %v1280_v25  ;;  %1281 = vadd.xlane.f32.xlu0 %v1279_v23  ;;  %v1375_v23 = vcvt.s32.f32 %v1373_v36  ;;  %v2730_v36 = vmul.u32 32768, %v970_v63  ;;  %v1470_v63 = vcvt.s32.f32 %v1468_v32  ;;  %v1019_v50 = vsub.s32 %v2597_v12, %v2745_v57 }
 0x14c   : > { %v878_v35 = vsel %vm393_vm5, %v3196_v26, 0  ;;  %v1532_v12 = vsel %vm1531_vm1, %v2453_v8, 0  ;;  %vm702_vm1 = vcmp.eq.s32.totalorder %v2439_v27, 12 }
 0x14d   : > { %v972_v25 = vsub.s32 %v2584_v40, %v2730_v36  ;;  %v1020_v40 = vsel %vm393_vm5, %v1019_v50, 0 }
 0x14e   : > { %v1021_v50 = vand.u32 65535, %v1020_v40 }
 0x14f   : > { %1330 = vadd.xlane.f32.xlu1 %v1327_v55  ;;  %1328 = vadd.xlane.f32.xlu0 %v1326_v52  ;;  %v2726_v52 = vmul.u32 32768, %v922_v39  ;;  %v1513_v55 = vsel %vm393_vm5, %v1492_v38, 0  ;;  %v404_v39 = vsel %vm393_vm5, %v403_v2, 0  ;;  %v2749_v38 = vmul.u32 32768, %v1065_v54 }
 0x150   : > { %v1515_v59 = vshrl.u32 %v1513_v55, 16  ;;  %v1514_v7 = vand.u32 65535, %v1513_v55  ;;  %v405_v2 = vand.u32 65535, %v404_v39  ;;  %v973_v0 = vsel %vm393_vm5, %v972_v25, 0 }
 0x151   : > { %v1067_v54 = vsub.s32 %v2599_v13, %v2749_v38 }
 0x152   : > { %v1517_v55 = vcvt.s32.f32 %v1515_v59  ;;  %v2793_v59 = vmul.u32 32768, %v1350_v15  ;;  %v2804_v15 = vmul.u32 32768, %v1397_v51 }
 0x153   : > { %1378 = vadd.xlane.f32.xlu1 %v1375_v23  ;;  %1376 = vadd.xlane.f32.xlu0 %v1374_v16  ;;  %v1469_v23 = vcvt.s32.f32 %v1467_v48  ;;  %v496_v16 = vmul.u32 32768, %v495_v4  ;;  %v2761_v4 = vmul.u32 32768, %v1160_v44  ;;  %v3190_v48 = vshra.s32 %v2485_v62, 15 }
 0x155   : > { %v497_v44 = vsub.s32 %v2483_v61, %v496_v16  ;;  %v1162_v24 = vsub.s32 %v2636_v43, %v2761_v4  ;;  %v407_v16 = vcvt.s32.f32 %v405_v2 }
 0x157   : > { %1425 = vadd.xlane.f32.xlu1 %v1422_v49  ;;  %1423 = vadd.xlane.f32.xlu0 %v1421_v18  ;;  %v406_v49 = vshrl.u32 %v404_v39, 16  ;;  %v1516_v18 = vcvt.s32.f32 %v1514_v7  ;;  %v451_v39 = vand.u32 65535, %v450_v28  ;;  %v498_v22 = vsel %vm393_vm5, %v497_v44, 0 }
 0x158   : > { %v2789_v7 = vmul.u32 32768, %v1302_v5  ;;  %v499_v2 = vand.u32 65535, %v498_v22 }
 0x159   : > { %v408_v61 = vcvt.s32.f32 %v406_v49  ;;  %v453_v49 = vcvt.s32.f32 %v451_v39 }
 0x15b   : > { %1473 = vadd.xlane.f32.xlu1 %v1470_v63  ;;  %1471 = vadd.xlane.f32.xlu0 %v1469_v23  ;;  %v543_v63 = vmul.u32 32768, %v3190_v48  ;;  %v452_v23 = vshrl.u32 %v450_v28, 16  ;;  %v3191_v48 = vshra.s32 %v2505_v29, 15 }
 0x15d   : > { %v544_v56 = vsub.s32 %v2485_v62, %v543_v63  ;;  %v454_v28 = vcvt.s32.f32 %v452_v23 }
 0x15f   : > { %1520 = vadd.xlane.f32.xlu1 %v1517_v55  ;;  %1518 = vadd.xlane.f32.xlu0 %v1516_v18  ;;  %v591_v55 = vmul.u32 32768, %v3191_v48  ;;  %v500_v18 = vshrl.u32 %v498_v22, 16  ;;  %v545_v62 = vsel %vm393_vm5, %v544_v56, 0  ;;  %v3193_v56 = vshra.s32 %v2509_v31, 15 }
 0x160   : > { %v546_v48 = vand.u32 65535, %v545_v62  ;;  %v547_v5 = vshrl.u32 %v545_v62, 16 }
 0x161   : > { %v592_v63 = vsub.s32 %v2505_v29, %v591_v55  ;;  %v502_v22 = vcvt.s32.f32 %v500_v18  ;;  %v686_v32 = vmul.u32 32768, %v3193_v56  ;;  %v3194_v18 = vshra.s32 %v2523_v47, 15 }
 0x162   : > { %v548_v29 = vcvt.s32.f32 %v546_v48  ;;  %v549_v55 = vcvt.s32.f32 %v547_v5 }
 0x163   : > { %411 = vadd.xlane.f32.xlu0 %v408_v61  ;;  %409 = vadd.xlane.f32.xlu1 %v407_v16  ;;  %v3192_v61 = vshra.s32 %v2507_v30, 15  ;;  %v501_v16 = vcvt.s32.f32 %v499_v2  ;;  %v593_v44 = vsel %vm393_vm5, %v592_v63, 0  ;;  %v687_v2 = vsub.s32 %v2509_v31, %v686_v32 }
 0x164   : > { %v733_v62 = vmul.u32 32768, %v3194_v18 }
 0x165   : > { %v638_v39 = vmul.u32 32768, %v3192_v61 }
 0x167   : > { %455 = vadd.xlane.f32.xlu0 %v453_v49  ;;  %457 = vadd.xlane.f32.xlu1 %v454_v28  ;;  %v639_v51 = vsub.s32 %v2507_v30, %v638_v39  ;;  %v594_v49 = vand.u32 65535, %v593_v44  ;;  %v595_v28 = vshrl.u32 %v593_v44, 16 }
 0x169   : > { %v640_v61 = vsel %vm393_vm5, %v639_v51, 0  ;;  %v596_v63 = vcvt.s32.f32 %v594_v49  ;;  %v597_v30 = vcvt.s32.f32 %v595_v28  ;;  %v783_v49 = vsel %vm393_vm5, %v782_v37, 0 }
 0x16a   : > { %v641_v39 = vand.u32 65535, %v640_v61  ;;  %v642_v23 = vshrl.u32 %v640_v61, 16  ;;  %v785_v61 = vshrl.u32 %v783_v49, 16 }
 0x16b   : > { %503 = vadd.xlane.f32.xlu0 %v501_v16  ;;  %505 = vadd.xlane.f32.xlu1 %v502_v22  ;;  %v688_v16 = vsel %vm393_vm5, %v687_v2, 0  ;;  %v734_v22 = vsub.s32 %v2523_v47, %v733_v62  ;;  %v3195_v2 = vsub.s32 %v2558_v58, %v2707_v17  ;;  %v3197_v58 = vsub.s32 %v2570_v20, %v2726_v52 }
 0x16c   : > { %v643_v44 = vcvt.s32.f32 %v641_v39  ;;  %v644_v5 = vcvt.s32.f32 %v642_v23  ;;  %v689_v48 = vand.u32 65535, %v688_v16  ;;  %v690_v51 = vshrl.u32 %v688_v16, 16 }
 0x16d   : > { %v735_v31 = vsel %vm393_vm5, %v734_v22, 0  ;;  %v784_v23 = vand.u32 65535, %v783_v49  ;;  %v830_v18 = vsel %vm393_vm5, %v3195_v2, 0  ;;  %v879_v22 = vand.u32 65535, %v878_v35 }
 0x16e   : > { %v691_v32 = vcvt.s32.f32 %v689_v48  ;;  %v692_v56 = vcvt.s32.f32 %v690_v51  ;;  %v832_v39 = vshrl.u32 %v830_v18, 16  ;;  %v925_v17 = vsel %vm393_vm5, %v3197_v58, 0 }
 0x16f   : > { %550 = vadd.xlane.f32.xlu0 %v548_v29  ;;  %552 = vadd.xlane.f32.xlu1 %v549_v55  ;;  %v736_v29 = vand.u32 65535, %v735_v31  ;;  %v737_v55 = vshrl.u32 %v735_v31, 16  ;;  %v786_v62 = vcvt.s32.f32 %v784_v23  ;;  %v881_v60 = vcvt.s32.f32 %v879_v22 }
 0x170   : > { %v834_v16 = vcvt.s32.f32 %v832_v39  ;;  %v926_v48 = vand.u32 65535, %v925_v17  ;;  %v927_v51 = vshrl.u32 %v925_v17, 16  ;;  %v1022_v2 = vshrl.u32 %v1020_v40, 16 }
 0x171   : > { %v738_v47 = vcvt.s32.f32 %v736_v29  ;;  %v739_v28 = vcvt.s32.f32 %v737_v55  ;;  %v975_v29 = vshrl.u32 %v973_v0, 16  ;;  %v3198_v40 = vsub.s32 %v2642_v21, %v2769_v19 }
 0x172   : > { %v928_v52 = vcvt.s32.f32 %v926_v48  ;;  %v929_v55 = vcvt.s32.f32 %v927_v51  ;;  %v1163_v51 = vsel %vm393_vm5, %v1162_v24, 0  ;;  %v3199_v21 = vsub.s32 %v2647_v46, %v2773_v41 }
 0x173   : > { %598 = vadd.xlane.f32.xlu0 %v596_v63  ;;  %600 = vadd.xlane.f32.xlu1 %v597_v30  ;;  %v787_v63 = vcvt.s32.f32 %v785_v61  ;;  %v831_v30 = vand.u32 65535, %v830_v18  ;;  %v977_v23 = vcvt.s32.f32 %v975_v29  ;;  %v1068_v61 = vsel %vm393_vm5, %v1067_v54, 0 }
 0x174   : > { %v1069_v13 = vand.u32 65535, %v1068_v61  ;;  %v1070_v38 = vshrl.u32 %v1068_v61, 16  ;;  %v1164_v4 = vand.u32 65535, %v1163_v51  ;;  %v1165_v24 = vshrl.u32 %v1163_v51, 16 }
 0x175   : > { %v833_v37 = vcvt.s32.f32 %v831_v30  ;;  %v1258_v19 = vsel %vm393_vm5, %v3199_v21, 0 }
 0x176   : > { %v1072_v48 = vcvt.s32.f32 %v1070_v38 }
 0x177   : > { %645 = vadd.xlane.f32.xlu0 %v643_v44  ;;  %647 = vadd.xlane.f32.xlu1 %v644_v5  ;;  %v880_v44 = vshrl.u32 %v878_v35, 16  ;;  %v1023_v35 = vcvt.s32.f32 %v1021_v50 }
 0x179   : > { %v882_v5 = vcvt.s32.f32 %v880_v44 }
 0x17b   : > { %693 = vadd.xlane.f32.xlu0 %v691_v32  ;;  %695 = vadd.xlane.f32.xlu1 %v692_v56  ;;  %v974_v56 = vand.u32 65535, %v973_v0 }
 0x17f   : > { %740 = vadd.xlane.f32.xlu0 %v738_v47  ;;  %742 = vadd.xlane.f32.xlu1 %v739_v28  ;;  %v976_v28 = vcvt.s32.f32 %v974_v56 }
 0x183   : > { %788 = vadd.xlane.f32.xlu0 %v786_v62  ;;  %790 = vadd.xlane.f32.xlu1 %v787_v63  ;;  %v1533_v63 = vsel %vm393_vm5, %v1532_v12, 0 }
 0x184   : > { %v1534_v22 = vrot.slane %v1533_v63, 4 }
 0x186   : > { %v1535_v56 = vadd.s32 %v1534_v22, %v1533_v63 }
 0x187   : > { %835 = vadd.xlane.f32.xlu0 %v833_v37  ;;  %837 = vadd.xlane.f32.xlu1 %v834_v16  ;;  %v1024_v37 = vcvt.s32.f32 %v1022_v2  ;;  %v1115_v16 = vsel %vm393_vm5, %v1114_v3, 0 }
 0x188   : > { %v1116_v3 = vand.u32 65535, %v1115_v16 }
 0x18b   : > { %883 = vadd.xlane.f32.xlu0 %v881_v60  ;;  %885 = vadd.xlane.f32.xlu1 %v882_v5  ;;  %v1071_v5 = vcvt.s32.f32 %v1069_v13  ;;  %v1167_v13 = vcvt.s32.f32 %v1165_v24 }
 0x18c   : > { %v429_v31 = vpop.xlane.xlu1 %428  ;;  %v427_v32 = vpop.xlane.xlu0 %426 }
 0x18d   : > { %v431_v20 = vcvt.f32.s32 %v429_v31  ;;  %v430_v25 = vcvt.f32.s32 %v427_v32  ;;  %v1117_v31 = vshrl.u32 %v1115_v16, 16 }
 0x18f   : > { %v432_v36 = vshll.u32 %v431_v20, 16  ;;  %930 = vadd.xlane.f32.xlu0 %v928_v52  ;;  %932 = vadd.xlane.f32.xlu1 %v929_v55  ;;  %v1580_v52 = vsel %vm393_vm5, %v1579_v14, 0 }
 0x190   : > { %v476_v49 = vpop.xlane.xlu1 %475  ;;  %v474_v47 = vpop.xlane.xlu0 %473  ;;  %v1581_v61 = vrot.slane %v1580_v52, 4 }
 0x191   : > { %v478_v57 = vcvt.f32.s32 %v476_v49  ;;  %v2855_v18 = vadd.s32 %v432_v36, %v430_v25  ;;  %v477_v30 = vcvt.f32.s32 %v474_v47  ;;  %v1210_v36 = vsel %vm393_vm5, %v3198_v40, 0 }
 0x192   : > { %v1118_v49 = vcvt.s32.f32 %v1116_v3  ;;  %v1119_v47 = vcvt.s32.f32 %v1117_v31  ;;  %v1212_v63 = vshrl.u32 %v1210_v36, 16  ;;  %v3201_v40 = vsub.s32 %v2675_v45, %v2793_v59 }
 0x193   : > { %v479_v62 = vshll.u32 %v478_v57, 16  ;;  %978 = vadd.xlane.f32.xlu0 %v976_v28  ;;  %980 = vadd.xlane.f32.xlu1 %v977_v23  ;;  %v1536_v23 = vrot.slane %v1535_v56, 2 }
 0x194   : > { %v524_v39 = vpop.xlane.xlu1 %523  ;;  %v522_v26 = vpop.xlane.xlu0 %521 }
 0x195   : > { %v526_v54 = vcvt.f32.s32 %v524_v39  ;;  %v2862_v44 = vadd.s32 %v479_v62, %v477_v30  ;;  %v525_v17 = vcvt.f32.s32 %v522_v26  ;;  %v1211_v62 = vand.u32 65535, %v1210_v36 }
 0x196   : > { %v1627_v30 = vsel %vm1626_vm2, %v2453_v8, 0  ;;  %v1166_v26 = vcvt.s32.f32 %v1164_v4  ;;  %v1353_v36 = vsel %vm393_vm5, %v3201_v40, 0 }
 0x197   : > { %v527_v58 = vshll.u32 %v526_v54, 16  ;;  %1025 = vadd.xlane.f32.xlu0 %v1023_v35  ;;  %1027 = vadd.xlane.f32.xlu1 %v1024_v37  ;;  %v1537_v54 = vadd.s32 %v1536_v23, %v1535_v56  ;;  %v1582_v35 = vadd.s32 %v1581_v61, %v1580_v52  ;;  %v1628_v22 = vsel %vm393_vm5, %v1627_v30, 0 }
 0x198   : > { %v571_v0 = vpop.xlane.xlu1 %570  ;;  %v569_v60 = vpop.xlane.xlu0 %568  ;;  %v1629_v31 = vrot.slane %v1628_v22, 4  ;;  %v1354_v45 = vand.u32 65535, %v1353_v36  ;;  %v1355_v59 = vshrl.u32 %v1353_v36, 16  ;;  %v1769_v36 = vsel %vm1721_vm3, %v2455_v6, 0 }
 0x199   : > { %v573_v33 = vcvt.f32.s32 %v571_v0  ;;  %v2871_v32 = vadd.s32 %v527_v58, %v525_v17  ;;  %v572_v20 = vcvt.f32.s32 %v569_v60  ;;  %v1213_v58 = vcvt.s32.f32 %v1211_v62 }
 0x19a   : > { %v1259_v17 = vand.u32 65535, %v1258_v19  ;;  %v1260_v0 = vshrl.u32 %v1258_v19, 16  ;;  %v1583_v3 = vrot.slane %v1582_v35, 2  ;;  %v1630_v23 = vadd.s32 %v1629_v31, %v1628_v22 }
 0x19b   : > { %v574_v29 = vshll.u32 %v573_v33, 16  ;;  %1073 = vadd.xlane.f32.xlu0 %v1071_v5  ;;  %1075 = vadd.xlane.f32.xlu1 %v1072_v48  ;;  %v1214_v5 = vcvt.s32.f32 %v1212_v63  ;;  %v3200_v48 = vsub.s32 %v2670_v9, %v2789_v7  ;;  %v1538_v33 = vrot.slane %v1537_v54, 1 }
 0x19c   : > { %v619_v55 = vpop.xlane.xlu1 %618  ;;  %v617_v43 = vpop.xlane.xlu0 %616  ;;  %v1674_v9 = vsel %vm1626_vm2, %v2455_v6, 0  ;;  %v3202_v63 = vsub.s32 %v2681_v53, %v2804_v15  ;;  %vm720_vm2 = vcmp.eq.s32.totalorder %v2439_v27, 13 }
 0x19d   : > { %v621_v25 = vcvt.f32.s32 %v619_v55  ;;  %v2878_v28 = vadd.s32 %v574_v29, %v572_v20  ;;  %v620_v57 = vcvt.f32.s32 %v617_v43  ;;  %v1305_v51 = vsel %vm393_vm5, %v3200_v48, 0 }
 0x19e   : > { %v1261_v55 = vcvt.s32.f32 %v1259_v17  ;;  %v1262_v43 = vcvt.s32.f32 %v1260_v0  ;;  %v1306_v4 = vand.u32 65535, %v1305_v51  ;;  %v1307_v24 = vshrl.u32 %v1305_v51, 16 }
 0x19f   : > { %v622_v12 = vshll.u32 %v621_v25, 16  ;;  %1120 = vadd.xlane.f32.xlu0 %v1118_v49  ;;  %1122 = vadd.xlane.f32.xlu1 %v1119_v47  ;;  %v2906_v49 = vadd.s32 %v1538_v33, %v1537_v54  ;;  %v1584_v47 = vadd.s32 %v1583_v3, %v1582_v35  ;;  %v1400_v21 = vsel %vm393_vm5, %v3202_v63, 0 }
 0x1a0   : > { %v666_v50 = vpop.xlane.xlu1 %665  ;;  %v664_v2 = vpop.xlane.xlu0 %663  ;;  %v1308_v62 = vcvt.s32.f32 %v1306_v4  ;;  %v1309_v30 = vcvt.s32.f32 %v1307_v24  ;;  %v1631_v35 = vrot.slane %v1630_v23, 2  ;;  %v3203_v17 = vsub.s32 %v2678_v34, %v2694_v1 }
 0x1a1   : > { %v668_v39 = vcvt.f32.s32 %v666_v50  ;;  %v2888_v38 = vadd.s32 %v622_v12, %v620_v57  ;;  %v667_v16 = vcvt.f32.s32 %v664_v2  ;;  %v1675_v57 = vsel %vm393_vm5, %v1674_v9, 0 }
 0x1a2   : > { %v1585_v54 = vrot.slane %v1584_v47, 1  ;;  %v1448_v0 = vsel %vm393_vm5, %v3203_v17, 0  ;;  %v1632_v31 = vadd.s32 %v1631_v35, %v1630_v23  ;;  %v3204_v9 = vsub.s32 %v2686_v11, %v2696_v10 }
 0x1a3   : > { %v669_v37 = vshll.u32 %v668_v39, 16  ;;  %1168 = vadd.xlane.f32.xlu0 %v1166_v26  ;;  %1170 = vadd.xlane.f32.xlu1 %v1167_v13  ;;  %v1722_v39 = vsel %vm1721_vm3, %v2453_v8, 0  ;;  %v1540_v13 = vshra.s32 %v2906_v49, 15  ;;  %v1449_v34 = vand.u32 65535, %v1448_v0 }
 0x1a4   : > { %v714_v46 = vpop.xlane.xlu1 %713  ;;  %v712_v41 = vpop.xlane.xlu0 %711  ;;  %v1723_v48 = vsel %vm393_vm5, %v1722_v39, 0  ;;  %v2929_v3 = vadd.s32 %v1585_v54, %v1584_v47  ;;  %v1450_v4 = vshrl.u32 %v1448_v0, 16  ;;  %vm749_vm3 = vcmp.eq.s32.totalorder %v2439_v27, 14 }
 0x1a5   : > { %v716_v60 = vcvt.f32.s32 %v714_v46  ;;  %v2895_v14 = vadd.s32 %v669_v37, %v667_v16  ;;  %v715_v29 = vcvt.f32.s32 %v712_v41  ;;  %v1676_v37 = vrot.slane %v1675_v57, 4 }
 0x1a6   : > { %v1356_v46 = vcvt.s32.f32 %v1354_v45  ;;  %v1401_v41 = vand.u32 65535, %v1400_v21  ;;  %v1541_v33 = vmul.u32 32768, %v1540_v13  ;;  %v1724_v40 = vrot.slane %v1723_v48, 4 }
 0x1a7   : > { %v717_v56 = vshll.u32 %v716_v60, 16  ;;  %1215 = vadd.xlane.f32.xlu0 %v1213_v58  ;;  %1217 = vadd.xlane.f32.xlu1 %v1214_v5  ;;  %v1402_v58 = vshrl.u32 %v1400_v21, 16  ;;  %v1357_v5 = vcvt.s32.f32 %v1355_v59  ;;  %v1451_v45 = vcvt.s32.f32 %v1449_v34 }
 0x1a8   : > { %v761_v20 = vpop.xlane.xlu1 %760  ;;  %v759_v52 = vpop.xlane.xlu0 %758  ;;  %v1542_v23 = vsub.s32 %v2906_v49, %v1541_v33  ;;  %v1452_v59 = vcvt.s32.f32 %v1450_v4  ;;  %v1561_v17 = vsel %vm393_vm5, %v1540_v13, 0 }
 0x1a9   : > { %v763_v7 = vcvt.f32.s32 %v761_v20  ;;  %v2904_v25 = vadd.s32 %v717_v56, %v715_v29  ;;  %v762_v12 = vcvt.f32.s32 %v759_v52  ;;  %v1677_v56 = vadd.s32 %v1676_v37, %v1675_v57 }
 0x1aa   : > { %v1543_v54 = vsel %vm393_vm5, %v1542_v23, 0 }
 0x1ab   : > { %v764_v61 = vshll.u32 %v763_v7, 16  ;;  %1263 = vadd.xlane.f32.xlu0 %v1261_v55  ;;  %1265 = vadd.xlane.f32.xlu1 %v1262_v43  ;;  %v1403_v55 = vcvt.s32.f32 %v1401_v41  ;;  %v1404_v43 = vcvt.s32.f32 %v1402_v58  ;;  %v1495_v7 = vsel %vm393_vm5, %v3204_v9, 0 }
 0x1ac   : > { %v809_v50 = vpop.xlane.xlu1 %808  ;;  %v807_v2 = vpop.xlane.xlu0 %806  ;;  %v1678_v57 = vrot.slane %v1677_v56, 2  ;;  %v1496_v11 = vand.u32 65535, %v1495_v7  ;;  %v1497_v63 = vshrl.u32 %v1495_v7, 16  ;;  %v1545_v33 = vshrl.u32 %v1543_v54, 16 }
 0x1ad   : > { %v811_v19 = vcvt.f32.s32 %v809_v50  ;;  %v2917_v26 = vadd.s32 %v764_v61, %v762_v12  ;;  %v810_v22 = vcvt.f32.s32 %v807_v2  ;;  %v1587_v61 = vshra.s32 %v2929_v3, 15 }
 0x1ae   : > { %v1633_v12 = vrot.slane %v1632_v31, 1  ;;  %v1499_v58 = vcvt.s32.f32 %v1497_v63 }
 0x1af   : > { %v812_v16 = vshll.u32 %v811_v19, 16  ;;  %1310 = vadd.xlane.f32.xlu0 %v1308_v62  ;;  %1312 = vadd.xlane.f32.xlu1 %v1309_v30  ;;  %v1725_v19 = vadd.s32 %v1724_v40, %v1723_v48  ;;  %v1770_v30 = vsel %vm393_vm5, %v1769_v36, 0  ;;  %v1588_v35 = vmul.u32 32768, %v1587_v61 }
 0x1b0   : > { %v856_v53 = vpop.xlane.xlu1 %855  ;;  %v854_v15 = vpop.xlane.xlu0 %853  ;;  %v2948_v37 = vadd.s32 %v1633_v12, %v1632_v31  ;;  %v1771_v0 = vrot.slane %v1770_v30, 4  ;;  %v1544_v48 = vand.u32 65535, %v1543_v54  ;;  %v1608_v63 = vsel %vm393_vm5, %v1587_v61, 0 }
 0x1b1   : > { %v858_v60 = vcvt.f32.s32 %v856_v53  ;;  %v2925_v51 = vadd.s32 %v812_v16, %v810_v22  ;;  %v857_v20 = vcvt.f32.s32 %v854_v15  ;;  %v1679_v16 = vadd.s32 %v1678_v57, %v1677_v56 }
 0x1b2   : > { %v1498_v15 = vcvt.s32.f32 %v1496_v11  ;;  %v1589_v56 = vsub.s32 %v2929_v3, %v1588_v35  ;;  %v1726_v34 = vrot.slane %v1725_v19, 2  ;;  %v1546_v7 = vcvt.s32.f32 %v1544_v48 }
 0x1b3   : > { %v859_v29 = vshll.u32 %v858_v60, 16  ;;  %1358 = vadd.xlane.f32.xlu0 %v1356_v46  ;;  %1360 = vadd.xlane.f32.xlu1 %v1357_v5  ;;  %v1817_v60 = vsel %vm1816_vm4, %v2453_v8, 0  ;;  %v1772_v8 = vadd.s32 %v1771_v0, %v1770_v30  ;;  %v1864_v11 = vsel %vm1816_vm4, %v2455_v6, 0 }
 0x1b4   : > { %v904_v1 = vpop.xlane.xlu1 %903  ;;  %v902_v52 = vpop.xlane.xlu0 %901  ;;  %v1818_v4 = vsel %vm393_vm5, %v1817_v60, 0  ;;  %v1590_v36 = vsel %vm393_vm5, %v1589_v56, 0  ;;  %v1727_v57 = vadd.s32 %v1726_v34, %v1725_v19  ;;  %v1610_v61 = vshrl.u32 %v1608_v63, 16 }
 0x1b5   : > { %v906_v24 = vcvt.f32.s32 %v904_v1  ;;  %v2938_v47 = vadd.s32 %v859_v29, %v857_v20  ;;  %v905_v2 = vcvt.f32.s32 %v902_v52  ;;  %v1635_v29 = vshra.s32 %v2948_v37, 15 }
 0x1b6   : > { %v1680_v20 = vrot.slane %v1679_v16, 1  ;;  %v1591_v54 = vand.u32 65535, %v1590_v36  ;;  %v1592_v19 = vshrl.u32 %v1590_v36, 16  ;;  %v1728_v42 = vrot.slane %v1727_v57, 1 }
 0x1b7   : > { %v907_v50 = vshll.u32 %v906_v24, 16  ;;  %1405 = vadd.xlane.f32.xlu0 %v1403_v55  ;;  %1407 = vadd.xlane.f32.xlu1 %v1404_v43  ;;  %v1562_v55 = vand.u32 65535, %v1561_v17  ;;  %v1563_v43 = vshrl.u32 %v1561_v17, 16  ;;  %v1547_v24 = vcvt.s32.f32 %v1545_v33 }
 0x1b8   : > { %v951_v10 = vpop.xlane.xlu1 %950  ;;  %v949_v62 = vpop.xlane.xlu0 %948  ;;  %v1636_v23 = vmul.u32 32768, %v1635_v29  ;;  %v2967_v12 = vadd.s32 %v1680_v20, %v1679_v16  ;;  %v1773_v6 = vrot.slane %v1772_v8, 2  ;;  %v1865_v17 = vsel %vm393_vm5, %v1864_v11, 0 }
 0x1b9   : > { %v953_v21 = vcvt.f32.s32 %v951_v10  ;;  %v2943_v39 = vadd.s32 %v907_v50, %v905_v2  ;;  %v952_v53 = vcvt.f32.s32 %v949_v62  ;;  %v1593_v60 = vcvt.s32.f32 %v1591_v54 }
 0x1ba   : > { %v1637_v16 = vsub.s32 %v2948_v37, %v1636_v23  ;;  %v2985_v20 = vadd.s32 %v1728_v42, %v1727_v57  ;;  %v1774_v34 = vadd.s32 %v1773_v6, %v1772_v8  ;;  %vm202_vm4 = vcmask 516096  }
 0x1bb   : > { %v954_v22 = vshll.u32 %v953_v21, 16  ;;  %1453 = vadd.xlane.f32.xlu0 %v1451_v45  ;;  %1455 = vadd.xlane.f32.xlu1 %v1452_v59  ;;  %v1564_v45 = vcvt.s32.f32 %v1562_v55  ;;  %v1565_v59 = vcvt.s32.f32 %v1563_v43  ;;  %v1819_v21 = vrot.slane %v1818_v4, 4 }
 0x1bc   : > { %v999_v46 = vpop.xlane.xlu1 %998  ;;  %v997_v41 = vpop.xlane.xlu0 %996  ;;  %v1638_v33 = vsel %vm393_vm5, %v1637_v16, 0  ;;  %v1612_v43 = vcvt.s32.f32 %v1610_v61  ;;  %v1730_v57 = vshra.s32 %v2985_v20, 15 }
 0x1bd   : > { %v1001_v5 = vcvt.f32.s32 %v999_v46  ;;  %v2957_v31 = vadd.s32 %v954_v22, %v952_v53  ;;  %v1000_v49 = vcvt.f32.s32 %v997_v41  ;;  %v1682_v22 = vshra.s32 %v2967_v12, 15 }
 0x1be   : > { %v1609_v41 = vand.u32 65535, %v1608_v63  ;;  %v1640_v36 = vshrl.u32 %v1638_v33, 16  ;;  %v1731_v16 = vmul.u32 32768, %v1730_v57 }
 0x1bf   : > { %v1002_v1 = vshll.u32 %v1001_v5, 16  ;;  %1500 = vadd.xlane.f32.xlu0 %v1498_v15  ;;  %1502 = vadd.xlane.f32.xlu1 %v1499_v58  ;;  %v1820_v58 = vadd.s32 %v1819_v21, %v1818_v4  ;;  %v1594_v5 = vcvt.s32.f32 %v1592_v19  ;;  %v1683_v56 = vmul.u32 32768, %v1682_v22 }
 0x1c0   : > { %v1046_v13 = vpop.xlane.xlu1 %1045  ;;  %v1044_v52 = vpop.xlane.xlu0 %1043  ;;  %v1611_v55 = vcvt.s32.f32 %v1609_v41  ;;  %v1656_v4 = vsel %vm393_vm5, %v1635_v29, 0 }
 0x1c1   : > { %v1048_v9 = vcvt.f32.s32 %v1046_v13  ;;  %v2962_v40 = vadd.s32 %v1002_v1, %v1000_v49  ;;  %v1047_v2 = vcvt.f32.s32 %v1044_v52  ;;  %v1684_v8 = vsub.s32 %v2967_v12, %v1683_v56 }
 0x1c2   : > { %v1658_v29 = vshrl.u32 %v1656_v4, 16  ;;  %v1732_v56 = vsub.s32 %v2985_v20, %v1731_v16 }
 0x1c3   : > { %v1049_v50 = vshll.u32 %v1048_v9, 16  ;;  %1548 = vadd.xlane.f32.xlu0 %v1546_v7  ;;  %1550 = vadd.xlane.f32.xlu1 %v1547_v24  ;;  %v1866_v9 = vrot.slane %v1865_v17, 4  ;;  %v1639_v24 = vand.u32 65535, %v1638_v33  ;;  %v1685_v19 = vsel %vm393_vm5, %v1684_v8, 0 }
 0x1c4   : > { %v1094_v10 = vpop.xlane.xlu1 %1093  ;;  %v1092_v62 = vpop.xlane.xlu0 %1091  ;;  %v1660_v61 = vcvt.s32.f32 %v1658_v29 }
 0x1c5   : > { %v1096_v30 = vcvt.f32.s32 %v1094_v10  ;;  %v2975_v35 = vadd.s32 %v1049_v50, %v1047_v2  ;;  %v1095_v15 = vcvt.f32.s32 %v1092_v62  ;;  %v1775_v50 = vrot.slane %v1774_v34, 1 }
 0x1c6   : > { %v1821_v2 = vrot.slane %v1820_v58, 2  ;;  %v1641_v21 = vcvt.s32.f32 %v1639_v24  ;;  %v1733_v24 = vsel %vm393_vm5, %v1732_v56, 0 }
 0x1c7   : > { %v1097_v53 = vshll.u32 %v1096_v30, 16  ;;  %1566 = vadd.xlane.f32.xlu0 %v1564_v45  ;;  %1568 = vadd.xlane.f32.xlu1 %v1565_v59  ;;  %v1657_v45 = vand.u32 65535, %v1656_v4  ;;  %v1867_v59 = vadd.s32 %v1866_v9, %v1865_v17  ;;  %v1642_v30 = vcvt.s32.f32 %v1640_v36 }
 0x1c8   : > { %v1141_v46 = vpop.xlane.xlu1 %1140  ;;  %v1139_v3 = vpop.xlane.xlu0 %1138  ;;  %v2997_v42 = vadd.s32 %v1775_v50, %v1774_v34  ;;  %v1822_v6 = vadd.s32 %v1821_v2, %v1820_v58  ;;  %v1703_v17 = vsel %vm393_vm5, %v1682_v22, 0 }
 0x1c9   : > { %v1143_v0 = vcvt.f32.s32 %v1141_v46  ;;  %v2980_v48 = vadd.s32 %v1097_v53, %v1095_v15  ;;  %v1142_v49 = vcvt.f32.s32 %v1139_v3  ;;  %v1659_v41 = vcvt.s32.f32 %v1657_v45 }
 0x1ca   : > { %v1777_v58 = vshra.s32 %v2997_v42, 15  ;;  %v1823_v34 = vrot.slane %v1822_v6, 1  ;;  %v1704_v12 = vand.u32 65535, %v1703_v17  ;;  %v1751_v45 = vsel %vm393_vm5, %v1730_v57, 0 }
 0x1cb   : > { %v1144_v1 = vshll.u32 %v1143_v0, 16  ;;  %1595 = vadd.xlane.f32.xlu0 %v1593_v60  ;;  %1597 = vadd.xlane.f32.xlu1 %v1594_v5  ;;  %v1686_v60 = vand.u32 65535, %v1685_v19  ;;  %v1687_v5 = vshrl.u32 %v1685_v19, 16 }
 0x1cc   : > { %v1189_v13 = vpop.xlane.xlu1 %1188  ;;  %v1187_v52 = vpop.xlane.xlu0 %1186  ;;  %v1778_v20 = vmul.u32 32768, %v1777_v58  ;;  %v3009_v36 = vadd.s32 %v1823_v34, %v1822_v6 }
 0x1cd   : > { %v1191_v7 = vcvt.f32.s32 %v1189_v13  ;;  %v2990_v23 = vadd.s32 %v1144_v1, %v1142_v49  ;;  %v1190_v10 = vcvt.f32.s32 %v1187_v52  ;;  %v1868_v1 = vrot.slane %v1867_v59, 2 }
 0x1ce   : > { %v1688_v4 = vcvt.s32.f32 %v1686_v60  ;;  %v1689_v9 = vcvt.s32.f32 %v1687_v5  ;;  %v1779_v19 = vsub.s32 %v2997_v42, %v1778_v20  ;;  %v1825_v16 = vshra.s32 %v3009_v36, 15 }
 0x1cf   : > { %v1192_v11 = vshll.u32 %v1191_v7, 16  ;;  %1613 = vadd.xlane.f32.xlu0 %v1611_v55  ;;  %1615 = vadd.xlane.f32.xlu1 %v1612_v43  ;;  %v1705_v43 = vshrl.u32 %v1703_v17, 16  ;;  %v1869_v8 = vadd.s32 %v1868_v1, %v1867_v59 }
 0x1d0   : > { %v1236_v62 = vpop.xlane.xlu1 %1235  ;;  %v1234_v37 = vpop.xlane.xlu0 %1233  ;;  %v1780_v60 = vsel %vm393_vm5, %v1779_v19, 0  ;;  %v1826_v5 = vmul.u32 32768, %v1825_v16 }
 0x1d1   : > { %v1238_v63 = vcvt.f32.s32 %v1236_v62  ;;  %v2994_v54 = vadd.s32 %v1192_v11, %v1190_v10  ;;  %v1237_v15 = vcvt.f32.s32 %v1234_v37  ;;  %v1706_v62 = vcvt.s32.f32 %v1704_v12 }
 0x1d2   : > { %v1707_v37 = vcvt.s32.f32 %v1705_v43  ;;  %v1870_v59 = vrot.slane %v1869_v8, 1  ;;  %v1781_v43 = vand.u32 65535, %v1780_v60 }
 0x1d3   : > { %v1239_v53 = vshll.u32 %v1238_v63, 16  ;;  %1643 = vadd.xlane.f32.xlu0 %v1641_v21  ;;  %1645 = vadd.xlane.f32.xlu1 %v1642_v30  ;;  %v1734_v63 = vand.u32 65535, %v1733_v24  ;;  %v1735_v21 = vshrl.u32 %v1733_v24, 16 }
 0x1d4   : > { %v1284_v46 = vpop.xlane.xlu1 %1283  ;;  %v1282_v3 = vpop.xlane.xlu0 %1281  ;;  %v3019_v42 = vadd.s32 %v1870_v59, %v1869_v8 }
 0x1d5   : > { %v1286_v0 = vcvt.f32.s32 %v1284_v46  ;;  %v3002_v33 = vadd.s32 %v1239_v53, %v1237_v15  ;;  %v1285_v13 = vcvt.f32.s32 %v1282_v3  ;;  %v1752_v3 = vand.u32 65535, %v1751_v45 }
 0x1d6   : > { %v1736_v57 = vcvt.s32.f32 %v1734_v63  ;;  %v1737_v17 = vcvt.s32.f32 %v1735_v21  ;;  %v1872_v24 = vshra.s32 %v3019_v42, 15 }
 0x1d7   : > { %v1287_v49 = vshll.u32 %v1286_v0, 16  ;;  %1661 = vadd.xlane.f32.xlu0 %v1659_v41  ;;  %1663 = vadd.xlane.f32.xlu1 %v1660_v61  ;;  %v1753_v41 = vshrl.u32 %v1751_v45, 16 }
 0x1d8   : > { %v1331_v52 = vpop.xlane.xlu1 %1330  ;;  %v1329_v55 = vpop.xlane.xlu0 %1328  ;;  %v1873_v63 = vmul.u32 32768, %v1872_v24 }
 0x1d9   : > { %v1333_v22 = vcvt.f32.s32 %v1331_v52  ;;  %v3006_v7 = vadd.s32 %v1287_v49, %v1285_v13  ;;  %v1332_v2 = vcvt.f32.s32 %v1329_v55  ;;  %v1754_v13 = vcvt.s32.f32 %v1752_v3 }
 0x1da   : > { %v1755_v52 = vcvt.s32.f32 %v1753_v41  ;;  %v1798_v55 = vsel %vm393_vm5, %v1777_v58, 0 }
 0x1db   : > { %v1334_v50 = vshll.u32 %v1333_v22, 16  ;;  %1690 = vadd.xlane.f32.xlu0 %v1688_v4  ;;  %1692 = vadd.xlane.f32.xlu1 %v1689_v9  ;;  %v1782_v22 = vshrl.u32 %v1780_v60, 16  ;;  %v1827_v9 = vsub.s32 %v3009_v36, %v1826_v5 }
 0x1dc   : > { %v1379_v11 = vpop.xlane.xlu1 %1378  ;;  %v1377_v10 = vpop.xlane.xlu0 %1376 }
 0x1dd   : > { %v1381_v29 = vcvt.f32.s32 %v1379_v11  ;;  %v3012_v30 = vadd.s32 %v1334_v50, %v1332_v2  ;;  %v1380_v53 = vcvt.f32.s32 %v1377_v10  ;;  %v1799_v11 = vand.u32 65535, %v1798_v55 }
 0x1de   : > { %v1800_v10 = vshrl.u32 %v1798_v55, 16  ;;  %v1784_v58 = vcvt.s32.f32 %v1782_v22 }
 0x1df   : > { %v1382_v6 = vshll.u32 %v1381_v29, 16  ;;  %1708 = vadd.xlane.f32.xlu0 %v1706_v62  ;;  %1710 = vadd.xlane.f32.xlu1 %v1707_v37  ;;  %v1783_v37 = vcvt.s32.f32 %v1781_v43  ;;  %v1828_v29 = vsel %vm393_vm5, %v1827_v9, 0 }
 0x1e0   : > { %v1426_v15 = vpop.xlane.xlu1 %1425  ;;  %v1424_v46 = vpop.xlane.xlu0 %1423  ;;  %v1829_v3 = vand.u32 65535, %v1828_v29  ;;  %v1830_v41 = vshrl.u32 %v1828_v29, 16 }
 0x1e1   : > { %v1428_v61 = vcvt.f32.s32 %v1426_v15  ;;  %v3016_v0 = vadd.s32 %v1382_v6, %v1380_v53  ;;  %v1427_v34 = vcvt.f32.s32 %v1424_v46  ;;  %v1801_v6 = vcvt.s32.f32 %v1799_v11 }
 0x1e2   : > { %v1802_v53 = vcvt.s32.f32 %v1800_v10  ;;  %v1846_v15 = vsel %vm393_vm5, %v1825_v16, 0 }
 0x1e3   : > { %v1429_v56 = vshll.u32 %v1428_v61, 16  ;;  %1738 = vadd.xlane.f32.xlu0 %v1736_v57  ;;  %1740 = vadd.xlane.f32.xlu1 %v1737_v17  ;;  %v1874_v57 = vsub.s32 %v3019_v42, %v1873_v63 }
 0x1e4   : > { %v1474_v1 = vpop.xlane.xlu1 %1473  ;;  %v1472_v49 = vpop.xlane.xlu0 %1471 }
 0x1e5   : > { %v1476_v12 = vcvt.f32.s32 %v1474_v1  ;;  %v3022_v4 = vadd.s32 %v1429_v56, %v1427_v34  ;;  %v1475_v8 = vcvt.f32.s32 %v1472_v49  ;;  %v1847_v34 = vand.u32 65535, %v1846_v15 }
 0x1e6   : > { %v1848_v1 = vshrl.u32 %v1846_v15, 16  ;;  %v1875_v16 = vsel %vm393_vm5, %v1874_v57, 0 }
 0x1e7   : > { %v1477_v20 = vshll.u32 %v1476_v12, 16  ;;  %1756 = vadd.xlane.f32.xlu0 %v1754_v13  ;;  %1758 = vadd.xlane.f32.xlu1 %v1755_v52  ;;  %v1831_v13 = vcvt.s32.f32 %v1829_v3  ;;  %v1832_v52 = vcvt.s32.f32 %v1830_v41  ;;  %v1849_v9 = vcvt.s32.f32 %v1847_v34 }
 0x1e8   : > { %v1521_v50 = vpop.xlane.xlu1 %1520  ;;  %v1519_v2 = vpop.xlane.xlu0 %1518  ;;  %v1876_v11 = vand.u32 65535, %v1875_v16  ;;  %v1877_v10 = vshrl.u32 %v1875_v16, 16 }
 0x1e9   : > { %v1523_v62 = vcvt.f32.s32 %v1521_v50  ;;  %v3026_v45 = vadd.s32 %v1477_v20, %v1475_v8  ;;  %v1522_v36 = vcvt.f32.s32 %v1519_v2  ;;  %v1850_v20 = vcvt.s32.f32 %v1848_v1 }
 0x1ea   : > { %v1893_v8 = vsel %vm393_vm5, %v1872_v24, 0  ;;  %vm418_vm5 = vcmp.eq.s32.totalorder %v2439_v27, 0 }
 0x1eb   : > { %v1524_v21 = vshll.u32 %v1523_v62, 16  ;;  %1785 = vadd.xlane.f32.xlu0 %v1783_v37  ;;  %1787 = vadd.xlane.f32.xlu1 %v1784_v58  ;;  %v1895_v63 = vshrl.u32 %v1893_v8, 16 }
 0x1ec   : > { %v412_v19 = vpop.xlane.xlu0 %411  ;;  %v410_v59 = vpop.xlane.xlu1 %409 }
 0x1ed   : > { %v414_v46 = vcvt.f32.s32 %v412_v19  ;;  %v3030_v61 = vadd.s32 %v1524_v21, %v1522_v36  ;;  %v413_v60 = vcvt.f32.s32 %v410_v59  ;;  %v1878_v36 = vcvt.s32.f32 %v1876_v11 }
 0x1ee   : > { %v1879_v19 = vcvt.s32.f32 %v1877_v10 }
 0x1ef   : > { %v415_v17 = vshll.u32 %v414_v46, 16  ;;  %1803 = vadd.xlane.f32.xlu0 %v1801_v6  ;;  %1805 = vadd.xlane.f32.xlu1 %v1802_v53 }
 0x1f0   : > { %v456_v5 = vpop.xlane.xlu0 %455  ;;  %v458_v56 = vpop.xlane.xlu1 %457 }
 0x1f1   : > { %v460_v49 = vcvt.f32.s32 %v458_v56  ;;  %v416_v55 = vadd.s32 %v415_v17, %v413_v60  ;;  %v459_v12 = vcvt.f32.s32 %v456_v5 }
 0x1f3   : > { %v461_v43 = vshll.u32 %v460_v49, 16  ;;  %1833 = vadd.xlane.f32.xlu0 %v1831_v13  ;;  %1835 = vadd.xlane.f32.xlu1 %v1832_v52  ;;  %2024 = vpush %v416_v55 }
 0x1f4   : > { %2026 = vpush %v2855_v18  ;;  %v504_v42 = vpop.xlane.xlu0 %503  ;;  %v506_v22 = vpop.xlane.xlu1 %505  ;;  %v1894_v18 = vand.u32 65535, %v1893_v8 }
 0x1f5   : > { %v508_v50 = vcvt.f32.s32 %v506_v22  ;;  %v462_v2 = vadd.s32 %v461_v43, %v459_v12  ;;  %v507_v62 = vcvt.f32.s32 %v504_v42 }
 0x1f6   : > { %v1896_v3 = vcvt.s32.f32 %v1894_v18 }
 0x1f7   : > { %v509_v37 = vshll.u32 %v508_v50, 16  ;;  %1851 = vadd.xlane.f32.xlu0 %v1849_v9  ;;  %1853 = vadd.xlane.f32.xlu1 %v1850_v20  ;;  %2028 = vpush %v462_v2 }
 0x1f8   : > { %2030 = vpush %v2862_v44  ;;  %v551_v58 = vpop.xlane.xlu0 %550  ;;  %v553_v29 = vpop.xlane.xlu1 %552  ;;  %v1897_v44 = vcvt.s32.f32 %v1895_v63 }
 0x1f9   : > { %v555_v21 = vcvt.f32.s32 %v553_v29  ;;  %v510_v59 = vadd.s32 %v509_v37, %v507_v62  ;;  %v554_v24 = vcvt.f32.s32 %v551_v58 }
 0x1fb   : > { %v556_v6 = vshll.u32 %v555_v21, 16  ;;  %1880 = vadd.xlane.f32.xlu0 %v1878_v36  ;;  %1882 = vadd.xlane.f32.xlu1 %v1879_v19  ;;  %2032 = vpush %v510_v59 }
 0x1fc   : > { %2034 = vpush %v2871_v32  ;;  %v599_v53 = vpop.xlane.xlu0 %598  ;;  %v601_v15 = vpop.xlane.xlu1 %600 }
 0x1fd   : > { %v603_v46 = vcvt.f32.s32 %v601_v15  ;;  %v557_v41 = vadd.s32 %v556_v6, %v554_v24  ;;  %v602_v57 = vcvt.f32.s32 %v599_v53 }
 0x1ff   : > { %v604_v17 = vshll.u32 %v603_v46, 16  ;;  %1898 = vadd.xlane.f32.xlu0 %v1896_v3  ;;  %1900 = vadd.xlane.f32.xlu1 %v1897_v44  ;;  %2036 = vpush %v557_v41 }
 0x200   : > { %2038 = vpush %v2878_v28  ;;  %v646_v60 = vpop.xlane.xlu0 %645  ;;  %v648_v5 = vpop.xlane.xlu1 %647 }
 0x201   : > { %v650_v56 = vcvt.f32.s32 %v648_v5  ;;  %v605_v34 = vadd.s32 %v604_v17, %v602_v57  ;;  %v649_v1 = vcvt.f32.s32 %v646_v60 }
 0x203   : > { %v651_v49 = vshll.u32 %v650_v56, 16  ;;  %2040 = vpush %v605_v34 }
 0x204   : > { %2042 = vpush %v2888_v38  ;;  %v694_v32 = vpop.xlane.xlu0 %693  ;;  %v696_v13 = vpop.xlane.xlu1 %695 }
 0x205   : > { %v698_v52 = vcvt.f32.s32 %v696_v13  ;;  %v652_v55 = vadd.s32 %v651_v49, %v649_v1  ;;  %v697_v16 = vcvt.f32.s32 %v694_v32 }
 0x207   : > { %v699_v12 = vshll.u32 %v698_v52, 16  ;;  %2044 = vpush %v652_v55 }
 0x208   : > { %2046 = vpush %v2895_v14  ;;  %v741_v43 = vpop.xlane.xlu0 %740  ;;  %v743_v28 = vpop.xlane.xlu1 %742 }
 0x209   : > { %v745_v42 = vcvt.f32.s32 %v743_v28  ;;  %v700_v22 = vadd.s32 %v699_v12, %v697_v16  ;;  %v744_v9 = vcvt.f32.s32 %v741_v43 }
 0x20b   : > { %v746_v20 = vshll.u32 %v745_v42, 16  ;;  %2048 = vpush %v700_v22 }
 0x20c   : > { %2050 = vpush %v2904_v25  ;;  %v789_v8 = vpop.xlane.xlu0 %788  ;;  %v791_v38 = vpop.xlane.xlu1 %790 }
 0x20d   : > { %v793_v50 = vcvt.f32.s32 %v791_v38  ;;  %v747_v2 = vadd.s32 %v746_v20, %v744_v9  ;;  %v792_v11 = vcvt.f32.s32 %v789_v8 }
 0x20f   : > { %v794_v10 = vshll.u32 %v793_v50, 16  ;;  %2052 = vpush %v747_v2 }
 0x210   : > { %2054 = vpush %v2917_v26  ;;  %v836_v62 = vpop.xlane.xlu0 %835  ;;  %v838_v14 = vpop.xlane.xlu1 %837 }
 0x211   : > { %v840_v37 = vcvt.f32.s32 %v838_v14  ;;  %v795_v58 = vadd.s32 %v794_v10, %v792_v11  ;;  %v839_v29 = vcvt.f32.s32 %v836_v62 }
 0x213   : > { %v841_v18 = vshll.u32 %v840_v37, 16  ;;  %2056 = vpush %v795_v58 }
 0x214   : > { %2058 = vpush %v2925_v51  ;;  %v884_v63 = vpop.xlane.xlu0 %883  ;;  %v886_v25 = vpop.xlane.xlu1 %885 }
 0x215   : > { %v888_v21 = vcvt.f32.s32 %v886_v25  ;;  %v842_v36 = vadd.s32 %v841_v18, %v839_v29  ;;  %v887_v19 = vcvt.f32.s32 %v884_v63 }
 0x217   : > { %v889_v59 = vshll.u32 %v888_v21, 16  ;;  %2060 = vpush %v842_v36 }
 0x218   : > { %2062 = vpush %v2938_v47  ;;  %v931_v24 = vpop.xlane.xlu0 %930  ;;  %v933_v26 = vpop.xlane.xlu1 %932 }
 0x219   : > { %v935_v6 = vcvt.f32.s32 %v933_v26  ;;  %v890_v53 = vadd.s32 %v889_v59, %v887_v19  ;;  %v934_v15 = vcvt.f32.s32 %v931_v24 }
 0x21b   : > { %v936_v46 = vshll.u32 %v935_v6, 16  ;;  %2064 = vpush %v890_v53 }
 0x21c   : > { %2066 = vpush %v2943_v39  ;;  %v979_v3 = vpop.xlane.xlu0 %978  ;;  %v981_v51 = vpop.xlane.xlu1 %980 }
 0x21d   : > { %v983_v44 = vcvt.f32.s32 %v981_v51  ;;  %v937_v41 = vadd.s32 %v936_v46, %v934_v15  ;;  %v982_v57 = vcvt.f32.s32 %v979_v3 }
 0x21f   : > { %v984_v17 = vshll.u32 %v983_v44, 16  ;;  %2068 = vpush %v937_v41 }
 0x220   : > { %2070 = vpush %v2957_v31  ;;  %v1026_v60 = vpop.xlane.xlu0 %1025  ;;  %v1028_v47 = vpop.xlane.xlu1 %1027 }
 0x221   : > { %v1030_v5 = vcvt.f32.s32 %v1028_v47  ;;  %v985_v56 = vadd.s32 %v984_v17, %v982_v57  ;;  %v1029_v34 = vcvt.f32.s32 %v1026_v60 }
 0x223   : > { %v1031_v1 = vshll.u32 %v1030_v5, 16  ;;  %2072 = vpush %v985_v56 }
 0x224   : > { %2074 = vpush %v2962_v40  ;;  %v1074_v39 = vpop.xlane.xlu0 %1073  ;;  %s2025_s3 = spop %2024  ;;  %v1076_v49 = vpop.xlane.xlu1 %1075 }
 0x225   : > { %v419_v32 = vstv %s2025_s3  ;;  %s2027_s4 = spop %2026  ;;  %v1078_v13 = vcvt.f32.s32 %v1076_v49  ;;  %v1032_v31 = vadd.s32 %v1031_v1, %v1029_v34  ;;  %v1077_v16 = vcvt.f32.s32 %v1074_v39 }
 0x226   : > { %v420_v52 = vsel %vm418_vm5, %v419_v32, 0  ;;  %v436_v55 = vstv %s2027_s4  ;;  %vm767_vm5 = vcmp.eq.s32.totalorder %v2439_v27, 15 }
 0x227   : > { %v437_v12 = vsel %vm435_vm6, %v436_v55, 0  ;;  %v1079_v43 = vshll.u32 %v1078_v13, 16  ;;  %2076 = vpush %v1032_v31  ;;  %vm797_vm6 = vcmp.eq.s32.totalorder %v2439_v27, 16 }
 0x228   : > { %2078 = vpush %v2975_v35  ;;  %v1121_v40 = vpop.xlane.xlu0 %1120  ;;  %s2029_s5 = spop %2028  ;;  %v1123_v28 = vpop.xlane.xlu1 %1122  ;;  %v438_v42 = vadd.s32 %v437_v12, %v420_v52 }
 0x229   : > { %v465_v22 = vstv %s2029_s5  ;;  %s2031_s6 = spop %2030  ;;  %v1125_v9 = vcvt.f32.s32 %v1123_v28  ;;  %v1080_v20 = vadd.s32 %v1079_v43, %v1077_v16  ;;  %v1124_v11 = vcvt.f32.s32 %v1121_v40 }
 0x22a   : > { %v466_v8 = vsel %vm464_vm7, %v465_v22, 0  ;;  %v483_v38 = vstv %s2031_s6  ;;  %vm815_vm7 = vcmp.eq.s32.totalorder %v2439_v27, 17 }
 0x22b   : > { %v467_v50 = vadd.s32 %v466_v8, %v438_v42  ;;  %v1126_v2 = vshll.u32 %v1125_v9, 16  ;;  %2080 = vpush %v1080_v20  ;;  %v484_v10 = vsel %vm482_vm8, %v483_v38, 0  ;;  %vm844_vm8 = vcmp.eq.s32.totalorder %v2439_v27, 18 }
 0x22c   : > { %2082 = vpush %v2980_v48  ;;  %v1169_v35 = vpop.xlane.xlu0 %1168  ;;  %s2033_s7 = spop %2032  ;;  %v1171_v62 = vpop.xlane.xlu1 %1170 }
 0x22d   : > { %v485_v14 = vadd.s32 %v484_v10, %v467_v50  ;;  %v513_v37 = vstv %s2033_s7  ;;  %s2035_s8 = spop %2034  ;;  %v1173_v58 = vcvt.f32.s32 %v1171_v62  ;;  %v1127_v63 = vadd.s32 %v1126_v2, %v1124_v11 }
 0x22e   : > { %v514_v29 = vsel %vm512_vm9, %v513_v37, 0  ;;  %v531_v18 = vstv %s2035_s8  ;;  %v1172_v36 = vcvt.f32.s32 %v1169_v35  ;;  %vm862_vm9 = vcmp.eq.s32.totalorder %v2439_v27, 19 }
 0x22f   : > { %v515_v25 = vadd.s32 %v514_v29, %v485_v14  ;;  %v1174_v21 = vshll.u32 %v1173_v58, 16  ;;  %v532_v19 = vsel %vm530_vm10, %v531_v18, 0  ;;  %2084 = vpush %v1127_v63  ;;  %v3205_v63 = vmov 0  }
 0x230   : > { %v1216_v48 = vpop.xlane.xlu0 %1215  ;;  %s2037_s15 = spop %2036  ;;  %v1218_v59 = vpop.xlane.xlu1 %1217  ;;  %2086 = vpush %v2990_v23  ;;  %vm892_vm10 = vcmp.eq.s32.totalorder %v2439_v27, 20 }
 0x231   : > { %v533_v24 = vadd.s32 %v532_v19, %v515_v25  ;;  %v560_v26 = vstv %s2037_s15  ;;  %s2039_s16 = spop %2038  ;;  %v1220_v6 = vcvt.f32.s32 %v1218_v59  ;;  %v1175_v46 = vadd.s32 %v1174_v21, %v1172_v36  ;;  %203 = vst.msk [vmem:[%s3074_s30] sm:$0x1] %vm202_vm4, %v3205_v63 }
 0x232   : > { %v561_v53 = vsel %vm559_vm11, %v560_v26, 0  ;;  %v578_v15 = vstv %s2039_s16  ;;  %v1219_v44 = vcvt.f32.s32 %v1216_v48  ;;  %vm910_vm11 = vcmp.eq.s32.totalorder %v2439_v27, 21 }
 0x233   : > { %v562_v3 = vadd.s32 %v561_v53, %v533_v24  ;;  %v1221_v51 = vshll.u32 %v1220_v6, 16  ;;  %v579_v41 = vsel %vm577_vm12, %v578_v15, 0  ;;  %2088 = vpush %v1175_v46  ;;  %vm939_vm12 = vcmp.eq.s32.totalorder %v2439_v27, 22 }
 0x234   : > { %v1264_v57 = vpop.xlane.xlu0 %1263  ;;  %s2041_s18 = spop %2040  ;;  %v1266_v17 = vpop.xlane.xlu1 %1265  ;;  %2090 = vpush %v2994_v54 }
 0x235   : > { %v580_v60 = vadd.s32 %v579_v41, %v562_v3  ;;  %v608_v23 = vstv %s2041_s18  ;;  %s2043_s20 = spop %2042  ;;  %v1268_v47 = vcvt.f32.s32 %v1266_v17  ;;  %v1222_v34 = vadd.s32 %v1221_v51, %v1219_v44 }
 0x236   : > { %v609_v5 = vsel %vm607_vm13, %v608_v23, 0  ;;  %v626_v56 = vstv %s2043_s20  ;;  %v1267_v49 = vcvt.f32.s32 %v1264_v57  ;;  %vm957_vm13 = vcmp.eq.s32.totalorder %v2439_v27, 23 }
 0x237   : > { %v610_v1 = vadd.s32 %v609_v5, %v580_v60  ;;  %v1269_v39 = vshll.u32 %v1268_v47, 16  ;;  %v627_v32 = vsel %vm625_vm14, %v626_v56, 0  ;;  %2092 = vpush %v1222_v34  ;;  %vm987_vm14 = vcmp.eq.s32.totalorder %v2439_v27, 24 }
 0x238   : > { %v1311_v13 = vpop.xlane.xlu0 %1310  ;;  %s2045_s23 = spop %2044  ;;  %v1313_v31 = vpop.xlane.xlu1 %1312  ;;  %2094 = vpush %v3002_v33 }
 0x239   : > { %v628_v52 = vadd.s32 %v627_v32, %v610_v1  ;;  %v655_v54 = vstv %s2045_s23  ;;  %s2047_s24 = spop %2046  ;;  %v1315_v55 = vcvt.f32.s32 %v1313_v31  ;;  %v1270_v43 = vadd.s32 %v1269_v39, %v1267_v49 }
 0x23a   : > { %v656_v16 = vsel %vm654_vm15, %v655_v54, 0  ;;  %v673_v12 = vstv %s2047_s24  ;;  %v1314_v42 = vcvt.f32.s32 %v1311_v13  ;;  %vm1005_vm15 = vcmp.eq.s32.totalorder %v2439_v27, 25 }
 0x23b   : > { %v657_v40 = vadd.s32 %v656_v16, %v628_v52  ;;  %v1316_v28 = vshll.u32 %v1315_v55, 16  ;;  %v674_v22 = vsel %vm672_vm0, %v673_v12, 0  ;;  %2096 = vpush %v1270_v43  ;;  %vm1034_vm0 = vcmp.eq.s32.totalorder %v2439_v27, 26 }
 0x23c   : > { %v1359_v9 = vpop.xlane.xlu0 %1358  ;;  %s2049_s25 = spop %2048  ;;  %v1361_v20 = vpop.xlane.xlu1 %1360  ;;  %2098 = vpush %v3006_v7 }
 0x23d   : > { %v675_v33 = vadd.s32 %v674_v22, %v657_v40  ;;  %v703_v8 = vstv %s2049_s25  ;;  %s2051_s26 = spop %2050  ;;  %v1363_v38 = vcvt.f32.s32 %v1361_v20  ;;  %v1317_v11 = vadd.s32 %v1316_v28, %v1314_v42 }
 0x23e   : > { %v704_v50 = vsel %vm702_vm1, %v703_v8, 0  ;;  %v721_v2 = vstv %s2051_s26  ;;  %v1362_v62 = vcvt.f32.s32 %v1359_v9  ;;  %vm1052_vm1 = vcmp.eq.s32.totalorder %v2439_v27, 27 }
 0x23f   : > { %v705_v10 = vadd.s32 %v704_v50, %v675_v33  ;;  %v1364_v35 = vshll.u32 %v1363_v38, 16  ;;  %v722_v14 = vsel %vm720_vm2, %v721_v2, 0  ;;  %2100 = vpush %v1317_v11  ;;  %vm1082_vm2 = vcmp.eq.s32.totalorder %v2439_v27, 28 }
 0x240   : > { %v1406_v37 = vpop.xlane.xlu0 %1405  ;;  %s2053_s28 = spop %2052  ;;  %v1408_v7 = vpop.xlane.xlu1 %1407  ;;  %2102 = vpush %v3012_v30 }
 0x241   : > { %v723_v58 = vadd.s32 %v722_v14, %v705_v10  ;;  %v750_v29 = vstv %s2053_s28  ;;  %s2055_s29 = spop %2054  ;;  %v1410_v18 = vcvt.f32.s32 %v1408_v7  ;;  %v1365_v36 = vadd.s32 %v1364_v35, %v1362_v62 }
 0x242   : > { %v751_v25 = vsel %vm749_vm3, %v750_v29, 0  ;;  %v768_v21 = vstv %s2055_s29  ;;  %v1409_v30 = vcvt.f32.s32 %v1406_v37  ;;  %vm1100_vm3 = vcmp.eq.s32.totalorder %v2439_v27, 29 }
 0x243   : > { %v752_v19 = vadd.s32 %v751_v25, %v723_v58  ;;  %v1411_v48 = vshll.u32 %v1410_v18, 16  ;;  %v769_v59 = vsel %vm767_vm5, %v768_v21, 0  ;;  %2104 = vpush %v1365_v36  ;;  %vm1129_vm5 = vcmp.eq.s32.totalorder %v2439_v27, 30 }
 0x244   : > { %v1454_v24 = vpop.xlane.xlu0 %1453  ;;  %s2057_s3 = spop %2056  ;;  %v1456_v26 = vpop.xlane.xlu1 %1455  ;;  %2106 = vpush %v3016_v0 }
 0x245   : > { %v770_v6 = vadd.s32 %v769_v59, %v752_v19  ;;  %v798_v53 = vstv %s2057_s3  ;;  %s2059_s4 = spop %2058  ;;  %v1458_v15 = vcvt.f32.s32 %v1456_v26  ;;  %v1412_v51 = vadd.s32 %v1411_v48, %v1409_v30 }
 0x246   : > { %v799_v46 = vsel %vm797_vm6, %v798_v53, 0  ;;  %v816_v3 = vstv %s2059_s4  ;;  %v1457_v57 = vcvt.f32.s32 %v1454_v24  ;;  %vm1147_vm6 = vcmp.eq.s32.totalorder %v2439_v27, 31 }
 0x247   : > { %v800_v44 = vadd.s32 %v799_v46, %v770_v6  ;;  %v1459_v41 = vshll.u32 %v1458_v15, 16  ;;  %v817_v17 = vsel %vm815_vm7, %v816_v3, 0  ;;  %2108 = vpush %v1412_v51  ;;  %vm1177_vm7 = vcmp.eq.s32.totalorder %v2439_v27, 32 }
 0x248   : > { %v1501_v60 = vpop.xlane.xlu0 %1500  ;;  %s2061_s5 = spop %2060  ;;  %v1503_v23 = vpop.xlane.xlu1 %1502  ;;  %2110 = vpush %v3022_v4 }
 0x249   : > { %v818_v47 = vadd.s32 %v817_v17, %v800_v44  ;;  %v845_v0 = vstv %s2061_s5  ;;  %s2063_s6 = spop %2062  ;;  %v1505_v5 = vcvt.f32.s32 %v1503_v23  ;;  %v1460_v1 = vadd.s32 %v1459_v41, %v1457_v57 }
 0x24a   : > { %v846_v56 = vsel %vm844_vm8, %v845_v0, 0  ;;  %v863_v34 = vstv %s2063_s6  ;;  %v1504_v32 = vcvt.f32.s32 %v1501_v60  ;;  %vm1195_vm8 = vcmp.eq.s32.totalorder %v2439_v27, 33 }
 0x24b   : > { %v847_v39 = vadd.s32 %v846_v56, %v818_v47  ;;  %v1506_v49 = vshll.u32 %v1505_v5, 16  ;;  %v864_v13 = vsel %vm862_vm9, %v863_v34, 0  ;;  %2112 = vpush %v1460_v1  ;;  %vm1224_vm9 = vcmp.eq.s32.totalorder %v2439_v27, 34 }
 0x24c   : > { %v1549_v31 = vpop.xlane.xlu0 %1548  ;;  %s2065_s7 = spop %2064  ;;  %v1551_v52 = vpop.xlane.xlu1 %1550  ;;  %2114 = vpush %v3026_v45 }
 0x24d   : > { %v865_v54 = vadd.s32 %v864_v13, %v847_v39  ;;  %v893_v4 = vstv %s2065_s7  ;;  %s2067_s8 = spop %2066  ;;  %v1553_v55 = vcvt.f32.s32 %v1551_v52  ;;  %v1507_v43 = vadd.s32 %v1506_v49, %v1504_v32 }
 0x24e   : > { %v894_v16 = vsel %vm892_vm10, %v893_v4, 0  ;;  %v911_v12 = vstv %s2067_s8  ;;  %v1552_v42 = vcvt.f32.s32 %v1549_v31  ;;  %vm1242_vm10 = vcmp.eq.s32.totalorder %v2439_v27, 35 }
 0x24f   : > { %v895_v40 = vadd.s32 %v894_v16, %v865_v54  ;;  %v1554_v28 = vshll.u32 %v1553_v55, 16  ;;  %v912_v22 = vsel %vm910_vm11, %v911_v12, 0  ;;  %2116 = vpush %v1507_v43  ;;  %vm1272_vm11 = vcmp.eq.s32.totalorder %v2439_v27, 36 }
 0x250   : > { %v1567_v9 = vpop.xlane.xlu0 %1566  ;;  %s2069_s15 = spop %2068  ;;  %v1569_v20 = vpop.xlane.xlu1 %1568  ;;  %2118 = vpush %v3030_v61 }
 0x251   : > { %v913_v33 = vadd.s32 %v912_v22, %v895_v40  ;;  %v940_v45 = vstv %s2069_s15  ;;  %s2071_s16 = spop %2070  ;;  %v1571_v8 = vcvt.f32.s32 %v1569_v20  ;;  %v1555_v2 = vadd.s32 %v1554_v28, %v1552_v42 }
 0x252   : > { %v941_v38 = vsel %vm939_vm12, %v940_v45, 0  ;;  %v958_v50 = vstv %s2071_s16  ;;  %v1570_v35 = vcvt.f32.s32 %v1567_v9  ;;  %vm1290_vm12 = vcmp.eq.s32.totalorder %v2439_v27, 37 }
 0x253   : > { %v942_v11 = vadd.s32 %v941_v38, %v913_v33  ;;  %v1572_v10 = vshll.u32 %v1571_v8, 16  ;;  %v959_v62 = vsel %vm957_vm13, %v958_v50, 0  ;;  %2120 = vpush %v1555_v2  ;;  %vm1319_vm13 = vcmp.eq.s32.totalorder %v2439_v27, 38 }
 0x254   : > { %v1596_v14 = vpop.xlane.xlu0 %1595  ;;  %s2073_s18 = spop %2072  ;;  %v1598_v37 = vpop.xlane.xlu1 %1597 }
 0x255   : > { %v960_v7 = vadd.s32 %v959_v62, %v942_v11  ;;  %v988_v61 = vstv %s2073_s18  ;;  %s2075_s20 = spop %2074  ;;  %v1600_v58 = vcvt.f32.s32 %v1598_v37  ;;  %v1573_v63 = vadd.s32 %v1572_v10, %v1570_v35 }
 0x256   : > { %v989_v29 = vsel %vm987_vm14, %v988_v61, 0  ;;  %v1006_v18 = vstv %s2075_s20  ;;  %v1599_v36 = vcvt.f32.s32 %v1596_v14  ;;  %vm1337_vm14 = vcmp.eq.s32.totalorder %v2439_v27, 39 }
 0x257   : > { %v990_v25 = vadd.s32 %v989_v29, %v960_v7  ;;  %v1601_v21 = vshll.u32 %v1600_v58, 16  ;;  %v1007_v19 = vsel %vm1005_vm15, %v1006_v18, 0  ;;  %2122 = vpush %v1573_v63  ;;  %vm1367_vm15 = vcmp.eq.s32.totalorder %v2439_v27, 40 }
 0x258   : > { %v1614_v48 = vpop.xlane.xlu0 %1613  ;;  %s2077_s23 = spop %2076  ;;  %v1616_v30 = vpop.xlane.xlu1 %1615 }
 0x259   : > { %v1008_v59 = vadd.s32 %v1007_v19, %v990_v25  ;;  %v1035_v24 = vstv %s2077_s23  ;;  %s2079_s24 = spop %2078  ;;  %v1618_v26 = vcvt.f32.s32 %v1616_v30  ;;  %v1602_v15 = vadd.s32 %v1601_v21, %v1599_v36 }
 0x25a   : > { %v1036_v6 = vsel %vm1034_vm0, %v1035_v24, 0  ;;  %v1053_v53 = vstv %s2079_s24  ;;  %v1617_v51 = vcvt.f32.s32 %v1614_v48  ;;  %vm1385_vm0 = vcmp.eq.s32.totalorder %v2439_v27, 41 }
 0x25b   : > { %v1037_v46 = vadd.s32 %v1036_v6, %v1008_v59  ;;  %v1619_v3 = vshll.u32 %v1618_v26, 16  ;;  %v1054_v44 = vsel %vm1052_vm1, %v1053_v53, 0  ;;  %2124 = vpush %v1602_v15  ;;  %vm1414_vm1 = vcmp.eq.s32.totalorder %v2439_v27, 42 }
 0x25c   : > { %v1644_v41 = vpop.xlane.xlu0 %1643  ;;  %s2081_s25 = spop %2080  ;;  %v1646_v57 = vpop.xlane.xlu1 %1645 }
 0x25d   : > { %v1055_v17 = vadd.s32 %v1054_v44, %v1037_v46  ;;  %v1083_v60 = vstv %s2081_s25  ;;  %s2083_s26 = spop %2082  ;;  %v1648_v23 = vcvt.f32.s32 %v1646_v57  ;;  %v1620_v5 = vadd.s32 %v1619_v3, %v1617_v51 }
 0x25e   : > { %v1084_v47 = vsel %vm1082_vm2, %v1083_v60, 0  ;;  %v1101_v0 = vstv %s2083_s26  ;;  %v1647_v56 = vcvt.f32.s32 %v1644_v41  ;;  %vm1432_vm2 = vcmp.eq.s32.totalorder %v2439_v27, 43 }
 0x25f   : > { %v1085_v34 = vadd.s32 %v1084_v47, %v1055_v17  ;;  %v1649_v1 = vshll.u32 %v1648_v23, 16  ;;  %v1102_v39 = vsel %vm1100_vm3, %v1101_v0, 0  ;;  %2126 = vpush %v1620_v5  ;;  %vm1462_vm3 = vcmp.eq.s32.totalorder %v2439_v27, 44 }
 0x260   : > { %v1662_v49 = vpop.xlane.xlu0 %1661  ;;  %v1664_v32 = vpop.xlane.xlu1 %1663  ;;  %s2085_s28 = spop %2084 }
 0x261   : > { %v1103_v13 = vadd.s32 %v1102_v39, %v1085_v34  ;;  %v1666_v31 = vcvt.f32.s32 %v1664_v32  ;;  %v1650_v52 = vadd.s32 %v1649_v1, %v1647_v56  ;;  %v1130_v54 = vstv %s2085_s28  ;;  %s2087_s29 = spop %2086 }
 0x262   : > { %v1665_v4 = vcvt.f32.s32 %v1662_v49  ;;  %v1131_v55 = vsel %vm1129_vm5, %v1130_v54, 0  ;;  %v1148_v16 = vstv %s2087_s29  ;;  %vm1480_vm5 = vcmp.eq.s32.totalorder %v2439_v27, 45 }
 0x263   : > { %v1667_v12 = vshll.u32 %v1666_v31, 16  ;;  %2128 = vpush %v1650_v52  ;;  %v1132_v43 = vadd.s32 %v1131_v55, %v1103_v13  ;;  %v1149_v42 = vsel %vm1147_vm6, %v1148_v16, 0  ;;  %vm1509_vm6 = vcmp.eq.s32.totalorder %v2439_v27, 46 }
 0x264   : > { %v1691_v40 = vpop.xlane.xlu0 %1690  ;;  %v1693_v28 = vpop.xlane.xlu1 %1692  ;;  %s2089_s3 = spop %2088 }
 0x265   : > { %v1695_v22 = vcvt.f32.s32 %v1693_v28  ;;  %v1668_v9 = vadd.s32 %v1667_v12, %v1665_v4  ;;  %v1150_v20 = vadd.s32 %v1149_v42, %v1132_v43  ;;  %v1178_v33 = vstv %s2089_s3  ;;  %s2091_s4 = spop %2090 }
 0x266   : > { %v1694_v45 = vcvt.f32.s32 %v1691_v40  ;;  %v1179_v8 = vsel %vm1177_vm7, %v1178_v33, 0  ;;  %v1196_v38 = vstv %s2091_s4  ;;  %vm1527_vm7 = vcmp.eq.s32.totalorder %v2439_v27, 47 }
 0x267   : > { %v1696_v50 = vshll.u32 %v1695_v22, 16  ;;  %2130 = vpush %v1668_v9  ;;  %v1180_v2 = vadd.s32 %v1179_v8, %v1150_v20  ;;  %v1197_v35 = vsel %vm1195_vm8, %v1196_v38, 0  ;;  %vm1557_vm8 = vcmp.eq.s32.totalorder %v2439_v27, 48 }
 0x268   : > { %v1709_v11 = vpop.xlane.xlu0 %1708  ;;  %v1711_v10 = vpop.xlane.xlu1 %1710  ;;  %s2093_s5 = spop %2092 }
 0x269   : > { %v1713_v62 = vcvt.f32.s32 %v1711_v10  ;;  %v1697_v14 = vadd.s32 %v1696_v50, %v1694_v45  ;;  %v1198_v37 = vadd.s32 %v1197_v35, %v1180_v2  ;;  %v1225_v7 = vstv %s2093_s5  ;;  %s2095_s6 = spop %2094 }
 0x26a   : > { %v1712_v61 = vcvt.f32.s32 %v1709_v11  ;;  %v1226_v58 = vsel %vm1224_vm9, %v1225_v7, 0  ;;  %v1243_v21 = vstv %s2095_s6  ;;  %vm1575_vm9 = vcmp.eq.s32.totalorder %v2439_v27, 49 }
 0x26b   : > { %v1714_v29 = vshll.u32 %v1713_v62, 16  ;;  %2132 = vpush %v1697_v14  ;;  %v1227_v25 = vadd.s32 %v1226_v58, %v1198_v37  ;;  %v1244_v24 = vsel %vm1242_vm10, %v1243_v21, 0  ;;  %vm1604_vm10 = vcmp.eq.s32.totalorder %v2439_v27, 50 }
 0x26c   : > { %v1739_v18 = vpop.xlane.xlu0 %1738  ;;  %v1741_v63 = vpop.xlane.xlu1 %1740  ;;  %s2097_s7 = spop %2096 }
 0x26d   : > { %v1743_v36 = vcvt.f32.s32 %v1741_v63  ;;  %v1715_v19 = vadd.s32 %v1714_v29, %v1712_v61  ;;  %v1742_v48 = vcvt.f32.s32 %v1739_v18  ;;  %v1273_v30 = vstv %s2097_s7  ;;  %s2099_s8 = spop %2098 }
 0x26e   : > { %v1245_v53 = vadd.s32 %v1244_v24, %v1227_v25  ;;  %v1274_v3 = vsel %vm1272_vm11, %v1273_v30, 0  ;;  %v1291_v60 = vstv %s2099_s8  ;;  %vm1622_vm11 = vcmp.eq.s32.totalorder %v2439_v27, 51 }
 0x26f   : > { %v1744_v59 = vshll.u32 %v1743_v36, 16  ;;  %2134 = vpush %v1715_v19  ;;  %v1292_v34 = vsel %vm1290_vm12, %v1291_v60, 0  ;;  %vm1652_vm12 = vcmp.eq.s32.totalorder %v2439_v27, 52 }
 0x270   : > { %v1757_v26 = vpop.xlane.xlu0 %1756  ;;  %v1759_v6 = vpop.xlane.xlu1 %1758  ;;  %s2101_s15 = spop %2100  ;;  %v1275_v17 = vadd.s32 %v1274_v3, %v1245_v53 }
 0x271   : > { %v1761_v15 = vcvt.f32.s32 %v1759_v6  ;;  %v1745_v46 = vadd.s32 %v1744_v59, %v1742_v48  ;;  %v1760_v51 = vcvt.f32.s32 %v1757_v26  ;;  %v1320_v0 = vstv %s2101_s15  ;;  %s2103_s16 = spop %2102 }
 0x272   : > { %v1293_v49 = vadd.s32 %v1292_v34, %v1275_v17  ;;  %v1321_v31 = vsel %vm1319_vm13, %v1320_v0, 0  ;;  %v1338_v12 = vstv %s2103_s16  ;;  %vm1670_vm13 = vcmp.eq.s32.totalorder %v2439_v27, 53 }
 0x273   : > { %v1762_v44 = vshll.u32 %v1761_v15, 16  ;;  %2136 = vpush %v1745_v46  ;;  %v1339_v9 = vsel %vm1337_vm14, %v1338_v12, 0  ;;  %vm1699_vm14 = vcmp.eq.s32.totalorder %v2439_v27, 54 }
 0x274   : > { %v1786_v41 = vpop.xlane.xlu0 %1785  ;;  %v1788_v57 = vpop.xlane.xlu1 %1787  ;;  %s2105_s18 = spop %2104  ;;  %v1322_v16 = vadd.s32 %v1321_v31, %v1293_v49 }
 0x275   : > { %v1790_v23 = vcvt.f32.s32 %v1788_v57  ;;  %v1763_v47 = vadd.s32 %v1762_v44, %v1760_v51  ;;  %v1789_v5 = vcvt.f32.s32 %v1786_v41  ;;  %v1368_v28 = vstv %s2105_s18  ;;  %s2107_s20 = spop %2106 }
 0x276   : > { %v1340_v45 = vadd.s32 %v1339_v9, %v1322_v16  ;;  %v1369_v50 = vsel %vm1367_vm15, %v1368_v28, 0  ;;  %v1386_v14 = vstv %s2107_s20  ;;  %vm1717_vm15 = vcmp.eq.s32.totalorder %v2439_v27, 55 }
 0x277   : > { %v1791_v56 = vshll.u32 %v1790_v23, 16  ;;  %2138 = vpush %v1763_v47  ;;  %v1387_v18 = vsel %vm1385_vm0, %v1386_v14, 0  ;;  %vm1747_vm0 = vcmp.eq.s32.totalorder %v2439_v27, 56 }
 0x278   : > { %v1804_v1 = vpop.xlane.xlu0 %1803  ;;  %v1806_v39 = vpop.xlane.xlu1 %1805  ;;  %s2109_s23 = spop %2108  ;;  %v1370_v62 = vadd.s32 %v1369_v50, %v1340_v45 }
 0x279   : > { %v1808_v32 = vcvt.f32.s32 %v1806_v39  ;;  %v1792_v13 = vadd.s32 %v1791_v56, %v1789_v5  ;;  %v1807_v52 = vcvt.f32.s32 %v1804_v1  ;;  %v1415_v61 = vstv %s2109_s23  ;;  %s2111_s24 = spop %2110 }
 0x27a   : > { %v1388_v21 = vadd.s32 %v1387_v18, %v1370_v62  ;;  %v1416_v48 = vsel %vm1414_vm1, %v1415_v61, 0  ;;  %v1433_v26 = vstv %s2111_s24  ;;  %vm1765_vm1 = vcmp.eq.s32.totalorder %v2439_v27, 57 }
 0x27b   : > { %v1809_v54 = vshll.u32 %v1808_v32, 16  ;;  %2140 = vpush %v1792_v13  ;;  %v1434_v15 = vsel %vm1432_vm2, %v1433_v26, 0  ;;  %vm1794_vm2 = vcmp.eq.s32.totalorder %v2439_v27, 58  ;;  %v1911_v26 = vld [vmem:[%s3074_s30] sm:$0x1] }
 0x27c   : > { %v1834_v4 = vpop.xlane.xlu0 %1833  ;;  %v1836_v55 = vpop.xlane.xlu1 %1835  ;;  %s2113_s25 = spop %2112  ;;  %v1417_v24 = vadd.s32 %v1416_v48, %v1388_v21 }
 0x27d   : > { %v1838_v43 = vcvt.f32.s32 %v1836_v55  ;;  %v1810_v40 = vadd.s32 %v1809_v54, %v1807_v52  ;;  %v1837_v42 = vcvt.f32.s32 %v1834_v4  ;;  %v1463_v53 = vstv %s2113_s25  ;;  %s2115_s26 = spop %2114 }
 0x27e   : > { %v1435_v46 = vadd.s32 %v1434_v15, %v1417_v24  ;;  %v1464_v3 = vsel %vm1462_vm3, %v1463_v53, 0  ;;  %v1481_v44 = vstv %s2115_s26  ;;  %vm1812_vm3 = vcmp.eq.s32.totalorder %v2439_v27, 59 }
 0x27f   : > { %v1839_v22 = vshll.u32 %v1838_v43, 16  ;;  %2142 = vpush %v1810_v40  ;;  %v1482_v57 = vsel %vm1480_vm5, %v1481_v44, 0  ;;  %vm1842_vm5 = vcmp.eq.s32.totalorder %v2439_v27, 60 }
 0x280   : > { %v1852_v20 = vpop.xlane.xlu0 %1851  ;;  %v1854_v33 = vpop.xlane.xlu1 %1853  ;;  %s2117_s28 = spop %2116  ;;  %v1465_v51 = vadd.s32 %v1464_v3, %v1435_v46 }
 0x281   : > { %v1856_v8 = vcvt.f32.s32 %v1854_v33  ;;  %v1840_v38 = vadd.s32 %v1839_v22, %v1837_v42  ;;  %v1855_v2 = vcvt.f32.s32 %v1852_v20  ;;  %v1510_v41 = vstv %s2117_s28  ;;  %s2119_s29 = spop %2118 }
 0x282   : > { %v1483_v17 = vadd.s32 %v1482_v57, %v1465_v51  ;;  %v1511_v60 = vsel %vm1509_vm6, %v1510_v41, 0  ;;  %v1528_v47 = vstv %s2119_s29  ;;  %vm1860_vm6 = vcmp.eq.s32.totalorder %v2439_v27, 61 }
 0x283   : > { %v1857_v11 = vshll.u32 %v1856_v8, 16  ;;  %2144 = vpush %v1840_v38  ;;  %v1529_v5 = vsel %vm1527_vm7, %v1528_v47, 0  ;;  %vm1889_vm7 = vcmp.eq.s32.totalorder %v2439_v27, 62 }
 0x284   : > { %v1881_v10 = vpop.xlane.xlu0 %1880  ;;  %v1883_v35 = vpop.xlane.xlu1 %1882  ;;  %s2121_s3 = spop %2120  ;;  %v1512_v23 = vadd.s32 %v1511_v60, %v1483_v17 }
 0x285   : > { %v1885_v37 = vcvt.f32.s32 %v1883_v35  ;;  %v1858_v7 = vadd.s32 %v1857_v11, %v1855_v2  ;;  %v1884_v58 = vcvt.f32.s32 %v1881_v10  ;;  %v1558_v0 = vstv %s2121_s3  ;;  %s2021_s3 = sshll.u32 %s2293_s12, 4 }
 0x286   : > { %v1530_v56 = vadd.s32 %v1529_v5, %v1512_v23  ;;  %v1559_v1 = vsel %vm1557_vm8, %v1558_v0, 0  ;;  %vm1907_vm8 = vcmp.eq.s32.totalorder %v2439_v27, 63 }
 0x287   : > { %v1886_v29 = vshll.u32 %v1885_v37, 16  ;;  %2146 = vpush %v1858_v7 }
 0x288   : > { %v1899_v63 = vpop.xlane.xlu0 %1898  ;;  %v1901_v25 = vpop.xlane.xlu1 %1900  ;;  %s2123_s4 = spop %2122  ;;  %v1560_v32 = vadd.s32 %v1559_v1, %v1530_v56 }
 0x289   : > { %v1903_v36 = vcvt.f32.s32 %v1901_v25  ;;  %v1887_v19 = vadd.s32 %v1886_v29, %v1884_v58  ;;  %v1902_v30 = vcvt.f32.s32 %v1899_v63  ;;  %v1576_v34 = vstv %s2123_s4  ;;  %s1929_s4 = sshll.u32 %s3074_s30, 4  ;;  %s1930_s4 = int_to_ptr.vmem [resolvable:$true] %s1929_s4 }
 0x28a   : > { %v1577_v49 = vsel %vm1575_vm9, %v1576_v34, 0 }
 0x28b   : > { %v1904_v59 = vshll.u32 %v1903_v36, 16  ;;  %2148 = vpush %v1887_v19  ;;  %v1578_v52 = vadd.s32 %v1577_v49, %v1560_v32 }
 0x28c   : > { %s2125_s5 = spop %2124 }
 0x28d   : > { %v1905_v6 = vadd.s32 %v1904_v59, %v1902_v30  ;;  %v1605_v39 = vstv %s2125_s5 }
 0x28e   : > { %v1606_v31 = vsel %vm1604_vm10, %v1605_v39, 0 }
 0x28f   : > { %2150 = vpush %v1905_v6  ;;  %v1607_v55 = vadd.s32 %v1606_v31, %v1578_v52 }
 0x290   : > { %s2127_s6 = spop %2126 }
 0x291   : > { %v1623_v13 = vstv %s2127_s6 }
 0x292   : > { %v1624_v4 = vsel %vm1622_vm11, %v1623_v13, 0 }
 0x293   : > { %v1625_v43 = vadd.s32 %v1624_v4, %v1607_v55 }
 0x294   : > { %s2129_s7 = spop %2128 }
 0x295   : > { %v1653_v54 = vstv %s2129_s7  ;;  %s1927_s7 = scalar_lea.hbm %s3179_s2, %s2021_s3 }
 0x296   : > { %v1654_v12 = vsel %vm1652_vm12, %v1653_v54, 0 }
 0x297   : > { %v1655_v42 = vadd.s32 %v1654_v12, %v1625_v43 }
 0x298   : > { %s2131_s8 = spop %2130 }
 0x299   : > { %v1671_v16 = vstv %s2131_s8  ;;  %s1916_s8 = scalar_lea.sflag [#allocation3], %s182_s27 }
 0x29a   : > { %v1672_v28 = vsel %vm1670_vm13, %v1671_v16, 0 }
 0x29b   : > { %v1673_v20 = vadd.s32 %v1672_v28, %v1655_v42 }
 0x29c   : > { %s2133_s15 = spop %2132 }
 0x29d   : > { %v1700_v40 = vstv %s2133_s15  ;;  %s2225_s15 = scalar_lea.vmem %s1930_s4, 16 }
 0x29e   : > { %v1701_v9 = vsel %vm1699_vm14, %v1700_v40, 0  ;;  %p2226_p12 = scmp.ne.s32.totalorder %s1930_s4, %s2225_s15 }
 0x29f   : > { %v1702_v8 = vadd.s32 %v1701_v9, %v1673_v20 }
 0x2a0   : > { %s2135_s16 = spop %2134  ;;  %p2227_p13 = pnand %p2226_p12, %p2365_p4 }
 0x2a1   : > { %v1718_v22 = vstv %s2135_s16  ;;  %s2309_s16 = smov [#allocation2]  }
 0x2a2   : > { %v1719_v45 = vsel %vm1717_vm15, %v1718_v22, 0  ;;  %p2228_p0 = pneg %p2227_p13 }
 0x2a3   : > { %v1720_v2 = vadd.s32 %v1719_v45, %v1702_v8 }
 0x2a4   : > { %s2137_s18 = spop %2136 }
 0x2a5   : > { %v1748_v33 = vstv %s2137_s18  ;;  %s2229_s18 = sshll.u32 %s2309_s16, 4  ;;  %s2230_s18 = int_to_ptr.vmem [resolvable:$false] %s2229_s18 }
 0x2a6   : > { %v1749_v50 = vsel %vm1747_vm0, %v1748_v33, 0  ;;  %s2231_s12 = scalar_lea.vmem %s2230_s18, 32  ;;  %p2232_p1 = scmp.lt.s32.totalorder %s1930_s4, %s2230_s18 }
 0x2a7   : > { %v1750_v35 = vadd.s32 %v1749_v50, %v1720_v2  ;;  %p2233_p2 = scmp.lt.s32.totalorder %s2231_s12, %s2225_s15 }
 0x2a8   : > { %s2139_s20 = spop %2138 }
 0x2a9   : > { %v1766_v38 = vstv %s2139_s20  ;;  %p2234_p3 = por %p2233_p2, %p2232_p1 }
 0x2aa   : > { %v1767_v10 = vsel %vm1765_vm1, %v1766_v38, 0 }
 0x2ab   : > { %v1768_v37 = vadd.s32 %v1767_v10, %v1750_v35  ;;  %p2235_p5 = pnand %p2234_p3, %p2228_p0 }
 0x2ac   : > { %s2141_s23 = spop %2140 }
 0x2ad   : > { %v1795_v11 = vstv %s2141_s23 }
 0x2ae   : > { %v1796_v14 = vsel %vm1794_vm2, %v1795_v11, 0 }
 0x2af   : > { %v1797_v58 = vadd.s32 %v1796_v14, %v1768_v37 }
 0x2b0   : > { %s2143_s24 = spop %2142 }
 0x2b1   : > { %v1813_v62 = vstv %s2143_s24 }
 0x2b2   : > { %v1814_v61 = vsel %vm1812_vm3, %v1813_v62, 0 }
 0x2b3   : > { %v1815_v63 = vadd.s32 %v1814_v61, %v1797_v58 }
 0x2b4   : > { %s2145_s25 = spop %2144 }
 0x2b5   : > { %v1843_v7 = vstv %s2145_s25 }
 0x2b6   : > { %v1844_v18 = vsel %vm1842_vm5, %v1843_v7, 0 }
 0x2b7   : > { %v1845_v21 = vadd.s32 %v1844_v18, %v1815_v63 }
 0x2b8   : > { %s2147_s26 = spop %2146 }
 0x2b9   : > { %v1861_v29 = vstv %s2147_s26 }
 0x2ba   : > { %v1862_v25 = vsel %vm1860_vm6, %v1861_v29, 0 }
 0x2bb   : > { %v1863_v48 = vadd.s32 %v1862_v25, %v1845_v21 }
 0x2bc   : > { %s2149_s28 = spop %2148 }
 0x2bd   : > { %v1890_v36 = vstv %s2149_s28 }
 0x2be   : > { %v1891_v19 = vsel %vm1889_vm7, %v1890_v36, 0 }
 0x2bf   : > { %v1892_v30 = vadd.s32 %v1891_v19, %v1863_v48 }
 0x2c0   : > { %s2151_s29 = spop %2150 }
 0x2c1   : > { %v1908_v59 = vstv %s2151_s29 }
 0x2c2   : > { %v1909_v24 = vsel %vm1907_vm8, %v1908_v59, 0 }
 0x2c3   : > { %v1910_v6 = vadd.s32 %v1909_v24, %v1892_v30 }
 0x2c5   : > { %v1912_v53 = vadd.s32 %v1911_v26, %v1910_v6 }
 0x2c7   : > { %1914 = vst.msk [vmem:[%s3074_s30] sm:$0x1] %vm202_vm4, %v1912_v53 }
 0x2c8   : > { %2238 = shalt.err (!%p2235_p5)
}
 0x2c9   : > { %s2239_s20 = scalar_lea.hbm %s1927_s7, 16  ;;  %s2243_s23 = scalar_lea.hbm %s3179_s2, 32 }
 0x2ca   : > { %p2240_p6 = scmp.ne.s32.totalorder %s1927_s7, %s2239_s20  ;;  %p2244_p10 = scmp.lt.s32.totalorder %s1927_s7, %s3179_s2 }
 0x2cb   : > { %p2245_p11 = scmp.lt.s32.totalorder %s2243_s23, %s2239_s20 }
 0x2cc   : > { %p2241_p7 = pnand %p2240_p6, %p2365_p4 }
 0x2cd   : > { %p2246_p12 = por %p2245_p11, %p2244_p10 }
 0x2ce   : > { %p2242_p9 = pneg %p2241_p7 }
 0x2d0   : > { %p2247_p13 = pnand %p2246_p12, %p2242_p9 }
 0x2d2   : > { %2250 = shalt.err (!%p2247_p13)
}
 0x2d3   : > { %2152 = dma.vmem_to_hbm [thread:$0]  (%p2365_p4), %s1930_s4, 16, %s1927_s7, %s1916_s8  }
 0x2d4 PF: > { %p2158_p0 = scmp.ge.s32.totalorder %s2301_s14, 2  ;;  %s1941_s26 = sand.u32 1, %s2281_s9  }
 0x2d5   : > { %s1942_s28 = scalar_lea.sflag [#allocation3], %s1941_s26 }
 0x2d6   : > { %p2155_p1 = pnand %p2158_p0, %p2372_p8 }
 0x2d8   : > { %p2156_p2 = pneg %p2155_p1 }
 0x2da   : > { %2276 = dma.done.wait (%p2156_p2), %s1942_s28, 16  }
 0x2db   : > { %2278 = vsyncadd (%p2156_p2), %s1942_s28, 4294967280  ;;  %s15_s14 = sadd.s32 1, %s2301_s14   ;;  %s3206_s9 = smov %s2285_s10 }
 0x2dc   : > { %p12_p3 = scmp.ge.s32.totalorder %s15_s14, 4   ;;  %s3207_s10 = smov %s2289_s11 }
 0x2dd   : > { %s3208_s11 = smov %s2378_s22  ;;  %s3209_s12 = smov %s2297_s13 }
 0x2de   : > { %s3210_s13 = smov %s3212_s17  ;;  %14 = sbr.rel (!%p12_p3) target bundleno = 4 (0x4), region = 70 }
 0x2e3   :  { %1946 = vsyncpa [#allocation3], 1 }
 0x2e4   :  { %1948 = vsyncpa [#allocation3 + $0x1], 1 }

</bundles_post_ra>
